<compile_context>
chip_gen: v7x
topology: tpu7x:2x2x1
jax: 0.10.0
libtpu: 0.0.40
codegen_flags: <defaults>
</compile_context>

<pallas_src>
import numpy as np
import jax
import jax.numpy as jnp
from jax.experimental import pallas as pl
from jax.experimental.pallas import tpu as pltpu


# ------------------------------ wavelet filters / matrices ------------------------------

def haar_1d_filters():
    """db1 1-D filters with the same reversals as create_wavelet_filter."""
    s = 1.0 / np.sqrt(2.0)
    dec_lo_p = np.array([s, s], np.float64)
    dec_hi_p = np.array([-s, s], np.float64)
    rec_lo_p = np.array([s, s], np.float64)
    rec_hi_p = np.array([s, -s], np.float64)
    dec_lo = dec_lo_p[::-1]            # torch: reversed
    dec_hi = dec_hi_p[::-1]
    rec_lo = rec_lo_p[::-1][::-1]      # reversed then flipped back (== original)
    rec_hi = rec_hi_p[::-1][::-1]
    return dec_lo, dec_hi, rec_lo, rec_hi


def make_haar_filters():
    """2x2 filter stacks [LL, LH, HL, HH] (used only by the pure-JAX reference)."""
    dec_lo, dec_hi, rec_lo, rec_hi = haar_1d_filters()
    dec = np.stack([np.outer(dec_lo, dec_lo), np.outer(dec_hi, dec_lo),
                    np.outer(dec_lo, dec_hi), np.outer(dec_hi, dec_hi)], 0)
    rec = np.stack([np.outer(rec_lo, rec_lo), np.outer(rec_hi, rec_lo),
                    np.outer(rec_lo, rec_hi), np.outer(rec_hi, rec_hi)], 0)
    return dec.astype(np.float32), rec.astype(np.float32)


def make_haar_matrices(H, W):
    """Row/col DWT and IDWT matrices; the parity zero-pad (DWT) and the crop back to
    (H, W) (IDWT) are folded into the matrices, so the kernel never materializes them."""
    dec_lo, dec_hi, rec_lo, rec_hi = haar_1d_filters()
    H2, W2 = (H + 1) // 2, (W + 1) // 2
    Rl = np.zeros((H2, H), np.float32); Rh = np.zeros((H2, H), np.float32)
    Ul = np.zeros((H, H2), np.float32); Uh = np.zeros((H, H2), np.float32)
    for i in range(H2):
        for p in range(2):
            h = 2 * i + p
            if h < H:
                Rl[i, h] = dec_lo[p]; Rh[i, h] = dec_hi[p]
                Ul[h, i] = rec_lo[p]; Uh[h, i] = rec_hi[p]
    ClT = np.zeros((W, W2), np.float32); ChT = np.zeros((W, W2), np.float32)
    VlT = np.zeros((W2, W), np.float32); VhT = np.zeros((W2, W), np.float32)
    for j in range(W2):
        for q in range(2):
            w = 2 * j + q
            if w < W:
                ClT[w, j] = dec_lo[q]; ChT[w, j] = dec_hi[q]
                VlT[j, w] = rec_lo[q]; VhT[j, w] = rec_hi[q]
    return dict(Rl=Rl, Rh=Rh, ClT=ClT, ChT=ChT, Ul=Ul, Uh=Uh, VlT=VlT, VhT=VhT)


# ------------------------------ fused WTConv2d kernel ------------------------------

def wtconv_fused_kernel(x_ref, bw_ref, bb_ref, bs_ref,
                        rl_ref, rh_ref, clt_ref, cht_ref,
                        ww_ref, wb_ref, gw_ref, gb_ref, gs_ref,
                        ul_ref, uh_ref, vlt_ref, vht_ref,
                        o_ref, xp_scr, cp_scr):
    """Per-batch: base depthwise 3x3 + full single-level Haar wavelet branch + add."""
    _, C, H, W = x_ref.shape
    C4 = ww_ref.shape[1]
    H2 = rl_ref.shape[0]
    W2 = clt_ref.shape[1]
    G, pg = gw_ref.shape[0], gw_ref.shape[1]
    f32 = jnp.float32

    x = x_ref[0]                                         # (C, H, W)

    # ---- base path: depthwise 3x3 'same' + bias, * base_scale ----------------------
    # Halo is built in a VMEM scratch (no HBM-side jnp.pad pass).
    xp_scr[...] = jnp.zeros_like(xp_scr)
    xp_scr[:, 1:H + 1, 1:W + 1] = x
    xp = xp_scr[...]
    # Hoisted single broadcast of all 9 taps (no per-tap broadcast_in_dim in the loop).
    bw = jnp.broadcast_to(bw_ref[...], (9, C, H, W))
    base = bw[0] * xp[:, 0:H, 0:W]
    for k in range(1, 9):
        dy, dx = k // 3, k % 3
        base = base + bw[k] * xp[:, dy:dy + H, dx:dx + W]
    base = (base + bb_ref[...]) * bs_ref[...]

    # ---- Haar DWT as batched MXU matmuls --------------------------------------------
    # subband_j = Rrow_j @ x @ Ccol_j ; parity pad folded into the constant matrices,
    # so there is no HBM pad and no strided even/odd de-interleave.
    rl = jnp.broadcast_to(rl_ref[...][None], (C, H2, H))
    rh = jnp.broadcast_to(rh_ref[...][None], (C, H2, H))
    clt = jnp.broadcast_to(clt_ref[...][None], (C, W, W2))
    cht = jnp.broadcast_to(cht_ref[...][None], (C, W, W2))
    xr_lo = jnp.einsum('cih,chw->ciw', rl, x, preferred_element_type=f32)
    xr_hi = jnp.einsum('cih,chw->ciw', rh, x, preferred_element_type=f32)
    sb0 = jnp.einsum('ciw,cwj->cij', xr_lo, clt, preferred_element_type=f32)   # LL
    sb1 = jnp.einsum('ciw,cwj->cij', xr_hi, clt, preferred_element_type=f32)   # LH
    sb2 = jnp.einsum('ciw,cwj->cij', xr_lo, cht, preferred_element_type=f32)   # HL
    sb3 = jnp.einsum('ciw,cwj->cij', xr_hi, cht, preferred_element_type=f32)   # HH
    cx = jnp.stack([sb0, sb1, sb2, sb3], axis=1).reshape(C4, H2, W2)           # c*4+j

    # ---- wavelet depthwise 3x3 'same' + bias ----------------------------------------
    cp_scr[...] = jnp.zeros_like(cp_scr)
    cp_scr[:, 1:H2 + 1, 1:W2 + 1] = cx
    cp = cp_scr[...]
    ww = jnp.broadcast_to(ww_ref[...], (9, C4, H2, W2))
    acc = ww[0] * cp[:, 0:H2, 0:W2]
    for k in range(1, 9):
        dy, dx = k // 3, k % 3
        acc = acc + ww[k] * cp[:, dy:dy + H2, dx:dx + W2]
    dwy = acc + wb_ref[...]                              # (C4, H2, W2)

    # ---- grouped 1x1 (groups=8), TRUE grouped form (no dense C4xC4 expansion) -------
    # TODO(synk): for production channel counts hoist this to an MXU matmul in a
    # channels-last / spatially-flattened layout instead of VPU multiply-adds.
    dwy_g = dwy.reshape(G, pg, H2, W2)
    gw = gw_ref[...]                                     # (G, pg_out, pg_in, 1, 1)
    mix_g = gw[:, :, 0] * dwy_g[:, 0:1]
    for cl in range(1, pg):
        mix_g = mix_g + gw[:, :, cl] * dwy_g[:, cl:cl + 1]
    mixed = mix_g.reshape(C4, H2, W2)
    mixed = (mixed + gb_ref[...]) * gs_ref[...]          # bias, then 0.1 _ScaleModule

    # ---- Haar inverse DWT as batched MXU matmuls (crop folded into U/V) -------------
    y = mixed.reshape(C, 4, H2, W2)
    vlt = jnp.broadcast_to(vlt_ref[...][None], (C, W2, W))
    vht = jnp.broadcast_to(vht_ref[...][None], (C, W2, W))
    ul = jnp.broadcast_to(ul_ref[...][None], (C, H, H2))
    uh = jnp.broadcast_to(uh_ref[...][None], (C, H, H2))
    zlo = (jnp.einsum('cij,cjw->ciw', y[:, 0], vlt, preferred_element_type=f32)
           + jnp.einsum('cij,cjw->ciw', y[:, 2], vht, preferred_element_type=f32))
    zhi = (jnp.einsum('cij,cjw->ciw', y[:, 1], vlt, preferred_element_type=f32)
           + jnp.einsum('cij,cjw->ciw', y[:, 3], vht, preferred_element_type=f32))
    x_tag = (jnp.einsum('chi,ciw->chw', ul, zlo, preferred_element_type=f32)
             + jnp.einsum('chi,ciw->chw', uh, zhi, preferred_element_type=f32))

    o_ref[0] = base + x_tag


def wtconv2d_depthwise(x, p):
    """WTConv2d (wt_levels=1, k=3, stride=1): base + wavelet branch, fused in one call."""
    B, C, H, W = x.shape
    C4 = 4 * C
    H2, W2 = (H + 1) // 2, (W + 1) // 2

    def rep(shape):
        nd = len(shape)
        return pl.BlockSpec(shape, lambda b, _nd=nd: (0,) * _nd)

    ops = [p['base_w9'], p['base_b3'], p['base_s3'],
           p['Rl'], p['Rh'], p['ClT'], p['ChT'],
           p['wdw_w9'], p['wdw_b3'],
           p['wpw_wg'], p['wpw_b3'], p['wscale3'],
           p['Ul'], p['Uh'], p['VlT'], p['VhT']]
    in_specs = [pl.BlockSpec((1, C, H, W), lambda b: (b, 0, 0, 0))]
    in_specs += [rep(tuple(o.shape)) for o in ops]

    return pl.pallas_call(
        wtconv_fused_kernel,
        out_shape=jax.ShapeDtypeStruct((B, C, H, W), jnp.float32),
        grid=(B,),
        in_specs=in_specs,
        out_specs=pl.BlockSpec((1, C, H, W), lambda b: (b, 0, 0, 0)),
        scratch_shapes=[pltpu.VMEM((C, H + 2, W + 2), jnp.float32),
                        pltpu.VMEM((C4, H2 + 2, W2 + 2), jnp.float32)],
        compiler_params=pltpu.CompilerParams(
            dimension_semantics=("parallel",),          # batch axis -> v7x megacore
            vmem_limit_bytes=32 * 1024 * 1024),
    )(x, *ops)


# ------------------------------ pointwise 1x1 (MXU, lane-dense) ------------------------------

def pointwise_conv(x, w, *, mxu_dtype=jnp.float32):
    """1x1 conv (no bias) as (Cout,Cin) x (Cin, H*W) matmuls; spatial flattened so the
    output minor dim is a multiple of 128 (unmasked stores).  On v6e/v7x pass
    mxu_dtype=jnp.bfloat16 to double MXU throughput / halve activation DMA bytes."""
    B, C, H, W = x.shape
    S = H * W
    Cout = w.shape[0]
    xf = x.reshape(B, C, S)          # free (contiguous) reshape, no extra HBM pass

    def kernel(x_ref, w_ref, o_ref):
        xv = x_ref[0].astype(mxu_dtype)
        wv = w_ref[...].astype(mxu_dtype)
        o_ref[0] = jnp.dot(wv, xv, preferred_element_type=jnp.float32)

    out = pl.pallas_call(
        kernel,
        out_shape=jax.ShapeDtypeStruct((B, Cout, S), jnp.float32),
        grid=(B,),
        in_specs=[pl.BlockSpec((1, C, S), lambda b: (b, 0, 0)),
                  pl.BlockSpec((Cout, C), lambda b: (0, 0))],
        out_specs=pl.BlockSpec((1, Cout, S), lambda b: (b, 0, 0)),
        compiler_params=pltpu.CompilerParams(
            dimension_semantics=("parallel",),
            vmem_limit_bytes=32 * 1024 * 1024),
    )(xf, w)
    return out.reshape(B, Cout, H, W)


# ------------------------------ full forward ------------------------------

def depthwise_separable_wtconv_forward(x, params):
    comb = wtconv2d_depthwise(x, params)         # WTConv2d depthwise part
    return pointwise_conv(comb, params['pw_w'])  # 1x1 pointwise, bias-free


# --------------------------- pure-JAX reference ------------------------------

def ref_forward(x, p, dec, rec):
    hi = jax.lax.Precision.HIGHEST
    dn = ('NCHW', 'OIHW', 'NCHW')
    C = x.shape[1]

    def dwconv3x3(xin, w, b):
        y = jax.lax.conv_general_dilated(
            xin, w[:, None], (1, 1), 'SAME', dimension_numbers=dn,
            feature_group_count=xin.shape[1], precision=hi)
        return y + b[None, :, None, None]

    base = dwconv3x3(x, p['base_w'], p['base_b']) * p['base_scale'][None, :, None, None]

    dec_full = jnp.tile(jnp.asarray(dec, jnp.float32)[:, None], (C, 1, 1, 1))
    wt = jax.lax.conv_general_dilated(x, dec_full, (2, 2), 'VALID',
                                      dimension_numbers=dn,
                                      feature_group_count=C, precision=hi)

    dwy = dwconv3x3(wt, p['wdw_w'], p['wdw_b'])
    pw = jax.lax.conv_general_dilated(dwy, p['wpw_w'][:, :, None, None], (1, 1),
                                      'VALID', dimension_numbers=dn,
                                      feature_group_count=8, precision=hi)
    pw = (pw + p['wpw_b'][None, :, None, None]) * p['wscale'][None, :, None, None]

    rec_flip = jnp.asarray(rec, jnp.float32)[:, ::-1, ::-1]
    rec_w = jnp.tile(rec_flip[None], (C, 1, 1, 1))   # (C, 4, 2, 2)
    x_tag = jax.lax.conv_general_dilated(
        pw, rec_w, (1, 1), ((1, 1), (1, 1)), lhs_dilation=(2, 2),
        dimension_numbers=dn, feature_group_count=C, precision=hi)

    comb = base + x_tag
    return jnp.einsum('oi,bihw->bohw', p['pw_w'], comb, precision=hi)


# ----------------------------------- main -------------------------------------

if __name__ == "__main__":
    B, Cin, Cout, H, W = 2, 4, 8, 16, 16
    C4 = 4 * Cin
    pg = C4 // 8   # in/out channels per group of the grouped 1x1 (groups=8)

    key = jax.random.PRNGKey(0)
    ks = jax.random.split(key, 8)
    tparams = {
        'base_w': jax.random.normal(ks[0], (Cin, 3, 3), jnp.float32) * 0.1,
        'base_b': jax.random.normal(ks[1], (Cin,), jnp.float32) * 0.1,
        'base_scale': jnp.ones((Cin,), jnp.float32),                   # init_scale=1.0
        'wdw_w': jax.random.normal(ks[2], (C4, 3, 3), jnp.float32) * 0.1,
        'wdw_b': jax.random.normal(ks[3], (C4,), jnp.float32) * 0.1,
        'wpw_w': jax.random.normal(ks[4], (C4, pg), jnp.float32) * 0.1,
        'wpw_b': jax.random.normal(ks[5], (C4,), jnp.float32) * 0.1,
        'wscale': jnp.full((C4,), 0.1, jnp.float32),                   # init_scale=0.1
        'pw_w': jax.random.normal(ks[6], (Cout, Cin), jnp.float32) * 0.1,
    }
    x = jax.random.normal(ks[7], (B, Cin, H, W), jnp.float32)

    mats = make_haar_matrices(H, W)
    pparams = {
        'base_w9': jnp.transpose(tparams['base_w'].reshape(Cin, 9), (1, 0)).reshape(9, Cin, 1, 1),
        'base_b3': tparams['base_b'].reshape(Cin, 1, 1),
        'base_s3': tparams['base_scale'].reshape(Cin, 1, 1),
        'wdw_w9': jnp.transpose(tparams['wdw_w'].reshape(C4, 9), (1, 0)).reshape(9, C4, 1, 1),
        'wdw_b3': tparams['wdw_b'].reshape(C4, 1, 1),
        'wpw_wg': tparams['wpw_w'].reshape(8, pg, pg)[:, :, :, None, None],
        'wpw_b3': tparams['wpw_b'].reshape(C4, 1, 1),
        'wscale3': tparams['wscale'].reshape(C4, 1, 1),
        'pw_w': tparams['pw_w'],
    }
    for name, m in mats.items():
        pparams[name] = jnp.asarray(m)

    fwd = jax.jit(lambda xx: depthwise_separable_wtconv_forward(xx, pparams))
    out = jax.block_until_ready(fwd(x))
    assert out.shape == (B, Cout, H, W)

    dec, rec = make_haar_filters()
    ref = jax.block_until_ready(ref_forward(x, tparams, dec, rec))
    # Loose-ish tolerance: the in-kernel MXU matmuls run at default TPU matmul precision,
    # the reference uses Precision.HIGHEST; structural errors would be orders larger.
    np.testing.assert_allclose(np.asarray(out), np.asarray(ref), rtol=1e-2, atol=1e-2)

    print("KERNEL_OK")
</pallas_src>

<mosaic_0001>
module attributes {stable_mosaic.version = 11 : i64} {
  func.func @wtconv_fused_kernel(%arg0: i32, %arg1: memref<1x4x16x16xf32, #tpu.memory_space<vmem>>, %arg2: memref<9x4x1x1xf32, #tpu.memory_space<vmem>>, %arg3: memref<4x1x1xf32, #tpu.memory_space<vmem>>, %arg4: memref<4x1x1xf32, #tpu.memory_space<vmem>>, %arg5: memref<8x16xf32, #tpu.memory_space<vmem>>, %arg6: memref<8x16xf32, #tpu.memory_space<vmem>>, %arg7: memref<16x8xf32, #tpu.memory_space<vmem>>, %arg8: memref<16x8xf32, #tpu.memory_space<vmem>>, %arg9: memref<9x16x1x1xf32, #tpu.memory_space<vmem>>, %arg10: memref<16x1x1xf32, #tpu.memory_space<vmem>>, %arg11: memref<8x2x2x1x1xf32, #tpu.memory_space<vmem>>, %arg12: memref<16x1x1xf32, #tpu.memory_space<vmem>>, %arg13: memref<16x1x1xf32, #tpu.memory_space<vmem>>, %arg14: memref<16x8xf32, #tpu.memory_space<vmem>>, %arg15: memref<16x8xf32, #tpu.memory_space<vmem>>, %arg16: memref<8x16xf32, #tpu.memory_space<vmem>>, %arg17: memref<8x16xf32, #tpu.memory_space<vmem>>, %arg18: memref<1x4x16x16xf32, #tpu.memory_space<vmem>>, %arg19: memref<4x18x18xf32, #tpu.memory_space<vmem>>, %arg20: memref<16x10x10xf32, #tpu.memory_space<vmem>>) attributes {dimension_semantics = [#tpu.dimension_semantics<parallel>], iteration_bounds = array<i64: 2>, scalar_prefetch = 0 : i64, scratch_operands = 2 : i64, tpu.core_type = #tpu.core_type<tc>, window_params = [{transform_indices = @transform_0, window_bounds = array<i64: 1, 4, 16, 16>}, {pipeline_mode = #tpu.pipeline_mode<synchronous>, transform_indices = @transform_1, window_bounds = array<i64: 9, 4, 1, 1>}, {pipeline_mode = #tpu.pipeline_mode<synchronous>, transform_indices = @transform_2, window_bounds = array<i64: 4, 1, 1>}, {pipeline_mode = #tpu.pipeline_mode<synchronous>, transform_indices = @transform_3, window_bounds = array<i64: 4, 1, 1>}, {pipeline_mode = #tpu.pipeline_mode<synchronous>, transform_indices = @transform_4, window_bounds = array<i64: 8, 16>}, {pipeline_mode = #tpu.pipeline_mode<synchronous>, transform_indices = @transform_5, window_bounds = array<i64: 8, 16>}, {pipeline_mode = #tpu.pipeline_mode<synchronous>, transform_indices = @transform_6, window_bounds = array<i64: 16, 8>}, {pipeline_mode = #tpu.pipeline_mode<synchronous>, transform_indices = @transform_7, window_bounds = array<i64: 16, 8>}, {pipeline_mode = #tpu.pipeline_mode<synchronous>, transform_indices = @transform_8, window_bounds = array<i64: 9, 16, 1, 1>}, {pipeline_mode = #tpu.pipeline_mode<synchronous>, transform_indices = @transform_9, window_bounds = array<i64: 16, 1, 1>}, {pipeline_mode = #tpu.pipeline_mode<synchronous>, transform_indices = @transform_10, window_bounds = array<i64: 8, 2, 2, 1, 1>}, {pipeline_mode = #tpu.pipeline_mode<synchronous>, transform_indices = @transform_11, window_bounds = array<i64: 16, 1, 1>}, {pipeline_mode = #tpu.pipeline_mode<synchronous>, transform_indices = @transform_12, window_bounds = array<i64: 16, 1, 1>}, {pipeline_mode = #tpu.pipeline_mode<synchronous>, transform_indices = @transform_13, window_bounds = array<i64: 16, 8>}, {pipeline_mode = #tpu.pipeline_mode<synchronous>, transform_indices = @transform_14, window_bounds = array<i64: 16, 8>}, {pipeline_mode = #tpu.pipeline_mode<synchronous>, transform_indices = @transform_15, window_bounds = array<i64: 8, 16>}, {pipeline_mode = #tpu.pipeline_mode<synchronous>, transform_indices = @transform_16, window_bounds = array<i64: 8, 16>}, {transform_indices = @transform_17, window_bounds = array<i64: 1, 4, 16, 16>}]} {
    %c0 = arith.constant 0 : index
    %c0_0 = arith.constant 0 : index
    %c0_1 = arith.constant 0 : index
    %c0_2 = arith.constant 0 : index
    %0 = vector.load %arg1[%c0, %c0_0, %c0_1, %c0_2] : memref<1x4x16x16xf32, #tpu.memory_space<vmem>>, vector<1x4x16x16xf32>
    %1 = vector.shape_cast %0 : vector<1x4x16x16xf32> to vector<4x16x16xf32>
    %cst = arith.constant 0.000000e+00 : f32
    %2 = vector.broadcast %cst : f32 to vector<4x18x18xf32>
    %c0_3 = arith.constant 0 : index
    %c0_4 = arith.constant 0 : index
    %c0_5 = arith.constant 0 : index
    %3 = vector.load %arg19[%c0_3, %c0_4, %c0_5] : memref<4x18x18xf32, #tpu.memory_space<vmem>>, vector<4x18x18xf32>
    tpu.vector_store %arg19[%c0_3, %c0_4, %c0_5], %2 {strides = array<i32>} : memref<4x18x18xf32, #tpu.memory_space<vmem>>, vector<4x18x18xf32>,
    %c0_6 = arith.constant 0 : index
    %c1 = arith.constant 1 : index
    %c1_7 = arith.constant 1 : index
    %4 = vector.load %arg19[%c0_6, %c1, %c1_7] : memref<4x18x18xf32, #tpu.memory_space<vmem>>, vector<4x16x16xf32>
    tpu.vector_store %arg19[%c0_6, %c1, %c1_7], %1 {strides = array<i32>} : memref<4x18x18xf32, #tpu.memory_space<vmem>>, vector<4x16x16xf32>,
    %c0_8 = arith.constant 0 : index
    %c0_9 = arith.constant 0 : index
    %c0_10 = arith.constant 0 : index
    %5 = vector.load %arg19[%c0_8, %c0_9, %c0_10] : memref<4x18x18xf32, #tpu.memory_space<vmem>>, vector<4x18x18xf32>
    %c0_11 = arith.constant 0 : index
    %c0_12 = arith.constant 0 : index
    %c0_13 = arith.constant 0 : index
    %c0_14 = arith.constant 0 : index
    %6 = vector.load %arg2[%c0_11, %c0_12, %c0_13, %c0_14] : memref<9x4x1x1xf32, #tpu.memory_space<vmem>>, vector<9x4x1x1xf32>
    %7 = vector.shape_cast %6 : vector<9x4x1x1xf32> to vector<9x4x1x1xf32>
    %8 = vector.broadcast %7 : vector<9x4x1x1xf32> to vector<9x4x16x16xf32>
    %9 = vector.extract_strided_slice %8 {offsets = [0, 0, 0, 0], sizes = [1, 4, 16, 16], strides = [1, 1, 1, 1]} : vector<9x4x16x16xf32> to vector<1x4x16x16xf32>
    %10 = vector.shape_cast %9 : vector<1x4x16x16xf32> to vector<4x16x16xf32>
    %11 = vector.extract_strided_slice %5 {offsets = [0, 0, 0], sizes = [4, 16, 16], strides = [1, 1, 1]} : vector<4x18x18xf32> to vector<4x16x16xf32>
    %12 = arith.mulf %10, %11 : vector<4x16x16xf32>
    %13 = vector.extract_strided_slice %8 {offsets = [1, 0, 0, 0], sizes = [1, 4, 16, 16], strides = [1, 1, 1, 1]} : vector<9x4x16x16xf32> to vector<1x4x16x16xf32>
    %14 = vector.shape_cast %13 : vector<1x4x16x16xf32> to vector<4x16x16xf32>
    %15 = vector.extract_strided_slice %5 {offsets = [0, 0, 1], sizes = [4, 16, 16], strides = [1, 1, 1]} : vector<4x18x18xf32> to vector<4x16x16xf32>
    %16 = arith.mulf %14, %15 : vector<4x16x16xf32>
    %17 = arith.addf %12, %16 : vector<4x16x16xf32>
    %18 = vector.extract_strided_slice %8 {offsets = [2, 0, 0, 0], sizes = [1, 4, 16, 16], strides = [1, 1, 1, 1]} : vector<9x4x16x16xf32> to vector<1x4x16x16xf32>
    %19 = vector.shape_cast %18 : vector<1x4x16x16xf32> to vector<4x16x16xf32>
    %20 = vector.extract_strided_slice %5 {offsets = [0, 0, 2], sizes = [4, 16, 16], strides = [1, 1, 1]} : vector<4x18x18xf32> to vector<4x16x16xf32>
    %21 = arith.mulf %19, %20 : vector<4x16x16xf32>
    %22 = arith.addf %17, %21 : vector<4x16x16xf32>
    %23 = vector.extract_strided_slice %8 {offsets = [3, 0, 0, 0], sizes = [1, 4, 16, 16], strides = [1, 1, 1, 1]} : vector<9x4x16x16xf32> to vector<1x4x16x16xf32>
    %24 = vector.shape_cast %23 : vector<1x4x16x16xf32> to vector<4x16x16xf32>
    %25 = vector.extract_strided_slice %5 {offsets = [0, 1, 0], sizes = [4, 16, 16], strides = [1, 1, 1]} : vector<4x18x18xf32> to vector<4x16x16xf32>
    %26 = arith.mulf %24, %25 : vector<4x16x16xf32>
    %27 = arith.addf %22, %26 : vector<4x16x16xf32>
    %28 = vector.extract_strided_slice %8 {offsets = [4, 0, 0, 0], sizes = [1, 4, 16, 16], strides = [1, 1, 1, 1]} : vector<9x4x16x16xf32> to vector<1x4x16x16xf32>
    %29 = vector.shape_cast %28 : vector<1x4x16x16xf32> to vector<4x16x16xf32>
    %30 = vector.extract_strided_slice %5 {offsets = [0, 1, 1], sizes = [4, 16, 16], strides = [1, 1, 1]} : vector<4x18x18xf32> to vector<4x16x16xf32>
    %31 = arith.mulf %29, %30 : vector<4x16x16xf32>
    %32 = arith.addf %27, %31 : vector<4x16x16xf32>
    %33 = vector.extract_strided_slice %8 {offsets = [5, 0, 0, 0], sizes = [1, 4, 16, 16], strides = [1, 1, 1, 1]} : vector<9x4x16x16xf32> to vector<1x4x16x16xf32>
    %34 = vector.shape_cast %33 : vector<1x4x16x16xf32> to vector<4x16x16xf32>
    %35 = vector.extract_strided_slice %5 {offsets = [0, 1, 2], sizes = [4, 16, 16], strides = [1, 1, 1]} : vector<4x18x18xf32> to vector<4x16x16xf32>
    %36 = arith.mulf %34, %35 : vector<4x16x16xf32>
    %37 = arith.addf %32, %36 : vector<4x16x16xf32>
    %38 = vector.extract_strided_slice %8 {offsets = [6, 0, 0, 0], sizes = [1, 4, 16, 16], strides = [1, 1, 1, 1]} : vector<9x4x16x16xf32> to vector<1x4x16x16xf32>
    %39 = vector.shape_cast %38 : vector<1x4x16x16xf32> to vector<4x16x16xf32>
    %40 = vector.extract_strided_slice %5 {offsets = [0, 2, 0], sizes = [4, 16, 16], strides = [1, 1, 1]} : vector<4x18x18xf32> to vector<4x16x16xf32>
    %41 = arith.mulf %39, %40 : vector<4x16x16xf32>
    %42 = arith.addf %37, %41 : vector<4x16x16xf32>
    %43 = vector.extract_strided_slice %8 {offsets = [7, 0, 0, 0], sizes = [1, 4, 16, 16], strides = [1, 1, 1, 1]} : vector<9x4x16x16xf32> to vector<1x4x16x16xf32>
    %44 = vector.shape_cast %43 : vector<1x4x16x16xf32> to vector<4x16x16xf32>
    %45 = vector.extract_strided_slice %5 {offsets = [0, 2, 1], sizes = [4, 16, 16], strides = [1, 1, 1]} : vector<4x18x18xf32> to vector<4x16x16xf32>
    %46 = arith.mulf %44, %45 : vector<4x16x16xf32>
    %47 = arith.addf %42, %46 : vector<4x16x16xf32>
    %48 = vector.extract_strided_slice %8 {offsets = [8, 0, 0, 0], sizes = [1, 4, 16, 16], strides = [1, 1, 1, 1]} : vector<9x4x16x16xf32> to vector<1x4x16x16xf32>
    %49 = vector.shape_cast %48 : vector<1x4x16x16xf32> to vector<4x16x16xf32>
    %50 = vector.extract_strided_slice %5 {offsets = [0, 2, 2], sizes = [4, 16, 16], strides = [1, 1, 1]} : vector<4x18x18xf32> to vector<4x16x16xf32>
    %51 = arith.mulf %49, %50 : vector<4x16x16xf32>
    %52 = arith.addf %47, %51 : vector<4x16x16xf32>
    %c0_15 = arith.constant 0 : index
    %c0_16 = arith.constant 0 : index
    %c0_17 = arith.constant 0 : index
    %53 = vector.load %arg3[%c0_15, %c0_16, %c0_17] : memref<4x1x1xf32, #tpu.memory_space<vmem>>, vector<4x1x1xf32>
    %54 = vector.broadcast %53 : vector<4x1x1xf32> to vector<4x16x16xf32>
    %55 = arith.addf %52, %54 : vector<4x16x16xf32>
    %c0_18 = arith.constant 0 : index
    %c0_19 = arith.constant 0 : index
    %c0_20 = arith.constant 0 : index
    %56 = vector.load %arg4[%c0_18, %c0_19, %c0_20] : memref<4x1x1xf32, #tpu.memory_space<vmem>>, vector<4x1x1xf32>
    %57 = vector.broadcast %56 : vector<4x1x1xf32> to vector<4x16x16xf32>
    %58 = arith.mulf %55, %57 : vector<4x16x16xf32>
    %c0_21 = arith.constant 0 : index
    %c0_22 = arith.constant 0 : index
    %59 = vector.load %arg5[%c0_21, %c0_22] : memref<8x16xf32, #tpu.memory_space<vmem>>, vector<8x16xf32>
    %60 = vector.shape_cast %59 : vector<8x16xf32> to vector<1x8x16xf32>
    %61 = vector.shape_cast %60 : vector<1x8x16xf32> to vector<1x8x16xf32>
    %62 = vector.broadcast %61 : vector<1x8x16xf32> to vector<4x8x16xf32>
    %c0_23 = arith.constant 0 : index
    %c0_24 = arith.constant 0 : index
    %63 = vector.load %arg6[%c0_23, %c0_24] : memref<8x16xf32, #tpu.memory_space<vmem>>, vector<8x16xf32>
    %64 = vector.shape_cast %63 : vector<8x16xf32> to vector<1x8x16xf32>
    %65 = vector.shape_cast %64 : vector<1x8x16xf32> to vector<1x8x16xf32>
    %66 = vector.broadcast %65 : vector<1x8x16xf32> to vector<4x8x16xf32>
    %c0_25 = arith.constant 0 : index
    %c0_26 = arith.constant 0 : index
    %67 = vector.load %arg7[%c0_25, %c0_26] : memref<16x8xf32, #tpu.memory_space<vmem>>, vector<16x8xf32>
    %68 = vector.shape_cast %67 : vector<16x8xf32> to vector<1x16x8xf32>
    %69 = vector.shape_cast %68 : vector<1x16x8xf32> to vector<1x16x8xf32>
    %70 = vector.broadcast %69 : vector<1x16x8xf32> to vector<4x16x8xf32>
    %c0_27 = arith.constant 0 : index
    %c0_28 = arith.constant 0 : index
    %71 = vector.load %arg8[%c0_27, %c0_28] : memref<16x8xf32, #tpu.memory_space<vmem>>, vector<16x8xf32>
    %72 = vector.shape_cast %71 : vector<16x8xf32> to vector<1x16x8xf32>
    %73 = vector.shape_cast %72 : vector<1x16x8xf32> to vector<1x16x8xf32>
    %74 = vector.broadcast %73 : vector<1x16x8xf32> to vector<4x16x8xf32>
    "tpu.trace_start"() <{level = 10 : i32, message = "cih,chw->ciw"}> : () -> ()
    %cst_29 = arith.constant dense<0.000000e+00> : vector<4x8x16xf32>
    %75 = tpu.matmul %62, %1, %cst_29 {dimension_numbers = #tpu.dot_dimension_numbers<[2], [1], [1], [2], [0, 0, 0, 1, 1, 2], [0], [0]>} : vector<4x8x16xf32>, vector<4x16x16xf32>, vector<4x8x16xf32> -> vector<4x8x16xf32>
    %cst_30 = arith.constant dense<0.000000e+00> : vector<4x8x16xf32>
    %76 = tpu.matmul %66, %1, %cst_30 {dimension_numbers = #tpu.dot_dimension_numbers<[2], [1], [1], [2], [0, 0, 0, 1, 1, 2], [0], [0]>} : vector<4x8x16xf32>, vector<4x16x16xf32>, vector<4x8x16xf32> -> vector<4x8x16xf32>
    "tpu.trace_stop"() : () -> ()
    "tpu.trace_start"() <{level = 10 : i32, message = "ciw,cwj->cij"}> : () -> ()
    %cst_31 = arith.constant dense<0.000000e+00> : vector<4x8x8xf32>
    %77 = tpu.matmul %75, %70, %cst_31 {dimension_numbers = #tpu.dot_dimension_numbers<[2], [1], [1], [2], [0, 0, 0, 1, 1, 2], [0], [0]>} : vector<4x8x16xf32>, vector<4x16x8xf32>, vector<4x8x8xf32> -> vector<4x8x8xf32>
    %cst_32 = arith.constant dense<0.000000e+00> : vector<4x8x8xf32>
    %78 = tpu.matmul %76, %70, %cst_32 {dimension_numbers = #tpu.dot_dimension_numbers<[2], [1], [1], [2], [0, 0, 0, 1, 1, 2], [0], [0]>} : vector<4x8x16xf32>, vector<4x16x8xf32>, vector<4x8x8xf32> -> vector<4x8x8xf32>
    %cst_33 = arith.constant dense<0.000000e+00> : vector<4x8x8xf32>
    %79 = tpu.matmul %75, %74, %cst_33 {dimension_numbers = #tpu.dot_dimension_numbers<[2], [1], [1], [2], [0, 0, 0, 1, 1, 2], [0], [0]>} : vector<4x8x16xf32>, vector<4x16x8xf32>, vector<4x8x8xf32> -> vector<4x8x8xf32>
    %cst_34 = arith.constant dense<0.000000e+00> : vector<4x8x8xf32>
    %80 = tpu.matmul %76, %74, %cst_34 {dimension_numbers = #tpu.dot_dimension_numbers<[2], [1], [1], [2], [0, 0, 0, 1, 1, 2], [0], [0]>} : vector<4x8x16xf32>, vector<4x16x8xf32>, vector<4x8x8xf32> -> vector<4x8x8xf32>
    "tpu.trace_stop"() : () -> ()
    %81 = vector.shape_cast %77 : vector<4x8x8xf32> to vector<4x1x8x8xf32>
    %82 = vector.shape_cast %78 : vector<4x8x8xf32> to vector<4x1x8x8xf32>
    %83 = vector.shape_cast %79 : vector<4x8x8xf32> to vector<4x1x8x8xf32>
    %84 = vector.shape_cast %80 : vector<4x8x8xf32> to vector<4x1x8x8xf32>
    %85 = tpu.concatenate %81, %82, %83, %84 in 1 : vector<4x1x8x8xf32>, vector<4x1x8x8xf32>, vector<4x1x8x8xf32>, vector<4x1x8x8xf32> -> vector<4x4x8x8xf32>
    %86 = vector.shape_cast %85 : vector<4x4x8x8xf32> to vector<16x8x8xf32>
    %cst_35 = arith.constant 0.000000e+00 : f32
    %87 = vector.broadcast %cst_35 : f32 to vector<16x10x10xf32>
    %c0_36 = arith.constant 0 : index
    %c0_37 = arith.constant 0 : index
    %c0_38 = arith.constant 0 : index
    %88 = vector.load %arg20[%c0_36, %c0_37, %c0_38] : memref<16x10x10xf32, #tpu.memory_space<vmem>>, vector<16x10x10xf32>
    tpu.vector_store %arg20[%c0_36, %c0_37, %c0_38], %87 {strides = array<i32>} : memref<16x10x10xf32, #tpu.memory_space<vmem>>, vector<16x10x10xf32>,
    %c0_39 = arith.constant 0 : index
    %c1_40 = arith.constant 1 : index
    %c1_41 = arith.constant 1 : index
    %89 = vector.load %arg20[%c0_39, %c1_40, %c1_41] : memref<16x10x10xf32, #tpu.memory_space<vmem>>, vector<16x8x8xf32>
    tpu.vector_store %arg20[%c0_39, %c1_40, %c1_41], %86 {strides = array<i32>} : memref<16x10x10xf32, #tpu.memory_space<vmem>>, vector<16x8x8xf32>,
    %c0_42 = arith.constant 0 : index
    %c0_43 = arith.constant 0 : index
    %c0_44 = arith.constant 0 : index
    %90 = vector.load %arg20[%c0_42, %c0_43, %c0_44] : memref<16x10x10xf32, #tpu.memory_space<vmem>>, vector<16x10x10xf32>
    %c0_45 = arith.constant 0 : index
    %c0_46 = arith.constant 0 : index
    %c0_47 = arith.constant 0 : index
    %c0_48 = arith.constant 0 : index
    %91 = vector.load %arg9[%c0_45, %c0_46, %c0_47, %c0_48] : memref<9x16x1x1xf32, #tpu.memory_space<vmem>>, vector<9x16x1x1xf32>
    %92 = vector.shape_cast %91 : vector<9x16x1x1xf32> to vector<9x16x1x1xf32>
    %93 = vector.broadcast %92 : vector<9x16x1x1xf32> to vector<9x16x8x8xf32>
    %94 = vector.extract_strided_slice %93 {offsets = [0, 0, 0, 0], sizes = [1, 16, 8, 8], strides = [1, 1, 1, 1]} : vector<9x16x8x8xf32> to vector<1x16x8x8xf32>
    %95 = vector.shape_cast %94 : vector<1x16x8x8xf32> to vector<16x8x8xf32>
    %96 = vector.extract_strided_slice %90 {offsets = [0, 0, 0], sizes = [16, 8, 8], strides = [1, 1, 1]} : vector<16x10x10xf32> to vector<16x8x8xf32>
    %97 = arith.mulf %95, %96 : vector<16x8x8xf32>
    %98 = vector.extract_strided_slice %93 {offsets = [1, 0, 0, 0], sizes = [1, 16, 8, 8], strides = [1, 1, 1, 1]} : vector<9x16x8x8xf32> to vector<1x16x8x8xf32>
    %99 = vector.shape_cast %98 : vector<1x16x8x8xf32> to vector<16x8x8xf32>
    %100 = vector.extract_strided_slice %90 {offsets = [0, 0, 1], sizes = [16, 8, 8], strides = [1, 1, 1]} : vector<16x10x10xf32> to vector<16x8x8xf32>
    %101 = arith.mulf %99, %100 : vector<16x8x8xf32>
    %102 = arith.addf %97, %101 : vector<16x8x8xf32>
    %103 = vector.extract_strided_slice %93 {offsets = [2, 0, 0, 0], sizes = [1, 16, 8, 8], strides = [1, 1, 1, 1]} : vector<9x16x8x8xf32> to vector<1x16x8x8xf32>
    %104 = vector.shape_cast %103 : vector<1x16x8x8xf32> to vector<16x8x8xf32>
    %105 = vector.extract_strided_slice %90 {offsets = [0, 0, 2], sizes = [16, 8, 8], strides = [1, 1, 1]} : vector<16x10x10xf32> to vector<16x8x8xf32>
    %106 = arith.mulf %104, %105 : vector<16x8x8xf32>
    %107 = arith.addf %102, %106 : vector<16x8x8xf32>
    %108 = vector.extract_strided_slice %93 {offsets = [3, 0, 0, 0], sizes = [1, 16, 8, 8], strides = [1, 1, 1, 1]} : vector<9x16x8x8xf32> to vector<1x16x8x8xf32>
    %109 = vector.shape_cast %108 : vector<1x16x8x8xf32> to vector<16x8x8xf32>
    %110 = vector.extract_strided_slice %90 {offsets = [0, 1, 0], sizes = [16, 8, 8], strides = [1, 1, 1]} : vector<16x10x10xf32> to vector<16x8x8xf32>
    %111 = arith.mulf %109, %110 : vector<16x8x8xf32>
    %112 = arith.addf %107, %111 : vector<16x8x8xf32>
    %113 = vector.extract_strided_slice %93 {offsets = [4, 0, 0, 0], sizes = [1, 16, 8, 8], strides = [1, 1, 1, 1]} : vector<9x16x8x8xf32> to vector<1x16x8x8xf32>
    %114 = vector.shape_cast %113 : vector<1x16x8x8xf32> to vector<16x8x8xf32>
    %115 = vector.extract_strided_slice %90 {offsets = [0, 1, 1], sizes = [16, 8, 8], strides = [1, 1, 1]} : vector<16x10x10xf32> to vector<16x8x8xf32>
    %116 = arith.mulf %114, %115 : vector<16x8x8xf32>
    %117 = arith.addf %112, %116 : vector<16x8x8xf32>
    %118 = vector.extract_strided_slice %93 {offsets = [5, 0, 0, 0], sizes = [1, 16, 8, 8], strides = [1, 1, 1, 1]} : vector<9x16x8x8xf32> to vector<1x16x8x8xf32>
    %119 = vector.shape_cast %118 : vector<1x16x8x8xf32> to vector<16x8x8xf32>
    %120 = vector.extract_strided_slice %90 {offsets = [0, 1, 2], sizes = [16, 8, 8], strides = [1, 1, 1]} : vector<16x10x10xf32> to vector<16x8x8xf32>
    %121 = arith.mulf %119, %120 : vector<16x8x8xf32>
    %122 = arith.addf %117, %121 : vector<16x8x8xf32>
    %123 = vector.extract_strided_slice %93 {offsets = [6, 0, 0, 0], sizes = [1, 16, 8, 8], strides = [1, 1, 1, 1]} : vector<9x16x8x8xf32> to vector<1x16x8x8xf32>
    %124 = vector.shape_cast %123 : vector<1x16x8x8xf32> to vector<16x8x8xf32>
    %125 = vector.extract_strided_slice %90 {offsets = [0, 2, 0], sizes = [16, 8, 8], strides = [1, 1, 1]} : vector<16x10x10xf32> to vector<16x8x8xf32>
    %126 = arith.mulf %124, %125 : vector<16x8x8xf32>
    %127 = arith.addf %122, %126 : vector<16x8x8xf32>
    %128 = vector.extract_strided_slice %93 {offsets = [7, 0, 0, 0], sizes = [1, 16, 8, 8], strides = [1, 1, 1, 1]} : vector<9x16x8x8xf32> to vector<1x16x8x8xf32>
    %129 = vector.shape_cast %128 : vector<1x16x8x8xf32> to vector<16x8x8xf32>
    %130 = vector.extract_strided_slice %90 {offsets = [0, 2, 1], sizes = [16, 8, 8], strides = [1, 1, 1]} : vector<16x10x10xf32> to vector<16x8x8xf32>
    %131 = arith.mulf %129, %130 : vector<16x8x8xf32>
    %132 = arith.addf %127, %131 : vector<16x8x8xf32>
    %133 = vector.extract_strided_slice %93 {offsets = [8, 0, 0, 0], sizes = [1, 16, 8, 8], strides = [1, 1, 1, 1]} : vector<9x16x8x8xf32> to vector<1x16x8x8xf32>
    %134 = vector.shape_cast %133 : vector<1x16x8x8xf32> to vector<16x8x8xf32>
    %135 = vector.extract_strided_slice %90 {offsets = [0, 2, 2], sizes = [16, 8, 8], strides = [1, 1, 1]} : vector<16x10x10xf32> to vector<16x8x8xf32>
    %136 = arith.mulf %134, %135 : vector<16x8x8xf32>
    %137 = arith.addf %132, %136 : vector<16x8x8xf32>
    %c0_49 = arith.constant 0 : index
    %c0_50 = arith.constant 0 : index
    %c0_51 = arith.constant 0 : index
    %138 = vector.load %arg10[%c0_49, %c0_50, %c0_51] : memref<16x1x1xf32, #tpu.memory_space<vmem>>, vector<16x1x1xf32>
    %139 = vector.broadcast %138 : vector<16x1x1xf32> to vector<16x8x8xf32>
    %140 = arith.addf %137, %139 : vector<16x8x8xf32>
    %141 = vector.shape_cast %140 : vector<16x8x8xf32> to vector<8x2x8x8xf32>
    %c0_52 = arith.constant 0 : index
    %c0_53 = arith.constant 0 : index
    %c0_54 = arith.constant 0 : index
    %c0_55 = arith.constant 0 : index
    %c0_56 = arith.constant 0 : index
    %142 = vector.load %arg11[%c0_52, %c0_53, %c0_54, %c0_55, %c0_56] : memref<8x2x2x1x1xf32, #tpu.memory_space<vmem>>, vector<8x2x2x1x1xf32>
    %143 = vector.extract_strided_slice %142 {offsets = [0, 0, 0, 0, 0], sizes = [8, 2, 1, 1, 1], strides = [1, 1, 1, 1, 1]} : vector<8x2x2x1x1xf32> to vector<8x2x1x1x1xf32>
    %144 = vector.shape_cast %143 : vector<8x2x1x1x1xf32> to vector<8x2x1x1xf32>
    %145 = vector.extract_strided_slice %141 {offsets = [0, 0, 0, 0], sizes = [8, 1, 8, 8], strides = [1, 1, 1, 1]} : vector<8x2x8x8xf32> to vector<8x1x8x8xf32>
    %146 = vector.broadcast %144 : vector<8x2x1x1xf32> to vector<8x2x8x8xf32>
    %147 = vector.broadcast %145 : vector<8x1x8x8xf32> to vector<8x2x8x8xf32>
    %148 = arith.mulf %146, %147 : vector<8x2x8x8xf32>
    %149 = vector.extract_strided_slice %142 {offsets = [0, 0, 1, 0, 0], sizes = [8, 2, 1, 1, 1], strides = [1, 1, 1, 1, 1]} : vector<8x2x2x1x1xf32> to vector<8x2x1x1x1xf32>
    %150 = vector.shape_cast %149 : vector<8x2x1x1x1xf32> to vector<8x2x1x1xf32>
    %151 = vector.extract_strided_slice %141 {offsets = [0, 1, 0, 0], sizes = [8, 1, 8, 8], strides = [1, 1, 1, 1]} : vector<8x2x8x8xf32> to vector<8x1x8x8xf32>
    %152 = vector.broadcast %150 : vector<8x2x1x1xf32> to vector<8x2x8x8xf32>
    %153 = vector.broadcast %151 : vector<8x1x8x8xf32> to vector<8x2x8x8xf32>
    %154 = arith.mulf %152, %153 : vector<8x2x8x8xf32>
    %155 = arith.addf %148, %154 : vector<8x2x8x8xf32>
    %156 = vector.shape_cast %155 : vector<8x2x8x8xf32> to vector<16x8x8xf32>
    %c0_57 = arith.constant 0 : index
    %c0_58 = arith.constant 0 : index
    %c0_59 = arith.constant 0 : index
    %157 = vector.load %arg12[%c0_57, %c0_58, %c0_59] : memref<16x1x1xf32, #tpu.memory_space<vmem>>, vector<16x1x1xf32>
    %158 = vector.broadcast %157 : vector<16x1x1xf32> to vector<16x8x8xf32>
    %159 = arith.addf %156, %158 : vector<16x8x8xf32>
    %c0_60 = arith.constant 0 : index
    %c0_61 = arith.constant 0 : index
    %c0_62 = arith.constant 0 : index
    %160 = vector.load %arg13[%c0_60, %c0_61, %c0_62] : memref<16x1x1xf32, #tpu.memory_space<vmem>>, vector<16x1x1xf32>
    %161 = vector.broadcast %160 : vector<16x1x1xf32> to vector<16x8x8xf32>
    %162 = arith.mulf %159, %161 : vector<16x8x8xf32>
    %163 = vector.shape_cast %162 : vector<16x8x8xf32> to vector<4x4x8x8xf32>
    %c0_63 = arith.constant 0 : index
    %c0_64 = arith.constant 0 : index
    %164 = vector.load %arg16[%c0_63, %c0_64] : memref<8x16xf32, #tpu.memory_space<vmem>>, vector<8x16xf32>
    %165 = vector.shape_cast %164 : vector<8x16xf32> to vector<1x8x16xf32>
    %166 = vector.shape_cast %165 : vector<1x8x16xf32> to vector<1x8x16xf32>
    %167 = vector.broadcast %166 : vector<1x8x16xf32> to vector<4x8x16xf32>
    %c0_65 = arith.constant 0 : index
    %c0_66 = arith.constant 0 : index
    %168 = vector.load %arg17[%c0_65, %c0_66] : memref<8x16xf32, #tpu.memory_space<vmem>>, vector<8x16xf32>
    %169 = vector.shape_cast %168 : vector<8x16xf32> to vector<1x8x16xf32>
    %170 = vector.shape_cast %169 : vector<1x8x16xf32> to vector<1x8x16xf32>
    %171 = vector.broadcast %170 : vector<1x8x16xf32> to vector<4x8x16xf32>
    %c0_67 = arith.constant 0 : index
    %c0_68 = arith.constant 0 : index
    %172 = vector.load %arg14[%c0_67, %c0_68] : memref<16x8xf32, #tpu.memory_space<vmem>>, vector<16x8xf32>
    %173 = vector.shape_cast %172 : vector<16x8xf32> to vector<1x16x8xf32>
    %174 = vector.shape_cast %173 : vector<1x16x8xf32> to vector<1x16x8xf32>
    %175 = vector.broadcast %174 : vector<1x16x8xf32> to vector<4x16x8xf32>
    %c0_69 = arith.constant 0 : index
    %c0_70 = arith.constant 0 : index
    %176 = vector.load %arg15[%c0_69, %c0_70] : memref<16x8xf32, #tpu.memory_space<vmem>>, vector<16x8xf32>
    %177 = vector.shape_cast %176 : vector<16x8xf32> to vector<1x16x8xf32>
    %178 = vector.shape_cast %177 : vector<1x16x8xf32> to vector<1x16x8xf32>
    %179 = vector.broadcast %178 : vector<1x16x8xf32> to vector<4x16x8xf32>
    %180 = vector.extract_strided_slice %163 {offsets = [0, 0, 0, 0], sizes = [4, 1, 8, 8], strides = [1, 1, 1, 1]} : vector<4x4x8x8xf32> to vector<4x1x8x8xf32>
    %181 = vector.shape_cast %180 : vector<4x1x8x8xf32> to vector<4x8x8xf32>
    "tpu.trace_start"() <{level = 10 : i32, message = "cij,cjw->ciw"}> : () -> ()
    %cst_71 = arith.constant dense<0.000000e+00> : vector<4x8x16xf32>
    %182 = tpu.matmul %181, %167, %cst_71 {dimension_numbers = #tpu.dot_dimension_numbers<[2], [1], [1], [2], [0, 0, 0, 1, 1, 2], [0], [0]>} : vector<4x8x8xf32>, vector<4x8x16xf32>, vector<4x8x16xf32> -> vector<4x8x16xf32>
    "tpu.trace_stop"() : () -> ()
    %183 = vector.extract_strided_slice %163 {offsets = [0, 2, 0, 0], sizes = [4, 1, 8, 8], strides = [1, 1, 1, 1]} : vector<4x4x8x8xf32> to vector<4x1x8x8xf32>
    %184 = vector.shape_cast %183 : vector<4x1x8x8xf32> to vector<4x8x8xf32>
    "tpu.trace_start"() <{level = 10 : i32, message = "cij,cjw->ciw"}> : () -> ()
    %cst_72 = arith.constant dense<0.000000e+00> : vector<4x8x16xf32>
    %185 = tpu.matmul %184, %171, %cst_72 {dimension_numbers = #tpu.dot_dimension_numbers<[2], [1], [1], [2], [0, 0, 0, 1, 1, 2], [0], [0]>} : vector<4x8x8xf32>, vector<4x8x16xf32>, vector<4x8x16xf32> -> vector<4x8x16xf32>
    "tpu.trace_stop"() : () -> ()
    %186 = arith.addf %182, %185 : vector<4x8x16xf32>
    %187 = vector.extract_strided_slice %163 {offsets = [0, 1, 0, 0], sizes = [4, 1, 8, 8], strides = [1, 1, 1, 1]} : vector<4x4x8x8xf32> to vector<4x1x8x8xf32>
    %188 = vector.shape_cast %187 : vector<4x1x8x8xf32> to vector<4x8x8xf32>
    "tpu.trace_start"() <{level = 10 : i32, message = "cij,cjw->ciw"}> : () -> ()
    %cst_73 = arith.constant dense<0.000000e+00> : vector<4x8x16xf32>
    %189 = tpu.matmul %188, %167, %cst_73 {dimension_numbers = #tpu.dot_dimension_numbers<[2], [1], [1], [2], [0, 0, 0, 1, 1, 2], [0], [0]>} : vector<4x8x8xf32>, vector<4x8x16xf32>, vector<4x8x16xf32> -> vector<4x8x16xf32>
    "tpu.trace_stop"() : () -> ()
    %190 = vector.extract_strided_slice %163 {offsets = [0, 3, 0, 0], sizes = [4, 1, 8, 8], strides = [1, 1, 1, 1]} : vector<4x4x8x8xf32> to vector<4x1x8x8xf32>
    %191 = vector.shape_cast %190 : vector<4x1x8x8xf32> to vector<4x8x8xf32>
    "tpu.trace_start"() <{level = 10 : i32, message = "cij,cjw->ciw"}> : () -> ()
    %cst_74 = arith.constant dense<0.000000e+00> : vector<4x8x16xf32>
    %192 = tpu.matmul %191, %171, %cst_74 {dimension_numbers = #tpu.dot_dimension_numbers<[2], [1], [1], [2], [0, 0, 0, 1, 1, 2], [0], [0]>} : vector<4x8x8xf32>, vector<4x8x16xf32>, vector<4x8x16xf32> -> vector<4x8x16xf32>
    "tpu.trace_stop"() : () -> ()
    %193 = arith.addf %189, %192 : vector<4x8x16xf32>
    "tpu.trace_start"() <{level = 10 : i32, message = "chi,ciw->chw"}> : () -> ()
    %cst_75 = arith.constant dense<0.000000e+00> : vector<4x16x16xf32>
    %194 = tpu.matmul %175, %186, %cst_75 {dimension_numbers = #tpu.dot_dimension_numbers<[2], [1], [1], [2], [0, 0, 0, 1, 1, 2], [0], [0]>} : vector<4x16x8xf32>, vector<4x8x16xf32>, vector<4x16x16xf32> -> vector<4x16x16xf32>
    %cst_76 = arith.constant dense<0.000000e+00> : vector<4x16x16xf32>
    %195 = tpu.matmul %179, %193, %cst_76 {dimension_numbers = #tpu.dot_dimension_numbers<[2], [1], [1], [2], [0, 0, 0, 1, 1, 2], [0], [0]>} : vector<4x16x8xf32>, vector<4x8x16xf32>, vector<4x16x16xf32> -> vector<4x16x16xf32>
    "tpu.trace_stop"() : () -> ()
    %196 = arith.addf %194, %195 : vector<4x16x16xf32>
    %197 = arith.addf %58, %196 : vector<4x16x16xf32>
    %c0_77 = arith.constant 0 : index
    %c0_78 = arith.constant 0 : index
    %c0_79 = arith.constant 0 : index
    %c0_80 = arith.constant 0 : index
    %198 = vector.load %arg18[%c0_77, %c0_78, %c0_79, %c0_80] : memref<1x4x16x16xf32, #tpu.memory_space<vmem>>, vector<1x4x16x16xf32>
    %199 = vector.shape_cast %198 : vector<1x4x16x16xf32> to vector<4x16x16xf32>
    %200 = vector.shape_cast %197 : vector<4x16x16xf32> to vector<1x4x16x16xf32>
    tpu.vector_store %arg18[%c0_77, %c0_78, %c0_79, %c0_80], %200 {strides = array<i32>} : memref<1x4x16x16xf32, #tpu.memory_space<vmem>>, vector<1x4x16x16xf32>,
    return
  }
  func.func @transform_0(%arg0: i32) -> (i32, i32, i32, i32) {
    %c0_i32 = arith.constant 0 : i32
    %c0_i32_0 = arith.constant 0 : i32
    %c0_i32_1 = arith.constant 0 : i32
    %c0_i32_2 = arith.constant 0 : i32
    return %arg0, %c0_i32, %c0_i32_0, %c0_i32_1 : i32, i32, i32, i32
  }
  func.func @transform_1(%arg0: i32) -> (i32, i32, i32, i32) {
    %c0_i32 = arith.constant 0 : i32
    %c0_i32_0 = arith.constant 0 : i32
    %c0_i32_1 = arith.constant 0 : i32
    %c0_i32_2 = arith.constant 0 : i32
    %c0_i32_3 = arith.constant 0 : i32
    return %c0_i32, %c0_i32_0, %c0_i32_1, %c0_i32_2 : i32, i32, i32, i32
  }
  func.func @transform_2(%arg0: i32) -> (i32, i32, i32) {
    %c0_i32 = arith.constant 0 : i32
    %c0_i32_0 = arith.constant 0 : i32
    %c0_i32_1 = arith.constant 0 : i32
    %c0_i32_2 = arith.constant 0 : i32
    return %c0_i32, %c0_i32_0, %c0_i32_1 : i32, i32, i32
  }
  func.func @transform_3(%arg0: i32) -> (i32, i32, i32) {
    %c0_i32 = arith.constant 0 : i32
    %c0_i32_0 = arith.constant 0 : i32
    %c0_i32_1 = arith.constant 0 : i32
    %c0_i32_2 = arith.constant 0 : i32
    return %c0_i32, %c0_i32_0, %c0_i32_1 : i32, i32, i32
  }
  func.func @transform_4(%arg0: i32) -> (i32, i32) {
    %c0_i32 = arith.constant 0 : i32
    %c0_i32_0 = arith.constant 0 : i32
    %c0_i32_1 = arith.constant 0 : i32
    return %c0_i32, %c0_i32_0 : i32, i32
  }
  func.func @transform_5(%arg0: i32) -> (i32, i32) {
    %c0_i32 = arith.constant 0 : i32
    %c0_i32_0 = arith.constant 0 : i32
    %c0_i32_1 = arith.constant 0 : i32
    return %c0_i32, %c0_i32_0 : i32, i32
  }
  func.func @transform_6(%arg0: i32) -> (i32, i32) {
    %c0_i32 = arith.constant 0 : i32
    %c0_i32_0 = arith.constant 0 : i32
    %c0_i32_1 = arith.constant 0 : i32
    return %c0_i32, %c0_i32_0 : i32, i32
  }
  func.func @transform_7(%arg0: i32) -> (i32, i32) {
    %c0_i32 = arith.constant 0 : i32
    %c0_i32_0 = arith.constant 0 : i32
    %c0_i32_1 = arith.constant 0 : i32
    return %c0_i32, %c0_i32_0 : i32, i32
  }
  func.func @transform_8(%arg0: i32) -> (i32, i32, i32, i32) {
    %c0_i32 = arith.constant 0 : i32
    %c0_i32_0 = arith.constant 0 : i32
    %c0_i32_1 = arith.constant 0 : i32
    %c0_i32_2 = arith.constant 0 : i32
    %c0_i32_3 = arith.constant 0 : i32
    return %c0_i32, %c0_i32_0, %c0_i32_1, %c0_i32_2 : i32, i32, i32, i32
  }
  func.func @transform_9(%arg0: i32) -> (i32, i32, i32) {
    %c0_i32 = arith.constant 0 : i32
    %c0_i32_0 = arith.constant 0 : i32
    %c0_i32_1 = arith.constant 0 : i32
    %c0_i32_2 = arith.constant 0 : i32
    return %c0_i32, %c0_i32_0, %c0_i32_1 : i32, i32, i32
  }
  func.func @transform_10(%arg0: i32) -> (i32, i32, i32, i32, i32) {
    %c0_i32 = arith.constant 0 : i32
    %c0_i32_0 = arith.constant 0 : i32
    %c0_i32_1 = arith.constant 0 : i32
    %c0_i32_2 = arith.constant 0 : i32
    %c0_i32_3 = arith.constant 0 : i32
    %c0_i32_4 = arith.constant 0 : i32
    return %c0_i32, %c0_i32_0, %c0_i32_1, %c0_i32_2, %c0_i32_3 : i32, i32, i32, i32, i32
  }
  func.func @transform_11(%arg0: i32) -> (i32, i32, i32) {
    %c0_i32 = arith.constant 0 : i32
    %c0_i32_0 = arith.constant 0 : i32
    %c0_i32_1 = arith.constant 0 : i32
    %c0_i32_2 = arith.constant 0 : i32
    return %c0_i32, %c0_i32_0, %c0_i32_1 : i32, i32, i32
  }
  func.func @transform_12(%arg0: i32) -> (i32, i32, i32) {
    %c0_i32 = arith.constant 0 : i32
    %c0_i32_0 = arith.constant 0 : i32
    %c0_i32_1 = arith.constant 0 : i32
    %c0_i32_2 = arith.constant 0 : i32
    return %c0_i32, %c0_i32_0, %c0_i32_1 : i32, i32, i32
  }
  func.func @transform_13(%arg0: i32) -> (i32, i32) {
    %c0_i32 = arith.constant 0 : i32
    %c0_i32_0 = arith.constant 0 : i32
    %c0_i32_1 = arith.constant 0 : i32
    return %c0_i32, %c0_i32_0 : i32, i32
  }
  func.func @transform_14(%arg0: i32) -> (i32, i32) {
    %c0_i32 = arith.constant 0 : i32
    %c0_i32_0 = arith.constant 0 : i32
    %c0_i32_1 = arith.constant 0 : i32
    return %c0_i32, %c0_i32_0 : i32, i32
  }
  func.func @transform_15(%arg0: i32) -> (i32, i32) {
    %c0_i32 = arith.constant 0 : i32
    %c0_i32_0 = arith.constant 0 : i32
    %c0_i32_1 = arith.constant 0 : i32
    return %c0_i32, %c0_i32_0 : i32, i32
  }
  func.func @transform_16(%arg0: i32) -> (i32, i32) {
    %c0_i32 = arith.constant 0 : i32
    %c0_i32_0 = arith.constant 0 : i32
    %c0_i32_1 = arith.constant 0 : i32
    return %c0_i32, %c0_i32_0 : i32, i32
  }
  func.func @transform_17(%arg0: i32) -> (i32, i32, i32, i32) {
    %c0_i32 = arith.constant 0 : i32
    %c0_i32_0 = arith.constant 0 : i32
    %c0_i32_1 = arith.constant 0 : i32
    %c0_i32_2 = arith.constant 0 : i32
    return %arg0, %c0_i32, %c0_i32_0, %c0_i32_1 : i32, i32, i32, i32
  }
}

module attributes {stable_mosaic.version = 11 : i64} {
  func.func @kernel(%arg0: i32, %arg1: memref<1x4x256xf32, #tpu.memory_space<vmem>>, %arg2: memref<8x4xf32, #tpu.memory_space<vmem>>, %arg3: memref<1x8x256xf32, #tpu.memory_space<vmem>>) attributes {dimension_semantics = [#tpu.dimension_semantics<parallel>], iteration_bounds = array<i64: 2>, scalar_prefetch = 0 : i64, scratch_operands = 0 : i64, tpu.core_type = #tpu.core_type<tc>, window_params = [{transform_indices = @transform_0, window_bounds = array<i64: 1, 4, 256>}, {pipeline_mode = #tpu.pipeline_mode<synchronous>, transform_indices = @transform_1, window_bounds = array<i64: 8, 4>}, {transform_indices = @transform_2, window_bounds = array<i64: 1, 8, 256>}]} {
    %c0 = arith.constant 0 : index
    %c0_0 = arith.constant 0 : index
    %c0_1 = arith.constant 0 : index
    %0 = vector.load %arg1[%c0, %c0_0, %c0_1] : memref<1x4x256xf32, #tpu.memory_space<vmem>>, vector<1x4x256xf32>
    %1 = vector.shape_cast %0 : vector<1x4x256xf32> to vector<4x256xf32>
    %c0_2 = arith.constant 0 : index
    %c0_3 = arith.constant 0 : index
    %2 = vector.load %arg2[%c0_2, %c0_3] : memref<8x4xf32, #tpu.memory_space<vmem>>, vector<8x4xf32>
    %cst = arith.constant dense<0.000000e+00> : vector<8x256xf32>
    %3 = tpu.matmul %2, %1, %cst {dimension_numbers = #tpu.dot_dimension_numbers<[1], [0], [0], [1], [0, 0, 1, 1], [], []>} : vector<8x4xf32>, vector<4x256xf32>, vector<8x256xf32> -> vector<8x256xf32>
    %c0_4 = arith.constant 0 : index
    %c0_5 = arith.constant 0 : index
    %c0_6 = arith.constant 0 : index
    %4 = vector.load %arg3[%c0_4, %c0_5, %c0_6] : memref<1x8x256xf32, #tpu.memory_space<vmem>>, vector<1x8x256xf32>
    %5 = vector.shape_cast %4 : vector<1x8x256xf32> to vector<8x256xf32>
    %6 = vector.shape_cast %3 : vector<8x256xf32> to vector<1x8x256xf32>
    tpu.vector_store %arg3[%c0_4, %c0_5, %c0_6], %6 {strides = array<i32>} : memref<1x8x256xf32, #tpu.memory_space<vmem>>, vector<1x8x256xf32>,
    return
  }
  func.func @transform_0(%arg0: i32) -> (i32, i32, i32) {
    %c0_i32 = arith.constant 0 : i32
    %c0_i32_0 = arith.constant 0 : i32
    %c0_i32_1 = arith.constant 0 : i32
    return %arg0, %c0_i32, %c0_i32_0 : i32, i32, i32
  }
  func.func @transform_1(%arg0: i32) -> (i32, i32) {
    %c0_i32 = arith.constant 0 : i32
    %c0_i32_0 = arith.constant 0 : i32
    %c0_i32_1 = arith.constant 0 : i32
    return %c0_i32, %c0_i32_0 : i32, i32
  }
  func.func @transform_2(%arg0: i32) -> (i32, i32, i32) {
    %c0_i32 = arith.constant 0 : i32
    %c0_i32_0 = arith.constant 0 : i32
    %c0_i32_1 = arith.constant 0 : i32
    return %arg0, %c0_i32, %c0_i32_0 : i32, i32, i32
  }
}

</mosaic_0001>

<bundles_post_ra>
// kernel: _lambda_.3
= control target key start
LH: loop header
LB: loop body
LE: loop exit
PB: predicated region body
PF: predicated region fallthrough
CT: control target
= control target key end

     0   :  { %s335_s9 = smov 0   ;;  %s355_s0 = inlined_call_operand.vmem [shape: f32[2,4,256], index: 0, kind: input, shape index: {}]   ;;  %s356_s1 = inlined_call_operand.vmem [shape: f32[8,4], index: 1, kind: input, shape index: {}]   ;;  %s357_s2 = inlined_call_operand.vmem [shape: f32[2,8,256], index: 2, kind: output, shape index: {}]  }
   0x1 LB: > { %s285_s10 = sadd.s32 4294967295, %s317_s9   ;;  %p289_p0 = scmp.ge.s32.totalorder %s317_s9, 1  ;;  %s317_s9 = sphi %s335_s9, %s12_s9  }
   0x2   : > { %p112_p1 = scmp.lt.s32.totalorder %s317_s9, 3 }
   0x4   : > { %p113_p2 = pnand %p289_p0, %p112_p1 }
   0x5   : > { %p134_p3 = scmp.lt.s32.totalorder (!%p113_p2), %s285_s10, 1  ;;  %v319_v0 = vmov (!%p113_p2), 0.0   ;;  %vm152_vm0 = vcmask (!%p113_p2), 1043456   ;;  %v145_v3 = vld [vmem:[%s356_s1] sm:$0xff] (!%p113_p2)  ;;  %vm148_vm1 = vcmask (!%p113_p2), 31744  }
   0x6   : > { %116 = sbr.rel (%p113_p2) target bundleno = 235 (0xeb), region = 28  ;;  %221 = vmatprep.mubr.f32.mxu0 (!%p113_p2), %v319_v0 }
   0xd   : > { %s359_s10 = smov (!%p134_p3, %s285_s10), 1 }
   0xe   : > { %s299_s11 = sshll.u32 %s359_s10, 3  ;;  %s300_s17 = sshll.u32 %s359_s10, 4 }
   0xf   : > { %s138_s14 = scalar_lea.vmem %s355_s0, %s299_s11  ;;  %s143_s20 = scalar_lea.vmem %s357_s2, %s300_s17 }
  0x10   : > { %v144_v1 = vld [vmem:[%s138_s14] sm:$0xff] }
  0x11   : > { %v147_v2 = vcombine.high %v144_v1, %v144_v1 }
  0x13   : > { %294 = vmatprep.subr.msk.mxu0 %vm152_vm0, %v147_v2 }
  0x14   : > { %295 = vmatpush1.msk.msra.mxu0 %vm152_vm0, %v144_v1 }
  0x15   : > { %296 = vmatmul.mubr.msk.f32.vlgmr.msra.gmra.mrb[0].mxu0 %vm148_vm1, %v145_v3 }
  0xe8   : > { %v223_v4 = vpop.f32.mrb[0].mxu0 }
  0xe9   : > { %228 = vst [vmem:[%s143_s20] sm:$0xff] %v223_v4  ;;  %v225_v5 = vpop.f32.mrb[1].mxu0 }
  0xea   : > { %229 = vst [vmem:[%s143_s20 + $0x8] sm:$0xff] %v225_v5 }
  0xeb PF: > { %s12_s9 = sadd.s32 1, %s317_s9  }
  0xec   : > { %p9_p4 = scmp.ge.s32.totalorder %s12_s9, 4  }
  0xee   :  { %11 = sbr.rel (!%p9_p4) target bundleno = 1 (0x1), region = 58 }

// kernel: _lambda_.2
= control target key start
LH: loop header
LB: loop body
LE: loop exit
PB: predicated region body
PF: predicated region fallthrough
CT: control target
= control target key end

     0   :  { %s13233_s0 = inlined_call_operand.hbm [shape: f32[2,4,16,16], index: 0, kind: input, shape index: {}]   ;;  %s13234_s1 = inlined_call_operand.hbm [shape: f32[9,4,1,1], index: 1, kind: input, shape index: {}]   ;;  %s13235_s2 = inlined_call_operand.hbm [shape: f32[4,1,1], index: 2, kind: input, shape index: {}]   ;;  %s13236_s3 = inlined_call_operand.vmem [shape: f32[4,1,1], index: 3, kind: input, shape index: {}]   ;;  %s13237_s4 = inlined_call_operand.hbm [shape: f32[8,16], index: 4, kind: input, shape index: {}, may-alias: {4,15}]   ;;  %s13238_s5 = inlined_call_operand.vmem [shape: f32[8,16], index: 5, kind: input, shape index: {}, may-alias: {5,16}]   ;;  %s13239_s6 = inlined_call_operand.vmem [shape: f32[16,8], index: 6, kind: input, shape index: {}, may-alias: {6,13}]   ;;  %s13240_s7 = inlined_call_operand.vmem [shape: f32[16,8], index: 7, kind: input, shape index: {}, may-alias: {7,14}]   ;;  %s13241_s8 = inlined_call_operand.hbm [shape: f32[9,16,1,1], index: 8, kind: input, shape index: {}]   ;;  %s13242_s9 = inlined_call_operand.hbm [shape: f32[16,1,1], index: 9, kind: input, shape index: {}]   ;;  %s13243_s10 = inlined_call_operand.hbm [shape: f32[8,2,2,1,1], index: 10, kind: input, shape index: {}]   ;;  %s13244_s11 = inlined_call_operand.vmem [shape: f32[16,1,1], index: 11, kind: input, shape index: {}]   ;;  %s13245_s12 = inlined_call_operand.vmem [shape: f32[16,1,1], index: 12, kind: input, shape index: {}]   ;;  %s13246_s13 = inlined_call_operand.vmem [shape: f32[16,8], index: 13, kind: input, shape index: {}, may-alias: {6,13}]   ;;  %s13247_s14 = inlined_call_operand.vmem [shape: f32[16,8], index: 14, kind: input, shape index: {}, may-alias: {7,14}]   ;;  %s13248_s15 = inlined_call_operand.hbm [shape: f32[8,16], index: 15, kind: input, shape index: {}, may-alias: {4,15}]   ;;  %s13249_s16 = inlined_call_operand.vmem [shape: f32[8,16], index: 16, kind: input, shape index: {}, may-alias: {5,16}]   ;;  %s13250_s17 = inlined_call_operand.vmem [shape: f32[2,4,16,16], index: 17, kind: output, shape index: {}]  }
   0x1   :  { %13390 = sst [smem:[#allocation191_spill]] %s13233_s0 }
   0x2   :  { %13391 = sst [smem:[#allocation192_spill]] %s13234_s1 }
   0x3   :  { %13392 = sst [smem:[#allocation193_spill]] %s13236_s3 }
   0x4   :  { %13393 = sst [smem:[#allocation194_spill]] %s13237_s4 }
   0x5   :  { %13394 = sst [smem:[#allocation195_spill]] %s13240_s7 }
   0x6   :  { %13395 = sst [smem:[#allocation196_spill]] %s13244_s11 }
   0x7   :  { %13396 = sst [smem:[#allocation197_spill]] %s13245_s12 }
   0x8   :  { %13397 = sst [smem:[#allocation198_spill]] %s13246_s13 }
   0x9   :  { %13398 = sst [smem:[#allocation199_spill]] %s13247_s14 }
   0xa   :  { %13399 = sst [smem:[#allocation200_spill]] %s13249_s16 }
   0xb   :  { %13400 = sst [smem:[#allocation201_spill]] %s13250_s17 }
   0xc   :  { %22 = vsyncpa [#allocation5], 0 }
   0xd   :  { %24 = vsyncpa [#allocation5 + $0x1], 0 }
   0xe   :  { %25 = vsyncpa [#allocation7], 0 }
   0xf   :  { %26 = vsyncpa [#allocation10], 0 }
  0x10   :  { %27 = vsyncpa [#allocation13], 0 }
  0x11   :  { %28 = vsyncpa [#allocation16], 0  ;;  %s10483_s24 = smov 0   ;;  %s10485_s25 = smov 0  }
  0x12   :  { %s10487_s26 = smov 0   ;;  %s10489_s27 = smov 0  }
  0x13 LB: > { %s10374_s28 = smov [#allocation6]   ;;  %s10504_s0 = sadd.s32 4294967295, %s10372_s27   ;;  %s10372_s27 = sphi %s10489_s27, %s13861_s27   ;;  %s10368_s26 = sphi %s10487_s26, %s13860_s26   ;;  %s10364_s25 = sphi %s10485_s25, %s13859_s25   ;;  %s10360_s24 = sphi %s10483_s24, %s13858_s24  }
  0x14   : > { %s439_s29 = sshll.u32 %s10374_s28, 4  ;;  %p9066_p0 = scmp.ge.s32.totalorder %s10372_s27, 1  ;;  %s10509_s29 = int_to_ptr.vmem [resolvable:$true] %s439_s29 }
  0x15   : > { %p13260_p1 = scmp.eq.s32.totalorder %s10504_s0, 0  ;;  %p427_p2 = scmp.lt.s32.totalorder %s10372_s27, 3 }
  0x16   : > { %s10375_s18 = smov [#allocation9]   ;;  %s10376_s20 = smov [#allocation12]  }
  0x17   : > { %p10511_p3 = pnand %p9066_p0, %p427_p2  ;;  %s469_s19 = sshll.u32 %s10375_s18, 4  ;;  %s10523_s19 = int_to_ptr.vmem [resolvable:$true] %s469_s19 }
  0x18   : > { %s501_s21 = sshll.u32 %s10376_s20, 4  ;;  %s13403_s28 = sld [smem:[#allocation192_spill]]  ;;  %s10525_s21 = int_to_ptr.vmem [resolvable:$true] %s501_s21 }
  0x19   : > { %s13401_s30 = scalar_select %p10511_p3, 1, 0 }
  0x1a   : > { %p9959_p4 = pneg %p10511_p3 }
  0x1c   : > { %p10519_p5 = pnand %p9959_p4, %p13260_p1 }
  0x1e   : > { %s10096_s17 = scalar_lea.hbm %s13403_s28, 576  ;;  %p10535_p7 = pneg %p10519_p5 }
  0x1f   : > { %p10097_p6 = scmp.ne.s32.totalorder %s13403_s28, %s10096_s17  ;;  %p10103_p10 = scmp.lt.u32.totalorder %s10096_s17, %s13403_s28 }
  0x21   : > { %p10099_p8 = pnand %p10535_p7, %p10097_p6 }
  0x23   : > { %p10100_p9 = pneg %p10099_p8 }
  0x25   : > { %p10105_p11 = pnand %p10103_p10, %p10100_p9 }
  0x27   : > { %10108 = shalt.err (!%p10105_p11)
}
  0x28   : > { %s10109_s13 = scalar_lea.vmem %s10509_s29, 576  ;;  %p10117_p2 = scmp.lt.s32.totalorder %s10509_s29, %s10509_s29 }
  0x29   : > { %p10110_p12 = scmp.ne.s32.totalorder %s10509_s29, %s10109_s13  ;;  %p10118_p4 = scmp.lt.s32.totalorder %s10109_s13, %s10109_s13 }
  0x2b   : > { %p10112_p13 = pnand %p10110_p12, %p10535_p7  ;;  %p10119_p6 = por %p10118_p4, %p10117_p2 }
  0x2d   : > { %p10113_p0 = pneg %p10112_p13 }
  0x2f   : > { %p10120_p8 = pnand %p10119_p6, %p10113_p0 }
  0x31   : > { %10123 = shalt.err (!%p10120_p8)
}
  0x32   : > { %s10377_s14 = smov 16   ;;  %s10378_s16 = smov 1  }
  0x33   : > { %9962 = dma.hbm_to_vmem [thread:$0]  (!%p10519_p5), %s13403_s28, 576, %s10509_s29, [#allocation7], %s10377_s14, %s10377_s14, %s10378_s16  }
  0x34   : > { %s13405_s4 = sld [smem:[#allocation194_spill]] }
  0x3a   : > { %s10124_s13 = scalar_lea.hbm %s13405_s4, 128 }
  0x3b   : > { %p10125_p9 = scmp.ne.s32.totalorder %s13405_s4, %s10124_s13  ;;  %p10131_p12 = scmp.lt.u32.totalorder %s10124_s13, %s13405_s4 }
  0x3d   : > { %p10127_p10 = pnand %p10125_p9, %p10535_p7 }
  0x3f   : > { %p10128_p11 = pneg %p10127_p10 }
  0x41   : > { %p10133_p13 = pnand %p10131_p12, %p10128_p11 }
  0x43   : > { %10136 = shalt.err (!%p10133_p13)
}
  0x44   : > { %s10137_s29 = scalar_lea.vmem %s10523_s19, 128  ;;  %p10145_p6 = scmp.lt.s32.totalorder %s10523_s19, %s10523_s19 }
  0x45   : > { %p10138_p0 = scmp.ne.s32.totalorder %s10523_s19, %s10137_s29  ;;  %p10146_p8 = scmp.lt.s32.totalorder %s10137_s29, %s10137_s29 }
  0x47   : > { %p10140_p2 = pnand %p10138_p0, %p10535_p7  ;;  %p10147_p9 = por %p10146_p8, %p10145_p6 }
  0x49   : > { %p10141_p4 = pneg %p10140_p2 }
  0x4b   : > { %p10148_p10 = pnand %p10147_p9, %p10141_p4 }
  0x4d   : > { %10151 = shalt.err (!%p10148_p10)
}
  0x4e   : > { %9968 = dma.hbm_to_vmem [thread:$0]  (!%p10519_p5), %s13405_s4, 128, %s10523_s19, [#allocation10]  }
  0x4f   : > { %s10152_s17 = scalar_lea.hbm %s13242_s9, 256 }
  0x50   : > { %p10153_p11 = scmp.ne.s32.totalorder %s13242_s9, %s10152_s17  ;;  %p10159_p0 = scmp.lt.u32.totalorder %s10152_s17, %s13242_s9 }
  0x52   : > { %p10155_p12 = pnand %p10153_p11, %p10535_p7 }
  0x54   : > { %p10156_p13 = pneg %p10155_p12 }
  0x56   : > { %p10161_p2 = pnand %p10159_p0, %p10156_p13 }
  0x58   : > { %10164 = shalt.err (!%p10161_p2)
}
  0x59   : > { %s10165_s19 = scalar_lea.vmem %s10525_s21, 256  ;;  %p10173_p9 = scmp.lt.s32.totalorder %s10525_s21, %s10525_s21 }
  0x5a   : > { %p10166_p4 = scmp.ne.s32.totalorder %s10525_s21, %s10165_s19  ;;  %p10174_p10 = scmp.lt.s32.totalorder %s10165_s19, %s10165_s19 }
  0x5c   : > { %p10168_p6 = pnand %p10166_p4, %p10535_p7  ;;  %p10175_p11 = por %p10174_p10, %p10173_p9 }
  0x5e   : > { %p10169_p8 = pneg %p10168_p6 }
  0x60   : > { %p10176_p12 = pnand %p10175_p11, %p10169_p8 }
  0x62   : > { %10179 = shalt.err (!%p10176_p12)
}
  0x63   : > { %9974 = dma.hbm_to_vmem [thread:$0]  (!%p10519_p5), %s13242_s9, 256, %s10525_s21, [#allocation13], %s10377_s14, %s10377_s14, %s10378_s16  }
  0x64   : > { %s10379_s7 = smov [#allocation8]   ;;  %s10380_s12 = smov [#allocation11]  }
  0x65   : > { %s452_s11 = sshll.u32 %s10379_s7, 4  ;;  %s488_s17 = sshll.u32 %s10380_s12, 4  ;;  %s453_s11 = int_to_ptr.vmem [resolvable:$true] %s452_s11  ;;  %s489_s17 = int_to_ptr.vmem [resolvable:$true] %s488_s17 }
  0x66   : > { %s10180_s20 = scalar_lea.hbm %s13235_s2, 64 }
  0x67   : > { %p10181_p13 = scmp.ne.s32.totalorder %s13235_s2, %s10180_s20  ;;  %p10187_p4 = scmp.lt.u32.totalorder %s10180_s20, %s13235_s2 }
  0x69   : > { %p10183_p0 = pnand %p10181_p13, %p10535_p7 }
  0x6b   : > { %p10184_p2 = pneg %p10183_p0 }
  0x6d   : > { %p10189_p6 = pnand %p10187_p4, %p10184_p2 }
  0x6f   : > { %10192 = shalt.err (!%p10189_p6)
}
  0x70   : > { %s10193_s21 = scalar_lea.vmem %s453_s11, 64  ;;  %p10201_p11 = scmp.lt.s32.totalorder %s453_s11, %s453_s11 }
  0x71   : > { %p10194_p8 = scmp.ne.s32.totalorder %s453_s11, %s10193_s21  ;;  %p10202_p12 = scmp.lt.s32.totalorder %s10193_s21, %s10193_s21 }
  0x73   : > { %p10196_p9 = pnand %p10194_p8, %p10535_p7  ;;  %p10203_p1 = por %p10202_p12, %p10201_p11 }
  0x75   : > { %p10197_p10 = pneg %p10196_p9 }
  0x77   : > { %p10204_p3 = pnand %p10203_p1, %p10197_p10 }
  0x79   : > { %10207 = shalt.err (!%p10204_p3)
}
  0x7a   : > { %9965 = dma.hbm_to_vmem [thread:$0]  (!%p10519_p5), %s13235_s2, 64, %s453_s11, [#allocation7], %s10377_s14, %s10377_s14, %s10378_s16  }
  0x7b   : > { %s10208_s22 = scalar_lea.hbm %s13241_s8, 2304 }
  0x7c   : > { %p10209_p1 = scmp.ne.s32.totalorder %s13241_s8, %s10208_s22  ;;  %p10215_p0 = scmp.lt.u32.totalorder %s10208_s22, %s13241_s8 }
  0x7e   : > { %p10211_p3 = pnand %p10209_p1, %p10535_p7 }
  0x80   : > { %p10212_p13 = pneg %p10211_p3 }
  0x82   : > { %p10217_p2 = pnand %p10215_p0, %p10212_p13 }
  0x84   : > { %10220 = shalt.err (!%p10217_p2)
}
  0x85   : > { %s10221_s29 = scalar_lea.vmem %s489_s17, 2304  ;;  %p10229_p9 = scmp.lt.s32.totalorder %s489_s17, %s489_s17 }
  0x86   : > { %p10222_p4 = scmp.ne.s32.totalorder %s489_s17, %s10221_s29  ;;  %p10230_p10 = scmp.lt.s32.totalorder %s10221_s29, %s10221_s29 }
  0x88   : > { %p10224_p6 = pnand %p10222_p4, %p10535_p7  ;;  %p10231_p11 = por %p10230_p10, %p10229_p9 }
  0x8a   : > { %p10225_p8 = pneg %p10224_p6 }
  0x8c   : > { %p10232_p12 = pnand %p10231_p11, %p10225_p8 }
  0x8e   : > { %10235 = shalt.err (!%p10232_p12)
}
  0x8f   : > { %9971 = dma.hbm_to_vmem [thread:$0]  (!%p10519_p5), %s13241_s8, 2304, %s489_s17, [#allocation10], %s10377_s14, %s10377_s14, %s10378_s16  }
  0x90   : > { %s10381_s4 = smov [#allocation14]   ;;  %s10382_s7 = smov [#allocation15]  }
  0x91   : > { %s514_s3 = sshll.u32 %s10381_s4, 4  ;;  %s540_s12 = sshll.u32 %s10382_s7, 4  ;;  %s515_s3 = int_to_ptr.vmem [resolvable:$true] %s514_s3  ;;  %s541_s12 = int_to_ptr.vmem [resolvable:$true] %s540_s12 }
  0x92   : > { %s10236_s20 = scalar_lea.hbm %s13243_s10, 512 }
  0x93   : > { %p10237_p1 = scmp.ne.s32.totalorder %s13243_s10, %s10236_s20  ;;  %p10243_p0 = scmp.lt.u32.totalorder %s10236_s20, %s13243_s10 }
  0x95   : > { %p10239_p3 = pnand %p10237_p1, %p10535_p7 }
  0x97   : > { %p10240_p13 = pneg %p10239_p3 }
  0x99   : > { %p10245_p2 = pnand %p10243_p0, %p10240_p13 }
  0x9b   : > { %10248 = shalt.err (!%p10245_p2)
}
  0x9c   : > { %s10249_s17 = scalar_lea.vmem %s515_s3, 512  ;;  %p10257_p9 = scmp.lt.s32.totalorder %s515_s3, %s515_s3 }
  0x9d   : > { %p10250_p4 = scmp.ne.s32.totalorder %s515_s3, %s10249_s17  ;;  %p10258_p10 = scmp.lt.s32.totalorder %s10249_s17, %s10249_s17 }
  0x9f   : > { %p10252_p6 = pnand %p10250_p4, %p10535_p7  ;;  %p10259_p11 = por %p10258_p10, %p10257_p9 }
  0xa1   : > { %p10253_p8 = pneg %p10252_p6 }
  0xa3   : > { %p10260_p12 = pnand %p10259_p11, %p10253_p8 }
  0xa5   : > { %10263 = shalt.err (!%p10260_p12)
}
  0xa6   : > { %9977 = dma.hbm_to_vmem [thread:$0]  (!%p10519_p5), %s13243_s10, 512, %s515_s3, [#allocation13], %s10377_s14, %s10377_s14, %s10378_s16  }
  0xa7   : > { %s10264_s23 = scalar_lea.hbm %s13248_s15, 128 }
  0xa8   : > { %p10265_p1 = scmp.ne.s32.totalorder %s13248_s15, %s10264_s23  ;;  %p10271_p0 = scmp.lt.u32.totalorder %s10264_s23, %s13248_s15 }
  0xaa   : > { %p10267_p3 = pnand %p10265_p1, %p10535_p7 }
  0xac   : > { %p10268_p13 = pneg %p10267_p3 }
  0xae   : > { %p10273_p2 = pnand %p10271_p0, %p10268_p13 }
  0xb0   : > { %10276 = shalt.err (!%p10273_p2)
}
  0xb1   : > { %s10277_s11 = scalar_lea.vmem %s541_s12, 128  ;;  %p10285_p9 = scmp.lt.s32.totalorder %s541_s12, %s541_s12 }
  0xb2   : > { %p10278_p4 = scmp.ne.s32.totalorder %s541_s12, %s10277_s11  ;;  %p10286_p10 = scmp.lt.s32.totalorder %s10277_s11, %s10277_s11 }
  0xb4   : > { %p10280_p6 = pnand %p10278_p4, %p10535_p7  ;;  %p10287_p11 = por %p10286_p10, %p10285_p9 }
  0xb6   : > { %p10281_p8 = pneg %p10280_p6 }
  0xb8   : > { %p10288_p12 = pnand %p10287_p11, %p10281_p8 }
  0xba   : > { %10291 = shalt.err (!%p10288_p12)
}
  0xbb   : > { %9980 = dma.hbm_to_vmem [thread:$0]  (!%p10519_p5), %s13248_s15, 128, %s541_s12, [#allocation16]  }
  0xbc   : > { %s10690_s18 = sadd.s32 1, %s10372_s27   ;;  %s41_s3 = sadd.s32 1, %s10368_s26 }
  0xbd   : > { %s38_s1 = ssub.s32 %s10372_s27, %s10690_s18  ;;  %p48_p1 = scmp.ne.s32.totalorder %s10368_s26, %s10364_s25 }
  0xbe   : > { %p39_p7 = scmp.eq.s32.totalorder %s38_s1, 0  ;;  %p49_p3 = scmp.eq.s32.totalorder %s10372_s27, 0 }
  0xbf   : > { %p54_p13 = scmp.ne.s32.totalorder %s10364_s25, %s10360_s24  ;;  %p13406_p2 = scmp.eq.s32.totalorder %s10504_s0, 0 }
  0xc0   : > { %s10701_s17 = scalar_select %p39_p7, %s10368_s26, %s41_s3  }
  0xc1   : > { %p50_p0 = por %p49_p3, %p48_p1  ;;  %p10705_p4 = por %p13406_p2, %p54_p13 }
  0xc2   : > { %p9992_p6 = scmp.lt.s32.totalorder %s10372_s27, 2  ;;  %s554_s4 = sand.u32 1, %s10368_s26  }
  0xc3   : > { %s9075_s12 = sshll.u32 %s554_s4, 6  ;;  %s9415_s7 = sshll.u32 %s10372_s27, 10 }
  0xc4   : > { %s13408_s20 = sld [smem:[#allocation191_spill]]  ;;  %s558_s24 = scalar_lea.vmem [#allocation4], %s9075_s12 }
  0xc5   : > { %s565_s19 = sshll.u32 %s558_s24, 4  ;;  %p10719_p5 = pnand %p9992_p6, %p50_p0  ;;  %s10717_s19 = int_to_ptr.vmem [resolvable:$true] %s565_s19 }
  0xc6   : > { %s10723_s27 = scalar_lea.sflag [#allocation5], %s554_s4 }
  0xc7   : > { %p10294_p9 = pneg %p10719_p5 }
  0xca   : > { %s10715_s13 = scalar_lea.hbm %s13408_s20, %s9415_s7  ;;  %s10297_s1 = scalar_lea.hbm %s13408_s20, 2048 }
  0xcb   : > { %s10292_s11 = scalar_lea.hbm %s10715_s13, 1024  ;;  %p10298_p12 = scmp.lt.u32.totalorder %s10715_s13, %s13408_s20 }
  0xcc   : > { %p10293_p8 = scmp.ne.s32.totalorder %s10715_s13, %s10292_s11  ;;  %p10299_p7 = scmp.lt.u32.totalorder %s10297_s1, %s10292_s11 }
  0xcd   : > { %p10301_p3 = scmp.lt.u32.totalorder %s10292_s11, %s10715_s13 }
  0xce   : > { %p10295_p10 = pnand %p10294_p9, %p10293_p8  ;;  %p10300_p1 = por %p10299_p7, %p10298_p12 }
  0xd0   : > { %p10296_p11 = pneg %p10295_p10  ;;  %p10302_p13 = por %p10301_p3, %p10300_p1 }
  0xd2   : > { %p10303_p0 = pnand %p10302_p13, %p10296_p11 }
  0xd4   : > { %10306 = shalt.err (!%p10303_p0)
}
  0xd5   : > { %s10307_s4 = scalar_lea.vmem %s10717_s19, 1024  ;;  %s10383_s7 = smov [#allocation4]  }
  0xd6   : > { %p10308_p2 = scmp.ne.s32.totalorder %s10717_s19, %s10307_s4  ;;  %s10312_s22 = sshll.u32 %s10383_s7, 4  ;;  %s10313_s22 = int_to_ptr.vmem [resolvable:$false] %s10312_s22 }
  0xd7   : > { %s10314_s23 = scalar_lea.vmem %s10313_s22, 2048  ;;  %p10315_p10 = scmp.lt.s32.totalorder %s10717_s19, %s10313_s22 }
  0xd8   : > { %p10310_p6 = pnand %p10308_p2, %p10294_p9  ;;  %p10316_p12 = scmp.lt.s32.totalorder %s10314_s23, %s10307_s4 }
  0xda   : > { %p10311_p8 = pneg %p10310_p6  ;;  %p10317_p7 = por %p10316_p12, %p10315_p10 }
  0xdc   : > { %p10318_p1 = pnand %p10317_p7, %p10311_p8 }
  0xde   : > { %10321 = shalt.err (!%p10318_p1)
}
  0xdf   : > { %s10384_s24 = smov 128   ;;  %s10385_s11 = smov 8  }
  0xe0   : > { %9984 = dma.hbm_to_vmem [thread:$0]  (!%p10719_p5), %s10715_s13, 1024, %s10717_s19, %s10723_s27, %s10384_s24, %s10384_s24, %s10385_s11  }
  0xe1   : > { %p13410_p9 = scmp.ne.s32.totalorder %s13401_s30, 0 }
  0xe3   : > { %577 = sbr.rel (%p13410_p9) target bundleno = 2089 (0x829), region = 88 }
  0xea   : > { %s579_s14 = sand.u32 1, %s10364_s25  }
  0xeb   : > { %s9079_s16 = sshll.u32 %s579_s14, 6  ;;  %s580_s1 = scalar_lea.sflag [#allocation5], %s579_s14 }
  0xec   : > { %s10754_s3 = scalar_lea.vmem [#allocation4], %s9079_s16 }
  0xed   : > { %10339 = dma.done.wait (%p10705_p4), %s580_s1, 1024  }
  0xee   : > { %10341 = vsyncadd (%p10705_p4), %s580_s1, 4294966272  ;;  %p13411_p11 = scmp.eq.s32.totalorder %s10504_s0, 0 }
  0xf0   : > { %10343 = dma.done.wait (%p13411_p11), [#allocation7], 640   ;;  %p13412_p5 = pmov %p13411_p11 }
  0xf2   : > { %10345 = vsyncadd (%p13412_p5), [#allocation7], 4294966656  ;;  %p13413_p3 = pmov %p13412_p5 }
  0xf4   : > { %10347 = dma.done.wait (%p13413_p3), [#allocation10], 2432   ;;  %p13414_p13 = pmov %p13413_p3 }
  0xf5   : > { %p13415_p0 = pmov %p13413_p3 }
  0xf6   : > { %10349 = vsyncadd (%p13414_p13), [#allocation10], 4294964864 }
  0xf7   : > { %10351 = dma.done.wait (%p13415_p0), [#allocation13], 768   ;;  %p13416_p2 = pmov %p13415_p0 }
  0xf8   : > { %p13417_p4 = pmov %p13415_p0 }
  0xf9   : > { %10353 = vsyncadd (%p13416_p2), [#allocation13], 4294966528 }
  0xfa   : > { %10355 = dma.done.wait (%p13417_p4), [#allocation16], 128   ;;  %p13418_p6 = pmov %p13415_p0 }
  0xfb   : > { %vm675_vm0 = vcmask 146432   ;;  %v10386_v0 = vmov 0   ;;  %v13264_v1 = vmov 0.0   ;;  %vm678_vm1 = vcmask 140288   ;;  %v10789_v2 = vld [vmem:[%s10754_s3 + $0x10] sm:$0xff]  ;;  %v10792_v3 = vld [vmem:[%s10754_s3] sm:$0xff] }
  0xfc   : > { %10357 = vsyncadd (%p13418_p6), [#allocation16], 4294967168  ;;  %10051 = vset.pattern.permute.xlu1 %v10386_v0  ;;  %10050 = vset.pattern.permute.xlu0 %v10386_v0  ;;  %680 = vst.msk [vmem:[#allocation2 + $0x18] sm:$0xff] %vm675_vm0, %v13264_v1  ;;  %v10795_v4 = vld [vmem:[%s10754_s3 + $0x18] sm:$0xff]  ;;  %s10388_s30 = smov 1   ;;  %v10802_v5 = vld [vmem:[%s10754_s3 + $0x8] sm:$0xff] }
  0xfd   : > { %681 = vst.msk [vmem:[#allocation2 + $0x20] sm:$0xff] %vm675_vm0, %v13264_v1  ;;  %676 = vst.msk [vmem:[#allocation2] sm:$0xff] %vm675_vm0, %v13264_v1  ;;  %701 = vrot.lane.b32.xlu1 %v10789_v2, %s10388_s30  ;;  %697 = vrot.lane.b32.xlu0 %v10792_v3, %s10388_s30  ;;  %v672_v6 = vld [vmem:[%s10754_s3 + $0x28] sm:$0xff]  ;;  %v671_v7 = vld [vmem:[%s10754_s3 + $0x20] sm:$0xff]  ;;  %vm721_vm2 = vcmask 138248   ;;  %s10389_s21 = smov 127  }
  0xfe   : > { %677 = vst.msk [vmem:[#allocation2 + $0x8] sm:$0xff] %vm675_vm0, %v13264_v1  ;;  %683 = vst.msk [vmem:[#allocation2 + $0x30] sm:$0xff] %vm675_vm0, %v13264_v1  ;;  %v674_v8 = vld [vmem:[%s10754_s3 + $0x38] sm:$0xff]  ;;  %v673_v9 = vld [vmem:[%s10754_s3 + $0x30] sm:$0xff]  ;;  %v10808_v10 = vpack.c.bf16 %v672_v6, %v671_v7  ;;  %s10390_s13 = smov 126   ;;  %vm1050_vm3 = vcmask 1046528  }
  0xff   : > { %684 = vst.msk [vmem:[#allocation2 + $0x38] sm:$0xff] %vm675_vm0, %v13264_v1  ;;  %686 = vst.msk [vmem:[#allocation2 + $0x48] sm:$0xff] %vm675_vm0, %v13264_v1  ;;  %v10810_v11 = vpack.c.bf16 %v674_v8, %v673_v9  ;;  %v9090_v12 = vld [vmem:[#allocation6 + $0x1] ss:$0 sm:$0xff]  ;;  %v9089_v13 = vld [vmem:[#allocation6] ss:$0 sm:$0xff] }
 0x100   : > { %687 = vst.msk [vmem:[#allocation2 + $0x50] sm:$0xff] %vm675_vm0, %v13264_v1  ;;  %v9091_v14 = vld [vmem:[#allocation6 + $0x2] ss:$0 sm:$0xff]  ;;  %v9092_v15 = vld [vmem:[#allocation6 + $0x3] ss:$0 sm:$0xff]  ;;  %vm1734_vm4 = vcmask 130048  }
 0x101   : > { %682 = vst.msk [vmem:[#allocation2 + $0x28] sm:$0x3] %vm678_vm1, %v13264_v1  ;;  %679 = vst.msk [vmem:[#allocation2 + $0x10] sm:$0x3] %vm678_vm1, %v13264_v1  ;;  %703 = vrot.lane.b32.xlu1 %v10795_v4, %s10388_s30  ;;  %699 = vrot.lane.b32.xlu0 %v10802_v5, %s10388_s30  ;;  %v9093_v16 = vld [vmem:[#allocation6 + $0x4] ss:$0 sm:$0xff] }
 0x102   : > { %685 = vst.msk [vmem:[#allocation2 + $0x40] sm:$0x3] %vm678_vm1, %v13264_v1  ;;  %688 = vst.msk [vmem:[#allocation2 + $0x58] sm:$0x3] %vm678_vm1, %v13264_v1  ;;  %v9094_v17 = vld [vmem:[#allocation6 + $0x5] ss:$0 sm:$0xff] }
 0x103   : > { %v9095_v18 = vld [vmem:[#allocation6 + $0x6] ss:$0 sm:$0xff]  ;;  %v9096_v19 = vld [vmem:[#allocation6 + $0x7] ss:$0 sm:$0xff]  ;;  %v9097_v20 = vld [vmem:[#allocation6 + $0x8] ss:$0 sm:$0xff] }
 0x104   : > { %v9098_v21 = vld [vmem:[#allocation6 + $0x9] ss:$0 sm:$0xff]  ;;  %v9099_v22 = vld [vmem:[#allocation6 + $0xa] ss:$0 sm:$0xff]  ;;  %v9100_v23 = vld [vmem:[#allocation6 + $0xb] ss:$0 sm:$0xff] }
 0x105   : > { %707 = vrot.lane.b32.xlu1 %v672_v6, %s10388_s30  ;;  %705 = vrot.lane.b32.xlu0 %v671_v7, %s10388_s30  ;;  %v9101_v24 = vld [vmem:[#allocation6 + $0xc] ss:$0 sm:$0xff]  ;;  %v9102_v25 = vld [vmem:[#allocation6 + $0xd] ss:$0 sm:$0xff]  ;;  %v9103_v26 = vld [vmem:[#allocation6 + $0xe] ss:$0 sm:$0xff] }
 0x106   : > { %v9104_v27 = vld [vmem:[#allocation6 + $0xf] ss:$0 sm:$0xff]  ;;  %v9105_v28 = vld [vmem:[#allocation6 + $0x10] ss:$0 sm:$0xff]  ;;  %v9106_v29 = vld [vmem:[#allocation6 + $0x11] ss:$0 sm:$0xff] }
 0x107   : > { %v9107_v30 = vld [vmem:[#allocation6 + $0x12] ss:$0 sm:$0xff]  ;;  %v9108_v31 = vld [vmem:[#allocation6 + $0x13] ss:$0 sm:$0xff]  ;;  %v9109_v32 = vld [vmem:[#allocation6 + $0x14] ss:$0 sm:$0xff] }
 0x108   : > { %v9110_v33 = vld [vmem:[#allocation6 + $0x15] ss:$0 sm:$0xff]  ;;  %v9111_v34 = vld [vmem:[#allocation6 + $0x16] ss:$0 sm:$0xff]  ;;  %v9112_v35 = vld [vmem:[#allocation6 + $0x17] ss:$0 sm:$0xff] }
 0x109   : > { %711 = vrot.lane.b32.xlu1 %v674_v8, %s10388_s30  ;;  %709 = vrot.lane.b32.xlu0 %v673_v9, %s10388_s30  ;;  %v9113_v36 = vld [vmem:[#allocation6 + $0x18] ss:$0 sm:$0xff]  ;;  %v9114_v37 = vld [vmem:[#allocation6 + $0x19] ss:$0 sm:$0xff]  ;;  %v9115_v38 = vld [vmem:[#allocation6 + $0x1a] ss:$0 sm:$0xff] }
 0x10a   : > { %v9116_v39 = vld [vmem:[#allocation6 + $0x1b] ss:$0 sm:$0xff]  ;;  %v9117_v40 = vld [vmem:[#allocation6 + $0x1c] ss:$0 sm:$0xff]  ;;  %v9118_v41 = vld [vmem:[#allocation6 + $0x1d] ss:$0 sm:$0xff] }
 0x10b   : > { %v9119_v42 = vld [vmem:[#allocation6 + $0x1e] ss:$0 sm:$0xff]  ;;  %vm10392_vm5 = vmmov 0   ;;  %vm1371_vm6 = vcmask 1045504   ;;  %s13457_s24 = sld [smem:[#allocation195_spill]]  ;;  %s13474_s19 = sld [smem:[#allocation193_spill]] }
 0x10c   : > { %9549 = vmatprep.mubr.msk.f32.mxu0 %vm10392_vm5, %v13264_v1  ;;  %9556 = vmatprep.mubr.msk.f32.mxu1 %vm10392_vm5, %v13264_v1  ;;  %vm3445_vm7 = vcmask 80896   ;;  %vm3447_vm8 = vcmask 74752   ;;  %vm3543_vm9 = vcmask 72712   ;;  %s13614_s27 = sld [smem:[#allocation197_spill]]  ;;  %s13619_s23 = sld [smem:[#allocation200_spill]]  ;;  %vm7134_vm10 = vcmask 64512  }
 0x10d   : > { %803 = vperm.xlu1 %10051, %v9090_v12   ;;  %799 = vperm.xlu0 %10050, %v9089_v13   ;;  %s13787_s1 = sld [smem:[#allocation199_spill]]  ;;  %p662_p8 = scmp.lt.s32.totalorder %s10504_s0, 1 }
 0x10f   : > { %s13863_s0 = smov (!%p662_p8, %s10504_s0), 1 }
 0x110   : > { %s9416_s22 = sshll.u32 %s13863_s0, 6 }
 0x111   : > { %807 = vperm.xlu1 %10051, %v9091_v14   ;;  %811 = vperm.xlu0 %10050, %v9092_v15   ;;  %s13458_s11 = smov %s13457_s24 }
 0x112   : > { %s13615_s12 = smov %s13614_s27 }
 0x115   : > { %843 = vperm.xlu1 %10051, %v9093_v16   ;;  %847 = vperm.xlu0 %10050, %v9094_v17  }
 0x119   : > { %851 = vperm.xlu1 %10051, %v9095_v18   ;;  %855 = vperm.xlu0 %10050, %v9096_v19  }
 0x11d   : > { %927 = vperm.xlu1 %10051, %v9097_v20   ;;  %931 = vperm.xlu0 %10050, %v9098_v21  }
 0x121   : > { %935 = vperm.xlu1 %10051, %v9099_v22   ;;  %939 = vperm.xlu0 %10050, %v9100_v23  }
 0x125   : > { %1011 = vperm.xlu1 %10051, %v9101_v24   ;;  %1015 = vperm.xlu0 %10050, %v9102_v25  }
 0x129   : > { %1019 = vperm.xlu1 %10051, %v9103_v26   ;;  %1023 = vperm.xlu0 %10050, %v9104_v27  }
 0x12d   : > { %1108 = vperm.xlu1 %10051, %v9105_v28   ;;  %1112 = vperm.xlu0 %10050, %v9106_v29  }
 0x131   : > { %1116 = vperm.xlu1 %10051, %v9107_v30   ;;  %1120 = vperm.xlu0 %10050, %v9108_v31  }
 0x135   : > { %1220 = vperm.xlu1 %10051, %v9109_v32   ;;  %1224 = vperm.xlu0 %10050, %v9110_v33  }
 0x139   : > { %1228 = vperm.xlu1 %10051, %v9111_v34   ;;  %1232 = vperm.xlu0 %10050, %v9112_v35  }
 0x13d   : > { %1332 = vperm.xlu1 %10051, %v9113_v36   ;;  %1336 = vperm.xlu0 %10050, %v9114_v37  }
 0x141   : > { %1340 = vperm.xlu1 %10051, %v9115_v38   ;;  %1344 = vperm.xlu0 %10050, %v9116_v39  }
 0x145   : > { %1429 = vperm.xlu1 %10051, %v9117_v40   ;;  %1433 = vperm.xlu0 %10050, %v9118_v41  }
 0x149   : > { %1437 = vperm.xlu1 %10051, %v9119_v42  }
 0x16f   : > { %v702_v43 = vpop.permute.xlu1 %701  ;;  %v698_v44 = vpop.permute.xlu0 %697 }
 0x170   : > { %724 = vst.msk [vmem:[#allocation2 + $0x19] sm:$0xff] %vm721_vm2, %v702_v43  ;;  %722 = vst.msk [vmem:[#allocation2 + $0x1] sm:$0xff] %vm721_vm2, %v698_v44 }
 0x173   : > { %v704_v45 = vpop.permute.xlu1 %703  ;;  %v700_v46 = vpop.permute.xlu0 %699 }
 0x174   : > { %725 = vst.msk [vmem:[#allocation2 + $0x21] sm:$0xff] %vm721_vm2, %v704_v45  ;;  %723 = vst.msk [vmem:[#allocation2 + $0x9] sm:$0xff] %vm721_vm2, %v700_v46 }
 0x177   : > { %v708_v47 = vpop.permute.xlu1 %707  ;;  %v706_v48 = vpop.permute.xlu0 %705  ;;  %v10836_v55 = vld [vmem:[#allocation2] sm:$0xff]  ;;  %v10844_v61 = vld [vmem:[#allocation2 + $0x18] sm:$0xff] }
 0x178   : > { %727 = vst.msk [vmem:[#allocation2 + $0x39] sm:$0xff] %vm721_vm2, %v708_v47  ;;  %726 = vst.msk [vmem:[#allocation2 + $0x31] sm:$0xff] %vm721_vm2, %v706_v48 }
 0x17b   : > { %v712_v49 = vpop.permute.xlu1 %711  ;;  %v710_v50 = vpop.permute.xlu0 %709  ;;  %v10838_v56 = vld [vmem:[#allocation2 + $0x8] sm:$0xff]  ;;  %v10846_v62 = vld [vmem:[#allocation2 + $0x20] sm:$0xff]  ;;  %v10886_v34 = vld [vmem:[#allocation2 + $0x10] sm:$0x3] }
 0x17c   : > { %729 = vst.msk [vmem:[#allocation2 + $0x51] sm:$0xff] %vm721_vm2, %v712_v49  ;;  %728 = vst.msk [vmem:[#allocation2 + $0x49] sm:$0xff] %vm721_vm2, %v710_v50  ;;  %v10894_v39 = vld [vmem:[#allocation2 + $0x28] sm:$0x3] }
 0x17f   : > { %v10852_v8 = vld [vmem:[#allocation2 + $0x30] sm:$0xff]  ;;  %v10854_v9 = vld [vmem:[#allocation2 + $0x38] sm:$0xff]  ;;  %v10902_v50 = vld [vmem:[#allocation2 + $0x40] sm:$0x3] }
 0x183   : > { %v10860_v16 = vld [vmem:[#allocation2 + $0x48] sm:$0xff]  ;;  %v10862_v17 = vld [vmem:[#allocation2 + $0x50] sm:$0xff] }
 0x18c   : > { %v10828_v51 = vpop.permute.xlu1 %803  ;;  %v10830_v52 = vpop.permute.xlu0 %799 }
 0x18d   : > { %13419 = vst [vmem:[#allocation22_spill] sm:$0xff] %v10828_v51  ;;  %13420 = vst [vmem:[#allocation23_spill] sm:$0xff] %v10830_v52  ;;  %v9287_v52 = vld [vmem:[#allocation11 + $0x82] ss:$0 sm:$0xff]  ;;  %v9280_v51 = vld [vmem:[#allocation11 + $0x7b] ss:$0 sm:$0xff] }
 0x190   : > { %v10832_v53 = vpop.permute.xlu1 %807  ;;  %v10834_v54 = vpop.permute.xlu0 %811 }
 0x191   : > { %13421 = vst [vmem:[#allocation24_spill] sm:$0xff] %v10832_v53  ;;  %13422 = vst [vmem:[#allocation25_spill] sm:$0xff] %v10834_v54  ;;  %v9275_v54 = vld [vmem:[#allocation11 + $0x76] ss:$0 sm:$0xff]  ;;  %v9276_v53 = vld [vmem:[#allocation11 + $0x77] ss:$0 sm:$0xff] }
 0x194   : > { %v844_v57 = vpop.permute.xlu1 %843  ;;  %v848_v58 = vpop.permute.xlu0 %847 }
 0x195   : > { %v858_v59 = vmul.f32 %v844_v57, %v10836_v55  ;;  %v859_v60 = vmul.f32 %v844_v57, %v10838_v56  ;;  %v860_v6 = vmul.f32 %v848_v58, %v10844_v61  ;;  %v861_v7 = vmul.f32 %v848_v58, %v10846_v62 }
 0x197   : > { %874 = vrot.lane.b32.xlu1 %v858_v59, %s10389_s21  ;;  %876 = vrot.lane.b32.xlu0 %v859_v60, %s10389_s21 }
 0x198   : > { %v852_v63 = vpop.permute.xlu1 %851  ;;  %v856_v0 = vpop.permute.xlu0 %855 }
 0x199   : > { %v862_v14 = vmul.f32 %v852_v63, %v10852_v8  ;;  %v863_v15 = vmul.f32 %v852_v63, %v10854_v9  ;;  %v864_v20 = vmul.f32 %v856_v0, %v10860_v16  ;;  %v865_v21 = vmul.f32 %v856_v0, %v10862_v17 }
 0x19b   : > { %880 = vrot.lane.b32.xlu0 %v861_v7, %s10389_s21  ;;  %878 = vrot.lane.b32.xlu1 %v860_v6, %s10389_s21 }
 0x19c   : > { %v928_v12 = vpop.permute.xlu1 %927  ;;  %v932_v13 = vpop.permute.xlu0 %931 }
 0x19d   : > { %v942_v24 = vmul.f32 %v928_v12, %v10836_v55  ;;  %v943_v25 = vmul.f32 %v928_v12, %v10838_v56  ;;  %v944_v28 = vmul.f32 %v932_v13, %v10844_v61  ;;  %v945_v29 = vmul.f32 %v932_v13, %v10846_v62  ;;  %v10911_v13 = vld [vmem:[#allocation2 + $0x58] sm:$0x3] }
 0x19f   : > { %884 = vrot.lane.b32.xlu0 %v863_v15, %s10389_s21  ;;  %882 = vrot.lane.b32.xlu1 %v862_v14, %s10389_s21 }
 0x1a0   : > { %v936_v18 = vpop.permute.xlu1 %935  ;;  %v940_v19 = vpop.permute.xlu0 %939 }
 0x1a1   : > { %v946_v32 = vmul.f32 %v936_v18, %v10852_v8  ;;  %v947_v33 = vmul.f32 %v936_v18, %v10854_v9  ;;  %v948_v38 = vmul.f32 %v940_v19, %v10860_v16  ;;  %v949_v42 = vmul.f32 %v940_v19, %v10862_v17 }
 0x1a3   : > { %888 = vrot.lane.b32.xlu0 %v865_v21, %s10389_s21  ;;  %886 = vrot.lane.b32.xlu1 %v864_v20, %s10389_s21 }
 0x1a4   : > { %v10868_v22 = vpop.permute.xlu1 %1011  ;;  %v10870_v23 = vpop.permute.xlu0 %1015 }
 0x1a5   : > { %13423 = vst [vmem:[#allocation26_spill] sm:$0xff] %v10868_v22  ;;  %13424 = vst [vmem:[#allocation27_spill] sm:$0xff] %v10870_v23  ;;  %v9292_v23 = vld [vmem:[#allocation11 + $0x87] ss:$0 sm:$0xff]  ;;  %v9279_v22 = vld [vmem:[#allocation11 + $0x7a] ss:$0 sm:$0xff] }
 0x1a7   : > { %960 = vrot.lane.b32.xlu0 %v943_v25, %s10390_s13  ;;  %958 = vrot.lane.b32.xlu1 %v942_v24, %s10390_s13 }
 0x1a8   : > { %v10876_v26 = vpop.permute.xlu1 %1019  ;;  %v10878_v27 = vpop.permute.xlu0 %1023 }
 0x1a9   : > { %13425 = vst [vmem:[#allocation28_spill] sm:$0xff] %v10876_v26  ;;  %13426 = vst [vmem:[#allocation29_spill] sm:$0xff] %v10878_v27  ;;  %v9288_v27 = vld [vmem:[#allocation11 + $0x83] ss:$0 sm:$0xff]  ;;  %v9291_v26 = vld [vmem:[#allocation11 + $0x86] ss:$0 sm:$0xff] }
 0x1ab   : > { %964 = vrot.lane.b32.xlu0 %v945_v29, %s10390_s13  ;;  %962 = vrot.lane.b32.xlu1 %v944_v28, %s10390_s13 }
 0x1ac   : > { %v1109_v30 = vpop.permute.xlu1 %1108  ;;  %v1113_v31 = vpop.permute.xlu0 %1112 }
 0x1ad   : > { %v1123_v35 = vmul.f32 %v1109_v30, %v10836_v55  ;;  %v1124_v36 = vmul.f32 %v1109_v30, %v10838_v56  ;;  %v1125_v37 = vmul.f32 %v1109_v30, %v10886_v34  ;;  %v1126_v43 = vmul.f32 %v1113_v31, %v10844_v61 }
 0x1ae   : > { %v1127_v44 = vmul.f32 %v1113_v31, %v10846_v62  ;;  %v1128_v45 = vmul.f32 %v1113_v31, %v10894_v39 }
 0x1af   : > { %968 = vrot.lane.b32.xlu0 %v947_v33, %s10390_s13  ;;  %966 = vrot.lane.b32.xlu1 %v946_v32, %s10390_s13  ;;  %v1148_v46 = vrot.slane %v1124_v36, 1  ;;  %v1150_v47 = vrot.slane %v1125_v37, 1  ;;  %v1147_v48 = vrot.slane %v1123_v35, 1  ;;  %v1152_v60 = vrot.slane %v1126_v43, 1 }
 0x1b0   : > { %v1117_v40 = vpop.permute.xlu1 %1116  ;;  %v1121_v41 = vpop.permute.xlu0 %1120  ;;  %v1153_v58 = vrot.slane %v1127_v44, 1  ;;  %v1155_v59 = vrot.slane %v1128_v45, 1 }
 0x1b1   : > { %v1129_v57 = vmul.f32 %v1117_v40, %v10852_v8  ;;  %v1130_v63 = vmul.f32 %v1117_v40, %v10854_v9  ;;  %v1131_v0 = vmul.f32 %v1117_v40, %v10902_v50  ;;  %v1151_v7 = vsel %vm1050_vm3, %v1148_v46, %v1150_v47 }
 0x1b2   : > { %v1149_v12 = vsel %vm1050_vm3, %v1147_v48, %v1148_v46  ;;  %v1132_v14 = vmul.f32 %v1121_v41, %v10860_v16  ;;  %v1133_v15 = vmul.f32 %v1121_v41, %v10862_v17  ;;  %v1134_v18 = vmul.f32 %v1121_v41, %v10911_v13 }
 0x1b3   : > { %972 = vrot.lane.b32.xlu0 %v949_v42, %s10390_s13  ;;  %970 = vrot.lane.b32.xlu1 %v948_v38, %s10390_s13  ;;  %v1156_v20 = vsel %vm1050_vm3, %v1153_v58, %v1155_v59  ;;  %v1154_v21 = vsel %vm1050_vm3, %v1152_v60, %v1153_v58  ;;  %v1158_v24 = vrot.slane %v1130_v63, 1  ;;  %v1160_v25 = vrot.slane %v1131_v0, 1 }
 0x1b4   : > { %v1221_v49 = vpop.permute.xlu1 %1220  ;;  %v1225_v6 = vpop.permute.xlu0 %1224  ;;  %v1157_v28 = vrot.slane %v1129_v57, 1  ;;  %v1163_v31 = vrot.slane %v1133_v15, 1  ;;  %v1165_v32 = vrot.slane %v1134_v18, 1  ;;  %v1162_v33 = vrot.slane %v1132_v14, 1 }
 0x1b5   : > { %v1236_v30 = vmul.f32 %v1221_v49, %v10838_v56  ;;  %v1235_v35 = vmul.f32 %v1221_v49, %v10836_v55  ;;  %v1237_v36 = vmul.f32 %v1221_v49, %v10886_v34  ;;  %v1161_v37 = vsel %vm1050_vm3, %v1158_v24, %v1160_v25 }
 0x1b6   : > { %v1159_v38 = vsel %vm1050_vm3, %v1157_v28, %v1158_v24  ;;  %v1239_v41 = vmul.f32 %v1225_v6, %v10846_v62  ;;  %v1240_v42 = vmul.f32 %v1225_v6, %v10894_v39  ;;  %v1238_v43 = vmul.f32 %v1225_v6, %v10844_v61 }
 0x1b7   : > { %1169 = vrot.lane.b32.xlu0 %v1151_v7, %s10389_s21  ;;  %1167 = vrot.lane.b32.xlu1 %v1149_v12, %s10389_s21  ;;  %v1166_v44 = vsel %vm1050_vm3, %v1163_v31, %v1165_v32  ;;  %v1164_v45 = vsel %vm1050_vm3, %v1162_v33, %v1163_v31  ;;  %v1260_v46 = vrot.slane %v1236_v30, 1  ;;  %v1262_v48 = vrot.slane %v1237_v36, 1 }
 0x1b8   : > { %v1229_v19 = vpop.permute.xlu1 %1228  ;;  %v1233_v29 = vpop.permute.xlu0 %1232  ;;  %v1259_v49 = vrot.slane %v1235_v35, 1  ;;  %v9834_v57 = vpack.c.bf16 %v10802_v5, %v10792_v3  ;;  %v1265_v58 = vrot.slane %v1239_v41, 1  ;;  %v1267_v59 = vrot.slane %v1240_v42, 1  ;;  %v1728_v3 = vld [vmem:[#allocation9] sm:$0xff]  ;;  %v1729_v41 = vld [vmem:[%s13238_s5] sm:$0xff] }
 0x1b9   : > { %v13262_v60 = vmov 0.0|0.0   ;;  %v1241_v63 = vmul.f32 %v1229_v19, %v10852_v8  ;;  %v1242_v0 = vmul.f32 %v1229_v19, %v10854_v9  ;;  %v1243_v6 = vmul.f32 %v1229_v19, %v10902_v50 }
 0x1ba   : > { %9833 = vmatprep.subr.bf16.mxu0 %v13262_v60  ;;  %9836 = vmatprep.subr.bf16.mxu1 %v13262_v60  ;;  %v1263_v5 = vsel %vm1050_vm3, %v1260_v46, %v1262_v48  ;;  %v1261_v12 = vsel %vm1050_vm3, %v1259_v49, %v1260_v46  ;;  %v1264_v14 = vrot.slane %v1238_v43, 1  ;;  %v9837_v15 = vpack.c.bf16 %v10795_v4, %v10789_v2 }
 0x1bb   : > { %1173 = vrot.lane.b32.xlu0 %v1156_v20, %s10389_s21  ;;  %1171 = vrot.lane.b32.xlu1 %v1154_v21, %s10389_s21  ;;  %v1245_v19 = vmul.f32 %v1233_v29, %v10862_v17  ;;  %v1246_v20 = vmul.f32 %v1233_v29, %v10911_v13  ;;  %v1270_v21 = vrot.slane %v1242_v0, 1  ;;  %v1272_v24 = vrot.slane %v1243_v6, 1 }
 0x1bc   : > { %v10925_v40 = vpop.permute.xlu1 %1332  ;;  %v10934_v47 = vpop.permute.xlu0 %1336  ;;  %9835 = vmatpush3.bf16.msra.mxu0 %v9834_v57  ;;  %9838 = vmatpush3.bf16.msra.mxu1 %v9837_v15  ;;  %v1244_v25 = vmul.f32 %v1233_v29, %v10860_v16  ;;  %v1268_v2 = vsel %vm1050_vm3, %v1265_v58, %v1267_v59  ;;  %v1266_v4 = vsel %vm1050_vm3, %v1264_v14, %v1265_v58  ;;  %v1269_v28 = vrot.slane %v1241_v63, 1  ;;  %v9120_v58 = vld [vmem:[#allocation6 + $0x1f] ss:$0 sm:$0xff] }
 0x1bd   : > { %13427 = vst [vmem:[#allocation30_spill] sm:$0xff] %v10925_v40  ;;  %13428 = vst [vmem:[#allocation31_spill] sm:$0xff] %v10934_v47  ;;  %9839 = vmatprep.subr.bf16.mxu0 %v13262_v60  ;;  %9842 = vmatprep.subr.bf16.mxu1 %v13262_v60  ;;  %v1273_v29 = vsel %vm1050_vm3, %v1270_v21, %v1272_v24  ;;  %v1275_v31 = vrot.slane %v1245_v19, 1  ;;  %v1277_v32 = vrot.slane %v1246_v20, 1  ;;  %v9271_v47 = vld [vmem:[#allocation11 + $0x72] ss:$0 sm:$0xff] }
 0x1be   : > { %v9272_v40 = vld [vmem:[#allocation11 + $0x73] ss:$0 sm:$0xff] }
 0x1bf   : > { %1177 = vrot.lane.b32.xlu0 %v1161_v37, %s10389_s21  ;;  %1175 = vrot.lane.b32.xlu1 %v1159_v38, %s10389_s21  ;;  %v1271_v37 = vsel %vm1050_vm3, %v1269_v28, %v1270_v21  ;;  %v1274_v38 = vrot.slane %v1244_v25, 1 }
 0x1c0   : > { %v10945_v7 = vpop.permute.xlu1 %1340  ;;  %v10956_v18 = vpop.permute.xlu0 %1344  ;;  %9550 = vmatmul.mubr.msk.f32.vlgmr.msra.gmra.mrb[0].mxu0 %vm1734_vm4, %v1728_v3  ;;  %9557 = vmatmul.mubr.msk.f32.vlgmr.msra.gmra.mrb[0].mxu1 %vm1734_vm4, %v1728_v3 }
 0x1c1   : > { %13429 = vst [vmem:[#allocation32_spill] sm:$0xff] %v10945_v7  ;;  %13430 = vst [vmem:[#allocation33_spill] sm:$0xff] %v10956_v18  ;;  %9841 = vmatpush3.bf16.msra.mxu0 %v10808_v10  ;;  %9563 = vmatprep.mubr.msk.f32.mxu0 %vm10392_vm5, %v13264_v1  ;;  %v1276_v46 = vsel %vm1050_vm3, %v1274_v38, %v1275_v31  ;;  %v9243_v18 = vld [vmem:[#allocation11 + $0x56] ss:$0 sm:$0xff]  ;;  %v9252_v7 = vld [vmem:[#allocation11 + $0x5f] ss:$0 sm:$0xff] }
 0x1c2   : > { %9845 = vmatprep.subr.bf16.mxu0 %v13262_v60  ;;  %9844 = vmatpush3.bf16.msra.mxu1 %v10810_v11 }
 0x1c3   : > { %1181 = vrot.lane.b32.xlu0 %v1166_v44, %s10389_s21  ;;  %1179 = vrot.lane.b32.xlu1 %v1164_v45, %s10389_s21  ;;  %v1278_v44 = vsel %vm1050_vm3, %v1275_v31, %v1277_v32 }
 0x1c4   : > { %v1430_v30 = vpop.permute.xlu1 %1429  ;;  %9564 = vmatmul.mubr.msk.f32.vlgmr.msra.gmra.mrb[2].mxu0 %vm1734_vm4, %v1728_v3  ;;  %v1434_v36 = vpop.permute.xlu0 %1433  ;;  %9570 = vmatprep.mubr.msk.f32.mxu1 %vm10392_vm5, %v13264_v1 }
 0x1c5   : > { %v1444_v33 = vmul.f32 %v1430_v30, %v10836_v55  ;;  %v1445_v35 = vmul.f32 %v1430_v30, %v10838_v56  ;;  %9847 = vmatpush3.bf16.msra.mxu0 %v9834_v57  ;;  %9577 = vmatprep.mubr.msk.f32.mxu0 %vm10392_vm5, %v13264_v1  ;;  %v1446_v42 = vmul.f32 %v1430_v30, %v10886_v34 }
 0x1c6   : > { %v1447_v43 = vmul.f32 %v1434_v36, %v10844_v61  ;;  %9571 = vmatmul.mubr.msk.f32.vlgmr.msra.gmra.mrb[2].mxu1 %vm1734_vm4, %v1728_v3  ;;  %9848 = vmatprep.subr.bf16.mxu1 %v13262_v60  ;;  %v1448_v45 = vmul.f32 %v1434_v36, %v10846_v62  ;;  %v1449_v59 = vmul.f32 %v1434_v36, %v10894_v39 }
 0x1c7   : > { %1281 = vrot.lane.b32.xlu0 %v1263_v5, %s10390_s13  ;;  %1279 = vrot.lane.b32.xlu1 %v1261_v12, %s10390_s13  ;;  %v1468_v48 = vrot.slane %v1444_v33, 2  ;;  %v1469_v49 = vrot.slane %v1445_v35, 2  ;;  %v1471_v63 = vrot.slane %v1446_v42, 2 }
 0x1c8   : > { %9578 = vmatmul.mubr.msk.f32.vlgmr.msra.gmra.mrb[4].mxu0 %vm1734_vm4, %v1729_v41  ;;  %9851 = vmatprep.subr.bf16.mxu0 %v13262_v60  ;;  %v1438_v57 = vpop.permute.xlu1 %1437  ;;  %v1473_v0 = vrot.slane %v1447_v43, 2  ;;  %v1474_v12 = vrot.slane %v1448_v45, 2  ;;  %v1476_v14 = vrot.slane %v1449_v59, 2 }
 0x1c9   : > { %9850 = vmatpush3.bf16.msra.mxu1 %v9837_v15  ;;  %9853 = vmatpush3.bf16.msra.mxu0 %v10808_v10  ;;  %v1450_v6 = vmul.f32 %v1438_v57, %v10852_v8  ;;  %v1451_v3 = vmul.f32 %v1438_v57, %v10854_v9  ;;  %v1470_v5 = vsel %vm1371_vm6, %v1468_v48, %v1469_v49 }
 0x1ca   : > { %9584 = vmatprep.mubr.msk.f32.mxu1 %vm10392_vm5, %v13264_v1  ;;  %9591 = vmatprep.mubr.msk.f32.mxu0 %vm10392_vm5, %v13264_v1  ;;  %v1452_v10 = vmul.f32 %v1438_v57, %v10902_v50  ;;  %v1472_v15 = vsel %vm1371_vm6, %v1469_v49, %v1471_v63  ;;  %v1475_v19 = vsel %vm1371_vm6, %v1473_v0, %v1474_v12 }
 0x1cb   : > { %1285 = vrot.lane.b32.xlu0 %v1268_v2, %s10390_s13  ;;  %1283 = vrot.lane.b32.xlu1 %v1266_v4, %s10390_s13  ;;  %v1478_v20 = vrot.slane %v1450_v6, 2  ;;  %v1479_v21 = vrot.slane %v1451_v3, 2  ;;  %v9122_v3 = vld [vmem:[#allocation6 + $0x21] ss:$0 sm:$0xff] }
 0x1cc   : > { %9854 = vmatprep.subr.bf16.mxu1 %v13262_v60  ;;  %9857 = vmatprep.subr.bf16.mxu0 %v13262_v60  ;;  %v1481_v25 = vrot.slane %v1452_v10, 2  ;;  %v9123_v10 = vld [vmem:[#allocation6 + $0x22] ss:$0 sm:$0xff] }
 0x1cd   : > { %9585 = vmatmul.mubr.msk.f32.vlgmr.msra.gmra.mrb[4].mxu1 %vm1734_vm4, %v1729_v41  ;;  %9592 = vmatmul.mubr.msk.f32.vlgmr.msra.gmra.mrb[6].mxu0 %vm1734_vm4, %v1729_v41  ;;  %v1480_v24 = vsel %vm1371_vm6, %v1478_v20, %v1479_v21 }
 0x1ce   : > { %9856 = vmatpush3.bf16.msra.mxu1 %v10810_v11  ;;  %9598 = vmatprep.mubr.msk.f32.mxu1 %vm10392_vm5, %v13264_v1  ;;  %v1477_v11 = vsel %vm1371_vm6, %v1474_v12, %v1476_v14  ;;  %v1482_v2 = vsel %vm1371_vm6, %v1479_v21, %v1481_v25  ;;  %v9124_v12 = vld [vmem:[#allocation6 + $0x23] ss:$0 sm:$0xff]  ;;  %v1731_v25 = vld [vmem:[%s13239_s6 + $0x8] sm:$0xff] }
 0x1cf   : > { %1289 = vrot.lane.b32.xlu0 %v1273_v29, %s10390_s13  ;;  %1287 = vrot.lane.b32.xlu1 %v1271_v37, %s10390_s13 }
 0x1d0   : > { %9605 = vmatprep.mubr.msk.f32.mxu0 %vm10392_vm5, %v13264_v1  ;;  %9860 = vmatprep.subr.bf16.mxu1 %v13262_v60 }
 0x1d1   : > { %9599 = vmatmul.mubr.msk.f32.vlgmr.msra.gmra.mrb[6].mxu1 %vm1734_vm4, %v1729_v41 }
 0x1d2   : > { %9612 = vmatprep.mubr.msk.f32.mxu1 %vm10392_vm5, %v13264_v1 }
 0x1d3   : > { %1293 = vrot.lane.b32.xlu0 %v1278_v44, %s10390_s13  ;;  %1291 = vrot.lane.b32.xlu1 %v1276_v46, %s10390_s13 }
 0x1d7   : > { %1441 = vperm.xlu0 %10050, %v9120_v58   ;;  %1488 = vrot.lane.b32.xlu1 %v1470_v5, %s10389_s21  ;;  %v9121_v5 = vld [vmem:[#allocation6 + $0x20] ss:$0 sm:$0xff] }
 0x1db   : > { %1490 = vrot.lane.b32.xlu0 %v1472_v15, %s10389_s21  ;;  %1492 = vrot.lane.b32.xlu1 %v1475_v19, %s10389_s21 }
 0x1df   : > { %1494 = vrot.lane.b32.xlu0 %v1477_v11, %s10389_s21  ;;  %1496 = vrot.lane.b32.xlu1 %v1480_v24, %s10389_s21  ;;  %v1730_v24 = vld [vmem:[%s13239_s6] sm:$0xff] }
 0x1e3   : > { %1498 = vrot.lane.b32.xlu0 %v1482_v2, %s10389_s21  ;;  %v9858_v2 = vpack.c.bf16 %v1731_v25, %v1730_v24  ;;  %v1732_v25 = vld [vmem:[%s13457_s24] sm:$0xff]  ;;  %s13598_s24 = sld [smem:[#allocation196_spill]] }
 0x1e5   : > { %9859 = vmatpush3.bf16.msra.mxu0 %v9858_v2  ;;  %9862 = vmatpush3.bf16.msra.mxu1 %v9858_v2 }
 0x1e6   : > { %9863 = vmatprep.subr.bf16.mxu0 %v13262_v60  ;;  %9866 = vmatprep.subr.bf16.mxu1 %v13262_v60 }
 0x1e9   : > { %s13599_s14 = smov %s13598_s24 }
 0x209   : > { %v11034_v4 = vpop.permute.xlu0 %876  ;;  %v11073_v14 = vpop.permute.xlu1 %874 }
 0x20a   : > { %13431 = vst [vmem:[#allocation34_spill] sm:$0xff] %v11034_v4  ;;  %13447 = vst [vmem:[#allocation50_spill] sm:$0xff] %v11073_v14  ;;  %v9249_v14 = vld [vmem:[#allocation11 + $0x5c] ss:$0 sm:$0xff]  ;;  %v9251_v4 = vld [vmem:[#allocation11 + $0x5e] ss:$0 sm:$0xff] }
 0x20d   : > { %v11036_v28 = vpop.permute.xlu0 %880  ;;  %v11075_v15 = vpop.permute.xlu1 %878 }
 0x20e   : > { %13432 = vst [vmem:[#allocation35_spill] sm:$0xff] %v11036_v28  ;;  %13448 = vst [vmem:[#allocation51_spill] sm:$0xff] %v11075_v15  ;;  %v9247_v15 = vld [vmem:[#allocation11 + $0x5a] ss:$0 sm:$0xff]  ;;  %v9250_v28 = vld [vmem:[#allocation11 + $0x5d] ss:$0 sm:$0xff] }
 0x211   : > { %v11038_v30 = vpop.permute.xlu0 %884  ;;  %v11077_v19 = vpop.permute.xlu1 %882 }
 0x212   : > { %13433 = vst [vmem:[#allocation36_spill] sm:$0xff] %v11038_v30  ;;  %13449 = vst [vmem:[#allocation52_spill] sm:$0xff] %v11077_v19  ;;  %v9242_v19 = vld [vmem:[#allocation11 + $0x55] ss:$0 sm:$0xff]  ;;  %v9244_v30 = vld [vmem:[#allocation11 + $0x57] ss:$0 sm:$0xff] }
 0x215   : > { %v11040_v29 = vpop.permute.xlu0 %888  ;;  %v11079_v20 = vpop.permute.xlu1 %886 }
 0x216   : > { %13434 = vst [vmem:[#allocation37_spill] sm:$0xff] %v11040_v29  ;;  %13450 = vst [vmem:[#allocation53_spill] sm:$0xff] %v11079_v20  ;;  %v9240_v20 = vld [vmem:[#allocation11 + $0x53] ss:$0 sm:$0xff]  ;;  %v9239_v29 = vld [vmem:[#allocation11 + $0x52] ss:$0 sm:$0xff] }
 0x219   : > { %v11042_v31 = vpop.permute.xlu0 %960  ;;  %v11081_v21 = vpop.permute.xlu1 %958 }
 0x21a   : > { %13435 = vst [vmem:[#allocation38_spill] sm:$0xff] %v11042_v31  ;;  %13451 = vst [vmem:[#allocation54_spill] sm:$0xff] %v11081_v21  ;;  %v9245_v21 = vld [vmem:[#allocation11 + $0x58] ss:$0 sm:$0xff]  ;;  %v9248_v31 = vld [vmem:[#allocation11 + $0x5b] ss:$0 sm:$0xff] }
 0x21d   : > { %v11044_v32 = vpop.permute.xlu0 %964  ;;  %v11083_v11 = vpop.permute.xlu1 %962 }
 0x21e   : > { %13436 = vst [vmem:[#allocation39_spill] sm:$0xff] %v11044_v32  ;;  %13452 = vst [vmem:[#allocation55_spill] sm:$0xff] %v11083_v11  ;;  %v9241_v11 = vld [vmem:[#allocation11 + $0x54] ss:$0 sm:$0xff]  ;;  %v9246_v32 = vld [vmem:[#allocation11 + $0x59] ss:$0 sm:$0xff] }
 0x221   : > { %v11046_v33 = vpop.permute.xlu0 %968 }
 0x222   : > { %13437 = vst [vmem:[#allocation40_spill] sm:$0xff] %v11046_v33  ;;  %v9237_v33 = vld [vmem:[#allocation11 + $0x50] ss:$0 sm:$0xff] }
 0x225   : > { %v11048_v35 = vpop.permute.xlu0 %972 }
 0x226   : > { %13438 = vst [vmem:[#allocation41_spill] sm:$0xff] %v11048_v35  ;;  %v9235_v35 = vld [vmem:[#allocation11 + $0x4e] ss:$0 sm:$0xff] }
 0x229   : > { %v11050_v36 = vpop.permute.xlu0 %1169 }
 0x22a   : > { %13439 = vst [vmem:[#allocation42_spill] sm:$0xff] %v11050_v36 }
 0x22d   : > { %v11052_v37 = vpop.permute.xlu0 %1173 }
 0x22e   : > { %13440 = vst [vmem:[#allocation43_spill] sm:$0xff] %v11052_v37  ;;  %v9231_v37 = vld [vmem:[#allocation11 + $0x4a] ss:$0 sm:$0xff] }
 0x231   : > { %v11054_v38 = vpop.permute.xlu0 %1177 }
 0x232   : > { %13441 = vst [vmem:[#allocation44_spill] sm:$0xff] %v11054_v38 }
 0x235   : > { %v11056_v41 = vpop.permute.xlu0 %1181 }
 0x236   : > { %13442 = vst [vmem:[#allocation45_spill] sm:$0xff] %v11056_v41 }
 0x239   : > { %v11058_v42 = vpop.permute.xlu0 %1281 }
 0x23a   : > { %13443 = vst [vmem:[#allocation46_spill] sm:$0xff] %v11058_v42  ;;  %v9229_v42 = vld [vmem:[#allocation11 + $0x48] ss:$0 sm:$0xff] }
 0x23d   : > { %v11060_v43 = vpop.permute.xlu0 %1285 }
 0x23e   : > { %13444 = vst [vmem:[#allocation47_spill] sm:$0xff] %v11060_v43 }
 0x241   : > { %v11062_v44 = vpop.permute.xlu0 %1289 }
 0x242   : > { %13445 = vst [vmem:[#allocation48_spill] sm:$0xff] %v11062_v44 }
 0x245   : > { %v11064_v45 = vpop.permute.xlu0 %1293 }
 0x246   : > { %13446 = vst [vmem:[#allocation49_spill] sm:$0xff] %v11064_v45 }
 0x256   : > { %v1442_v46 = vpop.permute.xlu0 %1441 }
 0x257   : > { %v1453_v48 = vmul.f32 %v1442_v46, %v10860_v16  ;;  %v1454_v49 = vmul.f32 %v1442_v46, %v10862_v17  ;;  %v1455_v57 = vmul.f32 %v1442_v46, %v10911_v13  ;;  %v11093_v46 = vpop.permute.xlu1 %966 }
 0x258   : > { %13453 = vst [vmem:[#allocation56_spill] sm:$0xff] %v11093_v46  ;;  %v9238_v46 = vld [vmem:[#allocation11 + $0x51] ss:$0 sm:$0xff] }
 0x259   : > { %v1484_v58 = vrot.slane %v1454_v49, 2  ;;  %v1486_v59 = vrot.slane %v1455_v57, 2  ;;  %v1483_v63 = vrot.slane %v1453_v48, 2 }
 0x25b   : > { %v1487_v0 = vsel %vm1371_vm6, %v1484_v58, %v1486_v59  ;;  %v1485_v6 = vsel %vm1371_vm6, %v1483_v63, %v1484_v58  ;;  %v11095_v48 = vpop.permute.xlu1 %970 }
 0x25c   : > { %1502 = vrot.lane.b32.xlu0 %v1487_v0, %s10389_s21  ;;  %1500 = vrot.lane.b32.xlu1 %v1485_v6, %s10389_s21  ;;  %13454 = vst [vmem:[#allocation57_spill] sm:$0xff] %v11095_v48 }
 0x25f   : > { %v11097_v49 = vpop.permute.xlu1 %1167 }
 0x260   : > { %1545 = vperm.xlu0 %10050, %v9122_v3   ;;  %1541 = vperm.xlu1 %10051, %v9121_v5   ;;  %13455 = vst [vmem:[#allocation58_spill] sm:$0xff] %v11097_v49 }
 0x263   : > { %v11104_v6 = vpop.permute.xlu1 %1171 }
 0x264   : > { %1553 = vperm.xlu0 %10050, %v9124_v12   ;;  %1549 = vperm.xlu1 %10051, %v9123_v10   ;;  %13456 = vst [vmem:[#allocation59_spill] sm:$0xff] %v11104_v6 }
 0x293   : > { %v1804_v57 = vpop.f32.mrb[0].mxu0  ;;  %v1874_v59 = vpop.f32.mrb[0].mxu1 }
 0x294   : > { %9606 = vmatmul.mubr.msk.f32.vlgmr.msra.gmra.mrb[8].mxu0 %vm1734_vm4, %v1804_v57  ;;  %v9551_v58 = vpop.f32.mrb[1].mxu0  ;;  %9613 = vmatmul.mubr.msk.f32.vlgmr.msra.gmra.mrb[8].mxu1 %vm1734_vm4, %v1874_v59  ;;  %v9558_v0 = vpop.f32.mrb[1].mxu1 }
 0x295   : > { %9865 = vmatpush3.bf16.msra.mxu0 %v9858_v2  ;;  %9619 = vmatprep.mubr.msk.f32.mxu0 %vm10392_vm5, %v13264_v1  ;;  %v1733_v58 = vld [vmem:[%s13458_s11 + $0x8] sm:$0xff]  ;;  %v11121_v0 = vpop.permute.xlu1 %1175 }
 0x296   : > { %9869 = vmatprep.subr.bf16.mxu0 %v13262_v60  ;;  %9868 = vmatpush3.bf16.msra.mxu1 %v9858_v2  ;;  %13459 = vst [vmem:[#allocation60_spill] sm:$0xff] %v11121_v0 }
 0x297   : > { %v1944_v63 = vpop.f32.mrb[2].mxu0  ;;  %9626 = vmatprep.mubr.msk.f32.mxu1 %vm10392_vm5, %v13264_v1  ;;  %9872 = vmatprep.subr.bf16.mxu1 %v13262_v60 }
 0x298   : > { %9620 = vmatmul.mubr.msk.f32.vlgmr.msra.gmra.mrb[10].mxu0 %vm1734_vm4, %v1944_v63  ;;  %v9565_v3 = vpop.f32.mrb[3].mxu0 }
 0x299   : > { %9871 = vmatpush3.bf16.msra.mxu0 %v9858_v2  ;;  %9633 = vmatprep.mubr.msk.f32.mxu0 %vm10392_vm5, %v13264_v1  ;;  %v2014_v5 = vpop.f32.mrb[2].mxu1  ;;  %v9882_v3 = vpack.c.bf16 %v1733_v58, %v1732_v25  ;;  %v11131_v41 = vpop.permute.xlu1 %1179  ;;  %v13461_v25 = vmov 0.0|0.0  }
 0x29a   : > { %9875 = vmatprep.subr.bf16.mxu0 %v13262_v60  ;;  %9627 = vmatmul.mubr.msk.f32.vlgmr.msra.gmra.mrb[10].mxu1 %vm1734_vm4, %v2014_v5  ;;  %v9572_v10 = vpop.f32.mrb[3].mxu1  ;;  %13460 = vst [vmem:[#allocation61_spill] sm:$0xff] %v11131_v41 }
 0x29b   : > { %v2087_v12 = vpop.f32.mrb[4].mxu0  ;;  %9874 = vmatpush3.bf16.msra.mxu1 %v9858_v2  ;;  %9640 = vmatprep.mubr.msk.f32.mxu1 %vm10392_vm5, %v13264_v1 }
 0x29c   : > { %9634 = vmatmul.mubr.msk.f32.vlgmr.msra.gmra.mrb[12].mxu0 %vm1734_vm4, %v2087_v12  ;;  %v9579_v24 = vpop.f32.mrb[5].mxu0  ;;  %9878 = vmatprep.subr.bf16.mxu1 %v13262_v60 }
 0x29d   : > { %9877 = vmatpush3.bf16.msra.mxu0 %v9858_v2  ;;  %9647 = vmatprep.mubr.msk.f32.mxu0 %vm10392_vm5, %v13264_v1 }
 0x29e   : > { %9881 = vmatprep.subr.bf16.mxu0 %v13262_v60 }
 0x2a0   : > { %v2157_v10 = vpop.f32.mrb[4].mxu1  ;;  %v2227_v24 = vpop.f32.mrb[6].mxu0 }
 0x2a1   : > { %9641 = vmatmul.mubr.msk.f32.vlgmr.msra.gmra.mrb[12].mxu1 %vm1734_vm4, %v2157_v10  ;;  %9648 = vmatmul.mubr.msk.f32.vlgmr.msra.gmra.mrb[14].mxu0 %vm1734_vm4, %v2227_v24  ;;  %v9586_v45 = vpop.f32.mrb[5].mxu1  ;;  %v9593_v44 = vpop.f32.mrb[7].mxu0 }
 0x2a2   : > { %9880 = vmatpush3.bf16.msra.mxu1 %v9858_v2  ;;  %9883 = vmatpush3.bf16.msra.mxu0 %v9882_v3  ;;  %v11145_v45 = vpop.permute.xlu1 %1279 }
 0x2a3   : > { %9654 = vmatprep.mubr.msk.f32.mxu1 %vm10392_vm5, %v13264_v1  ;;  %9661 = vmatprep.mubr.msk.f32.mxu0 %vm10392_vm5, %v13264_v1  ;;  %13462 = vst [vmem:[#allocation62_spill] sm:$0xff] %v11145_v45 }
 0x2a4   : > { %v2297_v60 = vpop.f32.mrb[6].mxu1  ;;  %9884 = vmatprep.subr.bf16.mxu1 %v13461_v25  ;;  %9887 = vmatprep.subr.bf16.mxu0 %v13461_v25 }
 0x2a5   : > { %9655 = vmatmul.mubr.msk.f32.vlgmr.msra.gmra.mrb[14].mxu1 %vm1734_vm4, %v2297_v60  ;;  %9662 = vmatmul.mubr.msk.f32.vlgmr.msra.gmra.mrb[16].mxu0 %vm1734_vm4, %v1804_v57  ;;  %v9600_v44 = vpop.f32.mrb[7].mxu1 }
 0x2a6   : > { %9886 = vmatpush3.bf16.msra.mxu1 %v9882_v3  ;;  %9889 = vmatpush3.bf16.msra.mxu0 %v9882_v3  ;;  %v11159_v2 = vpop.permute.xlu1 %1283 }
 0x2a7   : > { %9668 = vmatprep.mubr.msk.f32.mxu1 %vm10392_vm5, %v13264_v1  ;;  %9675 = vmatprep.mubr.msk.f32.mxu0 %vm10392_vm5, %v13264_v1  ;;  %13463 = vst [vmem:[#allocation63_spill] sm:$0xff] %v11159_v2 }
 0x2a8   : > { %9890 = vmatprep.subr.bf16.mxu1 %v13461_v25  ;;  %9893 = vmatprep.subr.bf16.mxu0 %v13461_v25 }
 0x2a9   : > { %9669 = vmatmul.mubr.msk.f32.vlgmr.msra.gmra.mrb[16].mxu1 %vm1734_vm4, %v1874_v59  ;;  %9676 = vmatmul.mubr.msk.f32.vlgmr.msra.gmra.mrb[18].mxu0 %vm1734_vm4, %v1944_v63 }
 0x2aa   : > { %9892 = vmatpush3.bf16.msra.mxu1 %v9882_v3  ;;  %9895 = vmatpush3.bf16.msra.mxu0 %v9882_v3  ;;  %v11172_v57 = vpop.permute.xlu1 %1287 }
 0x2ab   : > { %9682 = vmatprep.mubr.msk.f32.mxu1 %vm10392_vm5, %v13264_v1  ;;  %9689 = vmatprep.mubr.msk.f32.mxu0 %vm10392_vm5, %v13264_v1  ;;  %13464 = vst [vmem:[#allocation64_spill] sm:$0xff] %v11172_v57 }
 0x2ac   : > { %9896 = vmatprep.subr.bf16.mxu1 %v13461_v25  ;;  %9899 = vmatprep.subr.bf16.mxu0 %v13461_v25 }
 0x2ad   : > { %9683 = vmatmul.mubr.msk.f32.vlgmr.msra.gmra.mrb[18].mxu1 %vm1734_vm4, %v2014_v5  ;;  %9690 = vmatmul.mubr.msk.f32.vlgmr.msra.gmra.mrb[20].mxu0 %vm1734_vm4, %v2087_v12  ;;  %v11183_v5 = vpop.permute.xlu0 %1490 }
 0x2ae   : > { %9898 = vmatpush3.bf16.msra.mxu1 %v9882_v3  ;;  %9696 = vmatprep.mubr.msk.f32.mxu1 %vm10392_vm5, %v13264_v1  ;;  %v11179_v59 = vpop.permute.xlu1 %1291  ;;  %13467 = vst [vmem:[#allocation67_spill] sm:$0xff] %v11183_v5 }
 0x2af   : > { %9901 = vmatpush3.bf16.msra.mxu0 %v9882_v3  ;;  %9703 = vmatprep.mubr.msk.f32.mxu0 %vm10392_vm5, %v13264_v1  ;;  %13465 = vst [vmem:[#allocation65_spill] sm:$0xff] %v11179_v59 }
 0x2b0   : > { %9902 = vmatprep.subr.bf16.mxu1 %v13461_v25  ;;  %9713 = vmatprep.subr.mxu0 %v13264_v1 }
 0x2b1   : > { %9697 = vmatmul.mubr.msk.f32.vlgmr.msra.gmra.mrb[20].mxu1 %vm1734_vm4, %v2157_v10  ;;  %v11187_v58 = vpop.permute.xlu0 %1494 }
 0x2b2   : > { %9704 = vmatmul.mubr.msk.f32.vlgmr.msra.gmra.mrb[22].mxu0 %vm1734_vm4, %v2227_v24  ;;  %9904 = vmatpush3.bf16.msra.mxu1 %v9882_v3  ;;  %v11181_v63 = vpop.permute.xlu1 %1488  ;;  %13469 = vst [vmem:[#allocation69_spill] sm:$0xff] %v11187_v58 }
 0x2b3   : > { %9710 = vmatprep.mubr.msk.f32.mxu1 %vm10392_vm5, %v13264_v1  ;;  %9718 = vmatprep.subr.mxu1 %v13264_v1  ;;  %13466 = vst [vmem:[#allocation66_spill] sm:$0xff] %v11181_v63 }
 0x2b4   : > { %9715 = vmatprep.mubr.msk.f32.mxu0 %vm10392_vm5, %v13264_v1 }
 0x2b5   : > { %9711 = vmatmul.mubr.msk.f32.vlgmr.msra.gmra.mrb[22].mxu1 %vm1734_vm4, %v2297_v60  ;;  %v11191_v10 = vpop.permute.xlu0 %1498 }
 0x2b6   : > { %9720 = vmatprep.mubr.msk.f32.mxu1 %vm10392_vm5, %v13264_v1  ;;  %v11185_v12 = vpop.permute.xlu1 %1492  ;;  %13471 = vst [vmem:[#allocation71_spill] sm:$0xff] %v11191_v10 }
 0x2b7   : > { %13468 = vst [vmem:[#allocation68_spill] sm:$0xff] %v11185_v12 }
 0x2ba   : > { %v11189_v3 = vpop.permute.xlu1 %1496 }
 0x2bb   : > { %13470 = vst [vmem:[#allocation70_spill] sm:$0xff] %v11189_v3 }
 0x2ce   : > { %v11193_v24 = vpop.permute.xlu1 %1500  ;;  %v11195_v60 = vpop.permute.xlu0 %1502 }
 0x2cf   : > { %13472 = vst [vmem:[#allocation72_spill] sm:$0xff] %v11193_v24  ;;  %13473 = vst [vmem:[#allocation73_spill] sm:$0xff] %v11195_v60 }
 0x2df   : > { %v1542_v25 = vpop.permute.xlu1 %1541  ;;  %v1546_v44 = vpop.permute.xlu0 %1545 }
 0x2e0   : > { %v1556_v1 = vmul.f32 %v1542_v25, %v10836_v55  ;;  %v1557_v63 = vmul.f32 %v1542_v25, %v10838_v56  ;;  %v1558_v5 = vmul.f32 %v1542_v25, %v10886_v34  ;;  %v1559_v12 = vmul.f32 %v1546_v44, %v10844_v61  ;;  %v9132_v25 = vld [vmem:[%s13474_s19 + $0x3] ss:$0 sm:$0xff] }
 0x2e1   : > { %v1560_v58 = vmul.f32 %v1546_v44, %v10846_v62  ;;  %v1561_v3 = vmul.f32 %v1546_v44, %v10894_v39  ;;  %v9131_v44 = vld [vmem:[%s13474_s19 + $0x2] ss:$0 sm:$0xff] }
 0x2e2   : > { %v1581_v59 = vrot.slane %v1557_v63, 2  ;;  %v1583_v10 = vrot.slane %v1558_v5, 2  ;;  %v1580_v57 = vrot.slane %v1556_v1, 2  ;;  %v1585_v2 = vrot.slane %v1559_v12, 2 }
 0x2e3   : > { %v1550_v24 = vpop.permute.xlu1 %1549  ;;  %v1586_v41 = vrot.slane %v1560_v58, 2  ;;  %v1588_v0 = vrot.slane %v1561_v3, 2  ;;  %v1554_v34 = vpop.permute.xlu0 %1553  ;;  %v9128_v3 = vld [vmem:[#allocation8 + $0x3] ss:$0 sm:$0xff] }
 0x2e4   : > { %v1562_v60 = vmul.f32 %v1550_v24, %v10852_v8  ;;  %v1563_v55 = vmul.f32 %v1550_v24, %v10854_v9  ;;  %v1564_v56 = vmul.f32 %v1550_v24, %v10902_v50  ;;  %v1584_v61 = vsel %vm1371_vm6, %v1581_v59, %v1583_v10  ;;  %v9127_v10 = vld [vmem:[#allocation8 + $0x2] ss:$0 sm:$0xff]  ;;  %v9130_v24 = vld [vmem:[%s13474_s19 + $0x1] ss:$0 sm:$0xff] }
 0x2e5   : > { %v1582_v62 = vsel %vm1371_vm6, %v1580_v57, %v1581_v59  ;;  %1602 = vrot.lane.b32.xlu0 %v1584_v61, %s10390_s13  ;;  %v1565_v1 = vmul.f32 %v1554_v34, %v10860_v16  ;;  %v1566_v8 = vmul.f32 %v1554_v34, %v10862_v17  ;;  %v1567_v39 = vmul.f32 %v1554_v34, %v10911_v13  ;;  %v9160_v34 = vld [vmem:[#allocation11 + $0x3] ss:$0 sm:$0xff]  ;;  %v9159_v61 = vld [vmem:[#allocation11 + $0x2] ss:$0 sm:$0xff] }
 0x2e6   : > { %1600 = vrot.lane.b32.xlu1 %v1582_v62, %s10390_s13  ;;  %v1589_v63 = vsel %vm1371_vm6, %v1586_v41, %v1588_v0  ;;  %v1587_v9 = vsel %vm1371_vm6, %v1585_v2, %v1586_v41  ;;  %v1591_v50 = vrot.slane %v1563_v55, 2  ;;  %v1593_v5 = vrot.slane %v1564_v56, 2  ;;  %v9126_v0 = vld [vmem:[#allocation8 + $0x1] ss:$0 sm:$0xff]  ;;  %v9125_v2 = vld [vmem:[#allocation8] ss:$0 sm:$0xff] }
 0x2e7   : > { %v1590_v12 = vrot.slane %v1562_v60, 2  ;;  %v1596_v57 = vrot.slane %v1566_v8, 2  ;;  %v1598_v58 = vrot.slane %v1567_v39, 2  ;;  %v1595_v17 = vrot.slane %v1565_v1, 2  ;;  %v9129_v60 = vld [vmem:[%s13474_s19] ss:$0 sm:$0xff] }
 0x2e8   : > { %v1594_v59 = vsel %vm1371_vm6, %v1591_v50, %v1593_v5  ;;  %v9158_v55 = vld [vmem:[#allocation11 + $0x1] ss:$0 sm:$0xff]  ;;  %v9157_v56 = vld [vmem:[#allocation11] ss:$0 sm:$0xff]  ;;  %v9162_v62 = vld [vmem:[#allocation11 + $0x5] ss:$0 sm:$0xff] }
 0x2e9   : > { %1606 = vrot.lane.b32.xlu0 %v1589_v63, %s10390_s13  ;;  %v1592_v16 = vsel %vm1371_vm6, %v1590_v12, %v1591_v50  ;;  %v1599_v13 = vsel %vm1371_vm6, %v1596_v57, %v1598_v58  ;;  %v1597_v41 = vsel %vm1371_vm6, %v1595_v17, %v1596_v57  ;;  %v9161_v1 = vld [vmem:[#allocation11 + $0x4] ss:$0 sm:$0xff]  ;;  %v9164_v8 = vld [vmem:[#allocation11 + $0x7] ss:$0 sm:$0xff]  ;;  %v9163_v39 = vld [vmem:[#allocation11 + $0x6] ss:$0 sm:$0xff] }
 0x2ea   : > { %1604 = vrot.lane.b32.xlu1 %v1587_v9, %s10390_s13  ;;  %v9166_v63 = vld [vmem:[#allocation11 + $0x9] ss:$0 sm:$0xff]  ;;  %v9165_v9 = vld [vmem:[#allocation11 + $0x8] ss:$0 sm:$0xff]  ;;  %v9168_v50 = vld [vmem:[#allocation11 + $0xb] ss:$0 sm:$0xff] }
 0x2eb   : > { %v9167_v5 = vld [vmem:[#allocation11 + $0xa] ss:$0 sm:$0xff]  ;;  %v9170_v12 = vld [vmem:[#allocation11 + $0xd] ss:$0 sm:$0xff]  ;;  %v9169_v57 = vld [vmem:[#allocation11 + $0xc] ss:$0 sm:$0xff] }
 0x2ec   : > { %v9174_v58 = vld [vmem:[#allocation11 + $0x11] ss:$0 sm:$0xff]  ;;  %v9173_v17 = vld [vmem:[#allocation11 + $0x10] ss:$0 sm:$0xff] }
 0x2ed   : > { %1610 = vrot.lane.b32.xlu0 %v1594_v59, %s10390_s13  ;;  %v9172_v59 = vld [vmem:[#allocation11 + $0xf] ss:$0 sm:$0xff] }
 0x2ee   : > { %1608 = vrot.lane.b32.xlu1 %v1592_v16, %s10390_s13  ;;  %v9171_v16 = vld [vmem:[#allocation11 + $0xe] ss:$0 sm:$0xff] }
 0x2f1   : > { %1614 = vrot.lane.b32.xlu0 %v1599_v13, %s10390_s13  ;;  %v9176_v13 = vld [vmem:[#allocation11 + $0x13] ss:$0 sm:$0xff] }
 0x2f2   : > { %1612 = vrot.lane.b32.xlu1 %v1597_v41, %s10390_s13  ;;  %v9175_v41 = vld [vmem:[#allocation11 + $0x12] ss:$0 sm:$0xff] }
 0x2f5   : > { %1661 = vperm.xlu0 %10050, %v9126_v0   ;;  %v9178_v0 = vld [vmem:[#allocation11 + $0x15] ss:$0 sm:$0xff] }
 0x2f6   : > { %1657 = vperm.xlu1 %10051, %v9125_v2   ;;  %v9177_v2 = vld [vmem:[#allocation11 + $0x14] ss:$0 sm:$0xff] }
 0x2f9   : > { %1669 = vperm.xlu0 %10050, %v9128_v3   ;;  %v9180_v3 = vld [vmem:[#allocation11 + $0x17] ss:$0 sm:$0xff] }
 0x2fa   : > { %1665 = vperm.xlu1 %10051, %v9127_v10   ;;  %v9179_v10 = vld [vmem:[#allocation11 + $0x16] ss:$0 sm:$0xff] }
 0x2fd   : > { %1709 = vperm.xlu0 %10050, %v9130_v24   ;;  %v9182_v24 = vld [vmem:[#allocation11 + $0x19] ss:$0 sm:$0xff] }
 0x2fe   : > { %1705 = vperm.xlu1 %10051, %v9129_v60   ;;  %v9181_v60 = vld [vmem:[#allocation11 + $0x18] ss:$0 sm:$0xff] }
 0x301   : > { %1717 = vperm.xlu0 %10050, %v9132_v25   ;;  %v9184_v25 = vld [vmem:[#allocation11 + $0x1b] ss:$0 sm:$0xff] }
 0x302   : > { %1713 = vperm.xlu1 %10051, %v9131_v44   ;;  %v9183_v44 = vld [vmem:[#allocation11 + $0x1a] ss:$0 sm:$0xff] }
 0x305   : > { %3821 = vperm.xlu0 %10050, %v9158_v55   ;;  %v9186_v55 = vld [vmem:[#allocation11 + $0x1d] ss:$0 sm:$0xff] }
 0x306   : > { %3817 = vperm.xlu1 %10051, %v9157_v56   ;;  %v9185_v56 = vld [vmem:[#allocation11 + $0x1c] ss:$0 sm:$0xff] }
 0x309   : > { %3829 = vperm.xlu0 %10050, %v9160_v34   ;;  %v9188_v34 = vld [vmem:[#allocation11 + $0x1f] ss:$0 sm:$0xff] }
 0x30a   : > { %3825 = vperm.xlu1 %10051, %v9159_v61   ;;  %v9187_v61 = vld [vmem:[#allocation11 + $0x1e] ss:$0 sm:$0xff] }
 0x30d   : > { %3837 = vperm.xlu0 %10050, %v9162_v62   ;;  %v9190_v62 = vld [vmem:[#allocation11 + $0x21] ss:$0 sm:$0xff] }
 0x30e   : > { %3833 = vperm.xlu1 %10051, %v9161_v1   ;;  %v9189_v1 = vld [vmem:[#allocation11 + $0x20] ss:$0 sm:$0xff] }
 0x311   : > { %3845 = vperm.xlu0 %10050, %v9164_v8   ;;  %v9192_v8 = vld [vmem:[#allocation11 + $0x23] ss:$0 sm:$0xff] }
 0x312   : > { %3841 = vperm.xlu1 %10051, %v9163_v39   ;;  %v9191_v39 = vld [vmem:[#allocation11 + $0x22] ss:$0 sm:$0xff] }
 0x315   : > { %3853 = vperm.xlu0 %10050, %v9166_v63   ;;  %v9194_v63 = vld [vmem:[#allocation11 + $0x25] ss:$0 sm:$0xff] }
 0x316   : > { %3849 = vperm.xlu1 %10051, %v9165_v9   ;;  %v9193_v9 = vld [vmem:[#allocation11 + $0x24] ss:$0 sm:$0xff] }
 0x319   : > { %3861 = vperm.xlu0 %10050, %v9168_v50   ;;  %v9196_v50 = vld [vmem:[#allocation11 + $0x27] ss:$0 sm:$0xff] }
 0x31a   : > { %3857 = vperm.xlu1 %10051, %v9167_v5   ;;  %v9195_v5 = vld [vmem:[#allocation11 + $0x26] ss:$0 sm:$0xff] }
 0x31d   : > { %3869 = vperm.xlu0 %10050, %v9170_v12   ;;  %v9198_v12 = vld [vmem:[#allocation11 + $0x29] ss:$0 sm:$0xff] }
 0x31e   : > { %3865 = vperm.xlu1 %10051, %v9169_v57   ;;  %v9197_v57 = vld [vmem:[#allocation11 + $0x28] ss:$0 sm:$0xff] }
 0x321   : > { %3877 = vperm.xlu0 %10050, %v9172_v59   ;;  %v9200_v59 = vld [vmem:[#allocation11 + $0x2b] ss:$0 sm:$0xff] }
 0x322   : > { %3873 = vperm.xlu1 %10051, %v9171_v16   ;;  %v9199_v16 = vld [vmem:[#allocation11 + $0x2a] ss:$0 sm:$0xff] }
 0x325   : > { %3981 = vperm.xlu0 %10050, %v9174_v58   ;;  %v9202_v58 = vld [vmem:[#allocation11 + $0x2d] ss:$0 sm:$0xff] }
 0x326   : > { %3977 = vperm.xlu1 %10051, %v9173_v17   ;;  %v9201_v17 = vld [vmem:[#allocation11 + $0x2c] ss:$0 sm:$0xff] }
 0x329   : > { %3989 = vperm.xlu0 %10050, %v9176_v13  }
 0x32a   : > { %3985 = vperm.xlu1 %10051, %v9175_v41  }
 0x32d   : > { %3997 = vperm.xlu0 %10050, %v9178_v0   ;;  %v9204_v0 = vld [vmem:[#allocation11 + $0x2f] ss:$0 sm:$0xff] }
 0x32e   : > { %3993 = vperm.xlu1 %10051, %v9177_v2   ;;  %v9203_v2 = vld [vmem:[#allocation11 + $0x2e] ss:$0 sm:$0xff] }
 0x331   : > { %4005 = vperm.xlu0 %10050, %v9180_v3   ;;  %v9206_v3 = vld [vmem:[#allocation11 + $0x31] ss:$0 sm:$0xff] }
 0x332   : > { %4001 = vperm.xlu1 %10051, %v9179_v10   ;;  %v9205_v10 = vld [vmem:[#allocation11 + $0x30] ss:$0 sm:$0xff] }
 0x335   : > { %4013 = vperm.xlu0 %10050, %v9182_v24  }
 0x336   : > { %4009 = vperm.xlu1 %10051, %v9181_v60  }
 0x339   : > { %4021 = vperm.xlu0 %10050, %v9184_v25   ;;  %v9208_v25 = vld [vmem:[#allocation11 + $0x33] ss:$0 sm:$0xff] }
 0x33a   : > { %4017 = vperm.xlu1 %10051, %v9183_v44   ;;  %v9207_v44 = vld [vmem:[#allocation11 + $0x32] ss:$0 sm:$0xff] }
 0x33d   : > { %4029 = vperm.xlu0 %10050, %v9186_v55  }
 0x33e   : > { %4025 = vperm.xlu1 %10051, %v9185_v56  }
 0x341   : > { %4037 = vperm.xlu0 %10050, %v9188_v34   ;;  %v9210_v34 = vld [vmem:[#allocation11 + $0x35] ss:$0 sm:$0xff] }
 0x342   : > { %4033 = vperm.xlu1 %10051, %v9187_v61   ;;  %v9209_v61 = vld [vmem:[#allocation11 + $0x34] ss:$0 sm:$0xff] }
 0x345   : > { %4221 = vperm.xlu0 %10050, %v9190_v62   ;;  %v9212_v62 = vld [vmem:[#allocation11 + $0x37] ss:$0 sm:$0xff] }
 0x346   : > { %4217 = vperm.xlu1 %10051, %v9189_v1   ;;  %v9211_v1 = vld [vmem:[#allocation11 + $0x36] ss:$0 sm:$0xff] }
 0x349   : > { %4229 = vperm.xlu0 %10050, %v9192_v8  }
 0x34a   : > { %4225 = vperm.xlu1 %10051, %v9191_v39  }
 0x34d   : > { %4237 = vperm.xlu0 %10050, %v9194_v63  }
 0x34e   : > { %4233 = vperm.xlu1 %10051, %v9193_v9  }
 0x351   : > { %4245 = vperm.xlu0 %10050, %v9196_v50   ;;  %v9214_v50 = vld [vmem:[#allocation11 + $0x39] ss:$0 sm:$0xff] }
 0x352   : > { %4241 = vperm.xlu1 %10051, %v9195_v5  }
 0x355   : > { %4253 = vperm.xlu0 %10050, %v9198_v12   ;;  %v9213_v12 = vld [vmem:[#allocation11 + $0x38] ss:$0 sm:$0xff] }
 0x356   : > { %4249 = vperm.xlu1 %10051, %v9197_v57  }
 0x357   : > { %v11239_v41 = vpop.permute.xlu0 %1602 }
 0x358   : > { %v11237_v13 = vpop.permute.xlu1 %1600  ;;  %13476 = vst [vmem:[#allocation75_spill] sm:$0xff] %v11239_v41  ;;  %v9227_v41 = vld [vmem:[#allocation11 + $0x46] ss:$0 sm:$0xff] }
 0x359   : > { %4261 = vperm.xlu0 %10050, %v9200_v59   ;;  %13475 = vst [vmem:[#allocation74_spill] sm:$0xff] %v11237_v13 }
 0x35a   : > { %4257 = vperm.xlu1 %10051, %v9199_v16  }
 0x35b   : > { %v11243_v60 = vpop.permute.xlu0 %1606 }
 0x35c   : > { %v11241_v24 = vpop.permute.xlu1 %1604  ;;  %13478 = vst [vmem:[#allocation77_spill] sm:$0xff] %v11243_v60 }
 0x35d   : > { %4269 = vperm.xlu0 %10050, %v9202_v58   ;;  %13477 = vst [vmem:[#allocation76_spill] sm:$0xff] %v11241_v24 }
 0x35e   : > { %4265 = vperm.xlu1 %10051, %v9201_v17  }
 0x35f   : > { %v11247_v56 = vpop.permute.xlu0 %1610 }
 0x360   : > { %v11245_v55 = vpop.permute.xlu1 %1608  ;;  %13480 = vst [vmem:[#allocation79_spill] sm:$0xff] %v11247_v56 }
 0x361   : > { %4277 = vperm.xlu0 %10050, %v9204_v0   ;;  %13479 = vst [vmem:[#allocation78_spill] sm:$0xff] %v11245_v55  ;;  %v9216_v0 = vld [vmem:[#allocation11 + $0x3b] ss:$0 sm:$0xff] }
 0x362   : > { %4273 = vperm.xlu1 %10051, %v9203_v2   ;;  %v9215_v2 = vld [vmem:[#allocation11 + $0x3a] ss:$0 sm:$0xff] }
 0x363   : > { %v11253_v9 = vpop.permute.xlu0 %1614 }
 0x364   : > { %v11251_v63 = vpop.permute.xlu1 %1612  ;;  %13482 = vst [vmem:[#allocation81_spill] sm:$0xff] %v11253_v9 }
 0x365   : > { %4461 = vperm.xlu0 %10050, %v9206_v3   ;;  %13481 = vst [vmem:[#allocation80_spill] sm:$0xff] %v11251_v63 }
 0x366   : > { %4457 = vperm.xlu1 %10051, %v9205_v10  }
 0x367   : > { %v11249_v8 = vpop.f32.mrb[8].mxu0  ;;  %v11255_v5 = vpop.f32.mrb[8].mxu1 }
 0x368   : > { %v9607_v39 = vpop.f32.mrb[9].mxu0  ;;  %v9614_v59 = vpop.f32.mrb[9].mxu1 }
 0x369   : > { %4469 = vperm.xlu0 %10050, %v9208_v25  }
 0x36a   : > { %4465 = vperm.xlu1 %10051, %v9207_v44  }
 0x36b   : > { %v11257_v57 = vpop.f32.mrb[10].mxu0 }
 0x36c   : > { %v9621_v17 = vpop.f32.mrb[11].mxu0 }
 0x36d   : > { %4477 = vperm.xlu0 %10050, %v9210_v34   ;;  %v11263_v3 = vpop.f32.mrb[10].mxu1 }
 0x36e   : > { %4473 = vperm.xlu1 %10051, %v9209_v61   ;;  %v9628_v34 = vpop.f32.mrb[11].mxu1  ;;  %v9218_v61 = vld [vmem:[#allocation11 + $0x3d] ss:$0 sm:$0xff] }
 0x36f   : > { %v11269_v44 = vpop.f32.mrb[12].mxu0  ;;  %v9222_v34 = vld [vmem:[#allocation11 + $0x41] ss:$0 sm:$0xff] }
 0x371   : > { %4485 = vperm.xlu0 %10050, %v9212_v62   ;;  %v9635_v62 = vpop.f32.mrb[13].mxu0 }
 0x372   : > { %4481 = vperm.xlu1 %10051, %v9211_v1   ;;  %v9217_v1 = vld [vmem:[#allocation11 + $0x3c] ss:$0 sm:$0xff] }
 0x374   : > { %v11261_v58 = vpop.permute.xlu0 %1661  ;;  %v11275_v59 = vpop.f32.mrb[14].mxu0 }
 0x375   : > { %v11259_v16 = vpop.permute.xlu1 %1657  ;;  %13484 = vst [vmem:[#allocation83_spill] sm:$0xff] %v11261_v58  ;;  %4493 = vperm.xlu0 %10050, %v9214_v50   ;;  %v11277_v17 = vpop.f32.mrb[12].mxu1 }
 0x376   : > { %13483 = vst [vmem:[#allocation82_spill] sm:$0xff] %v11259_v16  ;;  %4489 = vperm.xlu1 %10051, %v9213_v12   ;;  %v9220_v12 = vld [vmem:[#allocation11 + $0x3f] ss:$0 sm:$0xff] }
 0x378   : > { %v11267_v25 = vpop.permute.xlu0 %1669 }
 0x379   : > { %v11265_v10 = vpop.permute.xlu1 %1665  ;;  %13486 = vst [vmem:[#allocation85_spill] sm:$0xff] %v11267_v25  ;;  %4501 = vperm.xlu0 %10050, %v9216_v0   ;;  %v9219_v25 = vld [vmem:[#allocation11 + $0x3e] ss:$0 sm:$0xff]  ;;  %v9649_v0 = vpop.f32.mrb[15].mxu0 }
 0x37a   : > { %13485 = vst [vmem:[#allocation84_spill] sm:$0xff] %v11265_v10  ;;  %4497 = vperm.xlu1 %10051, %v9215_v2   ;;  %v9642_v10 = vpop.f32.mrb[13].mxu1  ;;  %v11283_v62 = vpop.f32.mrb[16].mxu0 }
 0x37b   : > { %v9224_v10 = vld [vmem:[#allocation11 + $0x43] ss:$0 sm:$0xff] }
 0x37c   : > { %v11273_v50 = vpop.permute.xlu0 %1709 }
 0x37d   : > { %v11271_v39 = vpop.permute.xlu1 %1705  ;;  %13488 = vst [vmem:[#allocation87_spill] sm:$0xff] %v11273_v50  ;;  %4509 = vperm.xlu0 %10050, %v9218_v61   ;;  %v11285_v50 = vpop.f32.mrb[14].mxu1  ;;  %v9221_v61 = vld [vmem:[#allocation11 + $0x40] ss:$0 sm:$0xff] }
 0x37e   : > { %13487 = vst [vmem:[#allocation86_spill] sm:$0xff] %v11271_v39  ;;  %4505 = vperm.xlu1 %10051, %v9217_v1   ;;  %v9663_v1 = vpop.f32.mrb[17].mxu0  ;;  %v9656_v9 = vpop.f32.mrb[15].mxu1 }
 0x37f   : > { %v11291_v0 = vpop.f32.mrb[16].mxu1  ;;  %v9226_v9 = vld [vmem:[#allocation11 + $0x45] ss:$0 sm:$0xff] }
 0x380   : > { %v11281_v2 = vpop.permute.xlu0 %1717 }
 0x381   : > { %v11279_v63 = vpop.permute.xlu1 %1713  ;;  %13490 = vst [vmem:[#allocation89_spill] sm:$0xff] %v11281_v2  ;;  %4517 = vperm.xlu0 %10050, %v9220_v12   ;;  %v11293_v2 = vpop.f32.mrb[18].mxu0 }
 0x382   : > { %13489 = vst [vmem:[#allocation88_spill] sm:$0xff] %v11279_v63  ;;  %4513 = vperm.xlu1 %10051, %v9219_v25   ;;  %v9223_v25 = vld [vmem:[#allocation11 + $0x42] ss:$0 sm:$0xff]  ;;  %v9670_v12 = vpop.f32.mrb[17].mxu1  ;;  %v9677_v63 = vpop.f32.mrb[19].mxu0 }
 0x383   : > { %v11299_v1 = vpop.f32.mrb[18].mxu1  ;;  %v11301_v16 = vpop.f32.mrb[20].mxu0  ;;  %v9228_v63 = vld [vmem:[#allocation11 + $0x47] ss:$0 sm:$0xff] }
 0x384   : > { %v11289_v39 = vpop.permute.xlu0 %3821  ;;  %v9691_v24 = vpop.f32.mrb[21].mxu0 }
 0x385   : > { %v11287_v55 = vpop.permute.xlu1 %3817  ;;  %13492 = vst [vmem:[#allocation91_spill] sm:$0xff] %v11289_v39  ;;  %4749 = vperm.xlu0 %10050, %v9222_v34   ;;  %v9225_v34 = vld [vmem:[#allocation11 + $0x44] ss:$0 sm:$0xff]  ;;  %v9230_v24 = vld [vmem:[#allocation11 + $0x49] ss:$0 sm:$0xff] }
 0x386   : > { %13491 = vst [vmem:[#allocation90_spill] sm:$0xff] %v11287_v55  ;;  %4745 = vperm.xlu1 %10051, %v9221_v61   ;;  %v9684_v61 = vpop.f32.mrb[19].mxu1  ;;  %v9299_v55 = vld [vmem:[#allocation11 + $0x8e] ss:$0 sm:$0xff]  ;;  %v9270_v39 = vld [vmem:[#allocation11 + $0x71] ss:$0 sm:$0xff] }
 0x387   : > { %v11307_v12 = vpop.f32.mrb[20].mxu1 }
 0x388   : > { %v11297_v58 = vpop.permute.xlu0 %3829 }
 0x389   : > { %v11295_v56 = vpop.permute.xlu1 %3825  ;;  %13494 = vst [vmem:[#allocation93_spill] sm:$0xff] %v11297_v58  ;;  %4757 = vperm.xlu0 %10050, %v9224_v10   ;;  %v9698_v10 = vpop.f32.mrb[21].mxu1 }
 0x38a   : > { %13493 = vst [vmem:[#allocation92_spill] sm:$0xff] %v11295_v56  ;;  %4753 = vperm.xlu1 %10051, %v9223_v25   ;;  %v11309_v25 = vpop.f32.mrb[22].mxu0  ;;  %v11315_v45 = vpop.f32.mrb[22].mxu1  ;;  %v9232_v10 = vld [vmem:[#allocation11 + $0x4b] ss:$0 sm:$0xff] }
 0x38b   : > { %v9705_v61 = vpop.f32.mrb[23].mxu0 }
 0x38c   : > { %v11305_v13 = vpop.permute.xlu0 %3837 }
 0x38d   : > { %v11303_v60 = vpop.permute.xlu1 %3833  ;;  %13496 = vst [vmem:[#allocation95_spill] sm:$0xff] %v11305_v13  ;;  %4765 = vperm.xlu0 %10050, %v9226_v9   ;;  %v9712_v9 = vpop.f32.mrb[23].mxu1  ;;  %v9300_v13 = vld [vmem:[#allocation11 + $0x8f] ss:$0 sm:$0xff] }
 0x38e   : > { %13495 = vst [vmem:[#allocation94_spill] sm:$0xff] %v11303_v60  ;;  %4761 = vperm.xlu1 %10051, %v9225_v34   ;;  %v9236_v9 = vld [vmem:[#allocation11 + $0x4f] ss:$0 sm:$0xff]  ;;  %v9269_v60 = vld [vmem:[#allocation11 + $0x70] ss:$0 sm:$0xff] }
 0x390   : > { %v11313_v43 = vpop.permute.xlu0 %3845 }
 0x391   : > { %v11311_v38 = vpop.permute.xlu1 %3841  ;;  %13498 = vst [vmem:[#allocation97_spill] sm:$0xff] %v11313_v43  ;;  %4773 = vperm.xlu0 %10050, %v9228_v63   ;;  %v9233_v63 = vld [vmem:[#allocation11 + $0x4c] ss:$0 sm:$0xff] }
 0x392   : > { %13497 = vst [vmem:[#allocation96_spill] sm:$0xff] %v11311_v38  ;;  %4769 = vperm.xlu1 %10051, %v9227_v41   ;;  %v9234_v41 = vld [vmem:[#allocation11 + $0x4d] ss:$0 sm:$0xff] }
 0x394   : > { %v11319_v6 = vpop.permute.xlu0 %3853 }
 0x395   : > { %v11317_v34 = vpop.permute.xlu1 %3849  ;;  %13500 = vst [vmem:[#allocation99_spill] sm:$0xff] %v11319_v6  ;;  %4781 = vperm.xlu0 %10050, %v9230_v24   ;;  %v9296_v6 = vld [vmem:[#allocation11 + $0x8b] ss:$0 sm:$0xff] }
 0x396   : > { %13499 = vst [vmem:[#allocation98_spill] sm:$0xff] %v11317_v34  ;;  %4777 = vperm.xlu1 %10051, %v9229_v42   ;;  %v9295_v34 = vld [vmem:[#allocation11 + $0x8a] ss:$0 sm:$0xff] }
 0x398   : > { %v11323_v36 = vpop.permute.xlu0 %3861 }
 0x399   : > { %v11321_v49 = vpop.permute.xlu1 %3857  ;;  %13502 = vst [vmem:[#allocation101_spill] sm:$0xff] %v11323_v36  ;;  %4789 = vperm.xlu0 %10050, %v9232_v10   ;;  %v9273_v36 = vld [vmem:[#allocation11 + $0x74] ss:$0 sm:$0xff] }
 0x39a   : > { %13501 = vst [vmem:[#allocation100_spill] sm:$0xff] %v11321_v49  ;;  %4785 = vperm.xlu1 %10051, %v9231_v37  }
 0x39c   : > { %v11327_v48 = vpop.permute.xlu0 %3869 }
 0x39d   : > { %v11325_v61 = vpop.permute.xlu1 %3865  ;;  %13504 = vst [vmem:[#allocation103_spill] sm:$0xff] %v11327_v48  ;;  %4797 = vperm.xlu0 %10050, %v9234_v41   ;;  %v9284_v48 = vld [vmem:[#allocation11 + $0x7f] ss:$0 sm:$0xff] }
 0x39e   : > { %13503 = vst [vmem:[#allocation102_spill] sm:$0xff] %v11325_v61  ;;  %4793 = vperm.xlu1 %10051, %v9233_v63   ;;  %v9283_v61 = vld [vmem:[#allocation11 + $0x7e] ss:$0 sm:$0xff] }
 0x3a0   : > { %v11331_v42 = vpop.permute.xlu0 %3877 }
 0x3a1   : > { %v11329_v24 = vpop.permute.xlu1 %3873  ;;  %13506 = vst [vmem:[#allocation105_spill] sm:$0xff] %v11331_v42  ;;  %4805 = vperm.xlu0 %10050, %v9236_v9   ;;  %v9294_v42 = vld [vmem:[#allocation11 + $0x89] ss:$0 sm:$0xff] }
 0x3a2   : > { %13505 = vst [vmem:[#allocation104_spill] sm:$0xff] %v11329_v24  ;;  %4801 = vperm.xlu1 %10051, %v9235_v35   ;;  %v9297_v24 = vld [vmem:[#allocation11 + $0x8c] ss:$0 sm:$0xff] }
 0x3a4   : > { %v11335_v37 = vpop.permute.xlu0 %3981 }
 0x3a5   : > { %v11333_v10 = vpop.permute.xlu1 %3977  ;;  %5069 = vperm.xlu0 %10050, %v9238_v46  }
 0x3a6   : > { %5065 = vperm.xlu1 %10051, %v9237_v33  }
 0x3a8   : > { %v11339_v63 = vpop.permute.xlu0 %3989 }
 0x3a9   : > { %v11337_v41 = vpop.permute.xlu1 %3985  ;;  %5077 = vperm.xlu0 %10050, %v9240_v20  }
 0x3aa   : > { %5073 = vperm.xlu1 %10051, %v9239_v29  }
 0x3ac   : > { %v11343_v35 = vpop.permute.xlu0 %3997 }
 0x3ad   : > { %v11341_v9 = vpop.permute.xlu1 %3993  ;;  %5085 = vperm.xlu0 %10050, %v9242_v19  }
 0x3ae   : > { %5081 = vperm.xlu1 %10051, %v9241_v11  }
 0x3b0   : > { %v11347_v33 = vpop.permute.xlu0 %4005 }
 0x3b1   : > { %v11345_v46 = vpop.permute.xlu1 %4001  ;;  %5093 = vperm.xlu0 %10050, %v9244_v30  }
 0x3b2   : > { %5089 = vperm.xlu1 %10051, %v9243_v18  }
 0x3b4   : > { %v11351_v29 = vpop.permute.xlu0 %4013 }
 0x3b5   : > { %v11349_v20 = vpop.permute.xlu1 %4009  ;;  %5101 = vperm.xlu0 %10050, %v9246_v32  }
 0x3b6   : > { %5097 = vperm.xlu1 %10051, %v9245_v21  }
 0x3b8   : > { %v11355_v11 = vpop.permute.xlu0 %4021 }
 0x3b9   : > { %v11353_v19 = vpop.permute.xlu1 %4017  ;;  %5109 = vperm.xlu0 %10050, %v9248_v31  }
 0x3ba   : > { %5105 = vperm.xlu1 %10051, %v9247_v15  }
 0x3bc   : > { %v11359_v18 = vpop.permute.xlu0 %4029 }
 0x3bd   : > { %v11357_v30 = vpop.permute.xlu1 %4025  ;;  %5117 = vperm.xlu0 %10050, %v9250_v28  }
 0x3be   : > { %5113 = vperm.xlu1 %10051, %v9249_v14  }
 0x3c0   : > { %v11363_v21 = vpop.permute.xlu0 %4037 }
 0x3c1   : > { %v11361_v32 = vpop.permute.xlu1 %4033  ;;  %5125 = vperm.xlu0 %10050, %v9252_v7  }
 0x3c2   : > { %5121 = vperm.xlu1 %10051, %v9251_v4  }
 0x3c4   : > { %v11367_v15 = vpop.permute.xlu0 %4221 }
 0x3c5   : > { %v11365_v31 = vpop.permute.xlu1 %4217  ;;  %5681 = vperm.xlu0 %10050, %v9271_v47  }
 0x3c6   : > { %5685 = vperm.xlu1 %10051, %v9272_v40  }
 0x3c8   : > { %v11371_v14 = vpop.permute.xlu0 %4229 }
 0x3c9   : > { %v11369_v28 = vpop.permute.xlu1 %4225  ;;  %5697 = vperm.xlu0 %10050, %v9275_v54  }
 0x3ca   : > { %5701 = vperm.xlu1 %10051, %v9276_v53  }
 0x3cc   : > { %v11375_v4 = vpop.permute.xlu0 %4237 }
 0x3cd   : > { %v11373_v7 = vpop.permute.xlu1 %4233  ;;  %6001 = vperm.xlu0 %10050, %v9287_v52  }
 0x3ce   : > { %6005 = vperm.xlu1 %10051, %v9288_v27  }
 0x3d0   : > { %v11379_v40 = vpop.permute.xlu0 %4245 }
 0x3d1   : > { %v11377_v47 = vpop.permute.xlu1 %4241  ;;  %6017 = vperm.xlu0 %10050, %v9291_v26  }
 0x3d2   : > { %6021 = vperm.xlu1 %10051, %v9292_v23  }
 0x3d4   : > { %v11383_v53 = vpop.permute.xlu0 %4253 }
 0x3d5   : > { %v11381_v54 = vpop.permute.xlu1 %4249  ;;  %5713 = vperm.xlu0 %10050, %v9279_v22  }
 0x3d6   : > { %5717 = vperm.xlu1 %10051, %v9280_v51  }
 0x3d8   : > { %v11387_v27 = vpop.permute.xlu0 %4261 }
 0x3d9   : > { %v11385_v52 = vpop.permute.xlu1 %4257  ;;  %5729 = vperm.xlu0 %10050, %v9283_v61  }
 0x3da   : > { %5733 = vperm.xlu1 %10051, %v9284_v48  }
 0x3dc   : > { %v11391_v23 = vpop.permute.xlu0 %4269 }
 0x3dd   : > { %v11389_v26 = vpop.permute.xlu1 %4265  ;;  %6033 = vperm.xlu0 %10050, %v9295_v34   ;;  %v13510_v34 = vmov 0.0  }
 0x3de   : > { %6037 = vperm.xlu1 %10051, %v9296_v6   ;;  %3446 = vst.msk [vmem:[#allocation3] sm:$0xff] %vm3445_vm7, %v13510_v34  ;;  %3449 = vst.msk [vmem:[#allocation3 + $0x10] sm:$0xff] %vm3445_vm7, %v13510_v34 }
 0x3df   : > { %3448 = vst.msk [vmem:[#allocation3 + $0x8] sm:$0x3] %vm3447_vm8, %v13510_v34  ;;  %3450 = vst.msk [vmem:[#allocation3 + $0x18] sm:$0x3] %vm3447_vm8, %v13510_v34 }
 0x3e0   : > { %v11395_v51 = vpop.permute.xlu0 %4277  ;;  %3451 = vst.msk [vmem:[#allocation3 + $0x20] sm:$0xff] %vm3445_vm7, %v13510_v34  ;;  %3453 = vst.msk [vmem:[#allocation3 + $0x30] sm:$0xff] %vm3445_vm7, %v13510_v34 }
 0x3e1   : > { %v11393_v22 = vpop.permute.xlu1 %4273  ;;  %6049 = vperm.xlu0 %10050, %v9299_v55   ;;  %3452 = vst.msk [vmem:[#allocation3 + $0x28] sm:$0x3] %vm3447_vm8, %v13510_v34  ;;  %3454 = vst.msk [vmem:[#allocation3 + $0x38] sm:$0x3] %vm3447_vm8, %v13510_v34 }
 0x3e2   : > { %6053 = vperm.xlu1 %10051, %v9300_v13   ;;  %3455 = vst.msk [vmem:[#allocation3 + $0x40] sm:$0xff] %vm3445_vm7, %v13510_v34  ;;  %3457 = vst.msk [vmem:[#allocation3 + $0x50] sm:$0xff] %vm3445_vm7, %v13510_v34 }
 0x3e3   : > { %3456 = vst.msk [vmem:[#allocation3 + $0x48] sm:$0x3] %vm3447_vm8, %v13510_v34  ;;  %3458 = vst.msk [vmem:[#allocation3 + $0x58] sm:$0x3] %vm3447_vm8, %v13510_v34 }
 0x3e4   : > { %v11399_v48 = vpop.permute.xlu0 %4461  ;;  %3459 = vst.msk [vmem:[#allocation3 + $0x60] sm:$0xff] %vm3445_vm7, %v13510_v34  ;;  %3461 = vst.msk [vmem:[#allocation3 + $0x70] sm:$0xff] %vm3445_vm7, %v13510_v34 }
 0x3e5   : > { %v11397_v61 = vpop.permute.xlu1 %4457  ;;  %13508 = vst [vmem:[#allocation107_spill] sm:$0xff] %v11399_v48  ;;  %5673 = vperm.xlu0 %10050, %v9269_v60   ;;  %3460 = vst.msk [vmem:[#allocation3 + $0x68] sm:$0x3] %vm3447_vm8, %v13510_v34  ;;  %v9281_v48 = vld [vmem:[#allocation11 + $0x7c] ss:$0 sm:$0xff] }
 0x3e6   : > { %13507 = vst [vmem:[#allocation106_spill] sm:$0xff] %v11397_v61  ;;  %5677 = vperm.xlu1 %10051, %v9270_v39   ;;  %3462 = vst.msk [vmem:[#allocation3 + $0x78] sm:$0x3] %vm3447_vm8, %v13510_v34 }
 0x3e7   : > { %3463 = vst.msk [vmem:[#allocation3 + $0x80] sm:$0xff] %vm3445_vm7, %v13510_v34  ;;  %3465 = vst.msk [vmem:[#allocation3 + $0x90] sm:$0xff] %vm3445_vm7, %v13510_v34 }
 0x3e8   : > { %v11403_v6 = vpop.permute.xlu0 %4469  ;;  %3464 = vst.msk [vmem:[#allocation3 + $0x88] sm:$0x3] %vm3447_vm8, %v13510_v34  ;;  %3466 = vst.msk [vmem:[#allocation3 + $0x98] sm:$0x3] %vm3447_vm8, %v13510_v34 }
 0x3e9   : > { %v11401_v49 = vpop.permute.xlu1 %4465  ;;  %13509 = vst [vmem:[#allocation108_spill] sm:$0xff] %v11403_v6  ;;  %5689 = vperm.xlu0 %10050, %v9273_v36   ;;  %3467 = vst.msk [vmem:[#allocation3 + $0xa0] sm:$0xff] %vm3445_vm7, %v13510_v34 }
 0x3ea   : > { %3468 = vst.msk [vmem:[#allocation3 + $0xa8] sm:$0x3] %vm3447_vm8, %v13510_v34  ;;  %3470 = vst.msk [vmem:[#allocation3 + $0xb8] sm:$0x3] %vm3447_vm8, %v13510_v34  ;;  %3495 = vrot.lane.b32.xlu1 %v11249_v8, %s10388_s30 }
 0x3eb   : > { %3469 = vst.msk [vmem:[#allocation3 + $0xb0] sm:$0xff] %vm3445_vm7, %v13510_v34  ;;  %3471 = vst.msk [vmem:[#allocation3 + $0xc0] sm:$0xff] %vm3445_vm7, %v13510_v34 }
 0x3ec   : > { %3472 = vst.msk [vmem:[#allocation3 + $0xc8] sm:$0x3] %vm3447_vm8, %v13510_v34  ;;  %3474 = vst.msk [vmem:[#allocation3 + $0xd8] sm:$0x3] %vm3447_vm8, %v13510_v34  ;;  %v11473_v13 = vpop.permute.xlu0 %4477 }
 0x3ed   : > { %3473 = vst.msk [vmem:[#allocation3 + $0xd0] sm:$0xff] %vm3445_vm7, %v13510_v34  ;;  %3475 = vst.msk [vmem:[#allocation3 + $0xe0] sm:$0xff] %vm3445_vm7, %v13510_v34  ;;  %v11471_v36 = vpop.permute.xlu1 %4473  ;;  %3497 = vrot.lane.b32.xlu0 %v11269_v44, %s10388_s30 }
 0x3ee   : > { %3476 = vst.msk [vmem:[#allocation3 + $0xe8] sm:$0x3] %vm3447_vm8, %v13510_v34  ;;  %3478 = vst.msk [vmem:[#allocation3 + $0xf8] sm:$0x3] %vm3447_vm8, %v13510_v34  ;;  %3503 = vrot.lane.b32.xlu1 %v11255_v5, %s10388_s30 }
 0x3ef   : > { %3477 = vst.msk [vmem:[#allocation3 + $0xf0] sm:$0xff] %vm3445_vm7, %v13510_v34  ;;  %13511 = vst [vmem:[#allocation109_spill] sm:$0xff] %v11471_v36  ;;  %v9278_v36 = vld [vmem:[#allocation11 + $0x79] ss:$0 sm:$0xff] }
 0x3f0   : > { %13512 = vst [vmem:[#allocation110_spill] sm:$0xff] %v11473_v13  ;;  %v11481_v55 = vpop.permute.xlu0 %4485  ;;  %v9277_v13 = vld [vmem:[#allocation11 + $0x78] ss:$0 sm:$0xff] }
 0x3f1   : > { %v11479_v60 = vpop.permute.xlu1 %4481  ;;  %13514 = vst [vmem:[#allocation112_spill] sm:$0xff] %v11481_v55  ;;  %3505 = vrot.lane.b32.xlu0 %v11277_v17, %s10388_s30 }
 0x3f2   : > { %13513 = vst [vmem:[#allocation111_spill] sm:$0xff] %v11479_v60  ;;  %3511 = vrot.lane.b32.xlu1 %v11257_v57, %s10388_s30 }
 0x3f4   : > { %v11487_v8 = vpop.permute.xlu0 %4493 }
 0x3f5   : > { %13515 = vst [vmem:[#allocation113_spill] sm:$0xff] %v11487_v8  ;;  %v11489_v39 = vpop.permute.xlu1 %4489  ;;  %3513 = vrot.lane.b32.xlu0 %v11275_v59, %s10388_s30 }
 0x3f6   : > { %13516 = vst [vmem:[#allocation114_spill] sm:$0xff] %v11489_v39  ;;  %3519 = vrot.lane.b32.xlu1 %v11263_v3, %s10388_s30  ;;  %v9290_v39 = vld [vmem:[#allocation11 + $0x85] ss:$0 sm:$0xff] }
 0x3f8   : > { %v11495_v5 = vpop.permute.xlu0 %4501 }
 0x3f9   : > { %13517 = vst [vmem:[#allocation115_spill] sm:$0xff] %v11495_v5  ;;  %v11497_v44 = vpop.permute.xlu1 %4497  ;;  %3521 = vrot.lane.b32.xlu0 %v11285_v50, %s10388_s30  ;;  %v9282_v5 = vld [vmem:[#allocation11 + $0x7d] ss:$0 sm:$0xff] }
 0x3fa   : > { %13518 = vst [vmem:[#allocation116_spill] sm:$0xff] %v11497_v44  ;;  %3499 = vrot.lane.b32.xlu1 %v11283_v62, %s10388_s30  ;;  %v9293_v44 = vld [vmem:[#allocation11 + $0x88] ss:$0 sm:$0xff] }
 0x3fc   : > { %v11503_v57 = vpop.permute.xlu0 %4509 }
 0x3fd   : > { %13519 = vst [vmem:[#allocation117_spill] sm:$0xff] %v11503_v57  ;;  %v11505_v17 = vpop.permute.xlu1 %4505  ;;  %3501 = vrot.lane.b32.xlu0 %v11301_v16, %s10388_s30  ;;  %v9274_v16 = vld [vmem:[#allocation11 + $0x75] ss:$0 sm:$0xff] }
 0x3fe   : > { %13520 = vst [vmem:[#allocation118_spill] sm:$0xff] %v11505_v17  ;;  %3507 = vrot.lane.b32.xlu1 %v11291_v0, %s10388_s30 }
 0x400   : > { %v11511_v3 = vpop.permute.xlu0 %4517 }
 0x401   : > { %13521 = vst [vmem:[#allocation119_spill] sm:$0xff] %v11511_v3  ;;  %v11513_v59 = vpop.permute.xlu1 %4513  ;;  %3509 = vrot.lane.b32.xlu0 %v11307_v12, %s10388_s30  ;;  %v9286_v12 = vld [vmem:[#allocation11 + $0x81] ss:$0 sm:$0xff]  ;;  %v9298_v3 = vld [vmem:[#allocation11 + $0x8d] ss:$0 sm:$0xff] }
 0x402   : > { %13522 = vst [vmem:[#allocation120_spill] sm:$0xff] %v11513_v59  ;;  %3515 = vrot.lane.b32.xlu1 %v11293_v2, %s10388_s30  ;;  %v9285_v2 = vld [vmem:[#allocation11 + $0x80] ss:$0 sm:$0xff]  ;;  %v9255_v59 = vld [vmem:[#allocation11 + $0x62] ss:$0 sm:$0xff] }
 0x404   : > { %v11519_v50 = vpop.permute.xlu0 %4749 }
 0x405   : > { %v11521_v62 = vpop.permute.xlu1 %4745  ;;  %3517 = vrot.lane.b32.xlu0 %v11309_v25, %s10388_s30  ;;  %v9289_v25 = vld [vmem:[#allocation11 + $0x84] ss:$0 sm:$0xff] }
 0x406   : > { %3523 = vrot.lane.b32.xlu1 %v11299_v1, %s10388_s30 }
 0x408   : > { %v11527_v0 = vpop.permute.xlu0 %4757 }
 0x409   : > { %v11529_v57 = vpop.permute.xlu1 %4753  ;;  %3525 = vrot.lane.b32.xlu0 %v11315_v45, %s10388_s30 }
 0x40a   : > { %5693 = vperm.xlu1 %10051, %v9274_v16  }
 0x40c   : > { %v11533_v17 = vpop.permute.xlu0 %4765 }
 0x40d   : > { %v11535_v8 = vpop.permute.xlu1 %4761  ;;  %5993 = vperm.xlu0 %10050, %v9285_v2  }
 0x40e   : > { %5997 = vperm.xlu1 %10051, %v9286_v12  }
 0x410   : > { %v11537_v1 = vpop.permute.xlu0 %4773 }
 0x411   : > { %v11539_v61 = vpop.permute.xlu1 %4769  ;;  %6009 = vperm.xlu0 %10050, %v9289_v25  }
 0x412   : > { %6013 = vperm.xlu1 %10051, %v9290_v39  }
 0x414   : > { %v11541_v45 = vpop.permute.xlu0 %4781 }
 0x415   : > { %v11543_v16 = vpop.permute.xlu1 %4777  ;;  %5705 = vperm.xlu0 %10050, %v9277_v13  }
 0x416   : > { %5709 = vperm.xlu1 %10051, %v9278_v36  }
 0x418   : > { %v11545_v2 = vpop.permute.xlu0 %4789 }
 0x419   : > { %v11547_v12 = vpop.permute.xlu1 %4785  ;;  %5721 = vperm.xlu0 %10050, %v9281_v48  }
 0x41a   : > { %5725 = vperm.xlu1 %10051, %v9282_v5  }
 0x41c   : > { %v11549_v25 = vpop.permute.xlu0 %4797 }
 0x41d   : > { %v11551_v39 = vpop.permute.xlu1 %4793  ;;  %6025 = vperm.xlu0 %10050, %v9293_v44  }
 0x41e   : > { %6029 = vperm.xlu1 %10051, %v9294_v42  }
 0x420   : > { %v11553_v13 = vpop.permute.xlu0 %4805 }
 0x421   : > { %v11555_v36 = vpop.permute.xlu1 %4801  ;;  %6041 = vperm.xlu0 %10050, %v9297_v24  }
 0x422   : > { %6045 = vperm.xlu1 %10051, %v9298_v3  }
 0x424   : > { %v11557_v38 = vpop.permute.xlu0 %5069 }
 0x425   : > { %13523 = vst [vmem:[#allocation121_spill] sm:$0xff] %v11557_v38  ;;  %v11559_v48 = vpop.permute.xlu1 %5065  ;;  %5393 = vperm.xlu0 %10050, %v9255_v59  }
 0x428   : > { %v11561_v5 = vpop.permute.xlu0 %5077 }
 0x429   : > { %13524 = vst [vmem:[#allocation122_spill] sm:$0xff] %v11561_v5  ;;  %v11563_v60 = vpop.permute.xlu1 %5073 }
 0x42a   : > { %13525 = vst [vmem:[#allocation123_spill] sm:$0xff] %v11563_v60 }
 0x42c   : > { %v11565_v44 = vpop.permute.xlu0 %5085 }
 0x42d   : > { %13526 = vst [vmem:[#allocation124_spill] sm:$0xff] %v11565_v44  ;;  %v11567_v42 = vpop.permute.xlu1 %5081 }
 0x42e   : > { %13527 = vst [vmem:[#allocation125_spill] sm:$0xff] %v11567_v42 }
 0x430   : > { %v11569_v58 = vpop.permute.xlu0 %5093 }
 0x431   : > { %13528 = vst [vmem:[#allocation126_spill] sm:$0xff] %v11569_v58  ;;  %v11571_v6 = vpop.permute.xlu1 %5089 }
 0x432   : > { %13529 = vst [vmem:[#allocation127_spill] sm:$0xff] %v11571_v6 }
 0x434   : > { %v11573_v24 = vpop.permute.xlu0 %5101 }
 0x435   : > { %13530 = vst [vmem:[#allocation128_spill] sm:$0xff] %v11573_v24  ;;  %v11575_v3 = vpop.permute.xlu1 %5097 }
 0x436   : > { %13531 = vst [vmem:[#allocation129_spill] sm:$0xff] %v11575_v3 }
 0x438   : > { %v11577_v43 = vpop.permute.xlu0 %5109 }
 0x439   : > { %13532 = vst [vmem:[#allocation130_spill] sm:$0xff] %v11577_v43  ;;  %v11579_v55 = vpop.permute.xlu1 %5105 }
 0x43a   : > { %13533 = vst [vmem:[#allocation131_spill] sm:$0xff] %v11579_v55 }
 0x43c   : > { %v11581_v59 = vpop.permute.xlu0 %5117 }
 0x43d   : > { %13534 = vst [vmem:[#allocation132_spill] sm:$0xff] %v11581_v59  ;;  %v11583_v34 = vpop.permute.xlu1 %5113 }
 0x43e   : > { %13535 = vst [vmem:[#allocation133_spill] sm:$0xff] %v11583_v34 }
 0x440   : > { %v11585_v38 = vpop.permute.xlu0 %5125 }
 0x441   : > { %13536 = vst [vmem:[#allocation134_spill] sm:$0xff] %v11585_v38  ;;  %v11587_v44 = vpop.permute.xlu1 %5121 }
 0x442   : > { %13537 = vst [vmem:[#allocation135_spill] sm:$0xff] %v11587_v44 }
 0x444   : > { %v11589_v42 = vpop.permute.xlu0 %5681 }
 0x445   : > { %v11591_v56 = vpop.permute.xlu1 %5685 }
 0x446   : > { %13538 = vst [vmem:[#allocation136_spill] sm:$0xff] %v11591_v56 }
 0x448   : > { %v11593_v58 = vpop.permute.xlu0 %5697 }
 0x449   : > { %13539 = vst [vmem:[#allocation137_spill] sm:$0xff] %v11593_v58  ;;  %v11595_v24 = vpop.permute.xlu1 %5701 }
 0x44a   : > { %13540 = vst [vmem:[#allocation138_spill] sm:$0xff] %v11595_v24 }
 0x44c   : > { %v11597_v3 = vpop.permute.xlu0 %6001 }
 0x44d   : > { %v11599_v43 = vpop.permute.xlu1 %6005 }
 0x44e   : > { %13541 = vst [vmem:[#allocation139_spill] sm:$0xff] %v11599_v43 }
 0x450   : > { %v11601_v55 = vpop.permute.xlu0 %6017 }
 0x451   : > { %13542 = vst [vmem:[#allocation140_spill] sm:$0xff] %v11601_v55  ;;  %v11603_v59 = vpop.permute.xlu1 %6021 }
 0x452   : > { %13543 = vst [vmem:[#allocation141_spill] sm:$0xff] %v11603_v59 }
 0x454   : > { %v11605_v34 = vpop.permute.xlu0 %5713 }
 0x455   : > { %13544 = vst [vmem:[#allocation142_spill] sm:$0xff] %v11605_v34  ;;  %v11607_v38 = vpop.permute.xlu1 %5717 }
 0x456   : > { %13545 = vst [vmem:[#allocation143_spill] sm:$0xff] %v11607_v38 }
 0x458   : > { %v11609_v44 = vpop.permute.xlu0 %5729 }
 0x459   : > { %13546 = vst [vmem:[#allocation144_spill] sm:$0xff] %v11609_v44  ;;  %v11611_v5 = vpop.permute.xlu1 %5733 }
 0x45a   : > { %13547 = vst [vmem:[#allocation145_spill] sm:$0xff] %v11611_v5 }
 0x45c   : > { %v11613_v56 = vpop.permute.xlu0 %6033 }
 0x45d   : > { %13548 = vst [vmem:[#allocation146_spill] sm:$0xff] %v11613_v56  ;;  %v11615_v58 = vpop.permute.xlu1 %6037 }
 0x45e   : > { %13549 = vst [vmem:[#allocation147_spill] sm:$0xff] %v11615_v58 }
 0x460   : > { %v11617_v24 = vpop.permute.xlu0 %6049 }
 0x461   : > { %13550 = vst [vmem:[#allocation148_spill] sm:$0xff] %v11617_v24  ;;  %v11619_v6 = vpop.permute.xlu1 %6053 }
 0x462   : > { %13551 = vst [vmem:[#allocation149_spill] sm:$0xff] %v11619_v6 }
 0x464   : > { %v11621_v43 = vpop.permute.xlu0 %5673 }
 0x465   : > { %13552 = vst [vmem:[#allocation150_spill] sm:$0xff] %v11621_v43  ;;  %v11623_v55 = vpop.permute.xlu1 %5677 }
 0x466   : > { %13553 = vst [vmem:[#allocation151_spill] sm:$0xff] %v11623_v55 }
 0x468   : > { %v11625_v34 = vpop.permute.xlu0 %5689 }
 0x469   : > { %13554 = vst [vmem:[#allocation152_spill] sm:$0xff] %v11625_v34  ;;  %v3496_v38 = vpop.permute.xlu1 %3495 }
 0x46a   : > { %3544 = vst.msk [vmem:[#allocation3 + $0x1] sm:$0xff] %vm3543_vm9, %v3496_v38 }
 0x46c   : > { %v3498_v44 = vpop.permute.xlu0 %3497 }
 0x46d   : > { %v3504_v5 = vpop.permute.xlu1 %3503  ;;  %3545 = vst.msk [vmem:[#allocation3 + $0x11] sm:$0xff] %vm3543_vm9, %v3498_v44 }
 0x46e   : > { %3548 = vst.msk [vmem:[#allocation3 + $0x41] sm:$0xff] %vm3543_vm9, %v3504_v5 }
 0x470   : > { %v3506_v56 = vpop.permute.xlu0 %3505 }
 0x471   : > { %v3512_v24 = vpop.permute.xlu1 %3511  ;;  %3549 = vst.msk [vmem:[#allocation3 + $0x51] sm:$0xff] %vm3543_vm9, %v3506_v56  ;;  %v3560_v6 = vld [vmem:[#allocation3] sm:$0xff] }
 0x472   : > { %3552 = vst.msk [vmem:[#allocation3 + $0x81] sm:$0xff] %vm3543_vm9, %v3512_v24  ;;  %v4040_v55 = vmul.f32 %v11333_v10, %v3560_v6  ;;  %v3561_v24 = vld [vmem:[#allocation3 + $0x8] sm:$0x3] }
 0x474   : > { %4072 = vrot.lane.b32.xlu1 %v4040_v55, %s10389_s21  ;;  %v3514_v34 = vpop.permute.xlu0 %3513  ;;  %v11634_v43 = vld [vmem:[#allocation3 + $0x10] sm:$0xff] }
 0x475   : > { %v3520_v38 = vpop.permute.xlu1 %3519  ;;  %3553 = vst.msk [vmem:[#allocation3 + $0x91] sm:$0xff] %vm3543_vm9, %v3514_v34  ;;  %v11637_v44 = vld [vmem:[#allocation3 + $0x40] sm:$0xff]  ;;  %v4041_v5 = vmul.f32 %v11335_v37, %v11634_v43  ;;  %v4280_v37 = vmul.f32 %v11365_v31, %v3560_v6  ;;  %v4810_v31 = vmul.f32 %v11519_v50, %v11634_v43 }
 0x476   : > { %13555 = vst [vmem:[#allocation153_spill] sm:$0xff] %v11637_v44  ;;  %3556 = vst.msk [vmem:[#allocation3 + $0xc1] sm:$0xff] %vm3543_vm9, %v3520_v38  ;;  %v4044_v56 = vmul.f32 %v11341_v9, %v11637_v44  ;;  %v4808_v9 = vmul.f32 %v11521_v62, %v3560_v6  ;;  %v4809_v38 = vmul.f32 %v11521_v62, %v3561_v24 }
 0x477   : > { %4074 = vrot.lane.b32.xlu0 %v4041_v5, %s10389_s21  ;;  %v11656_v5 = vld [vmem:[#allocation3 + $0x18] sm:$0x3] }
 0x478   : > { %4080 = vrot.lane.b32.xlu1 %v4044_v56, %s10389_s21  ;;  %v3522_v10 = vpop.permute.xlu0 %3521  ;;  %v11646_v55 = vld [vmem:[#allocation3 + $0x50] sm:$0xff]  ;;  %v4811_v62 = vmul.f32 %v11519_v50, %v11656_v5 }
 0x479   : > { %3557 = vst.msk [vmem:[#allocation3 + $0xd1] sm:$0xff] %vm3543_vm9, %v3522_v10  ;;  %v3500_v34 = vpop.permute.xlu1 %3499  ;;  %v4045_v58 = vmul.f32 %v11343_v35, %v11646_v55  ;;  %v11659_v10 = vld [vmem:[#allocation3 + $0x48] sm:$0x3]  ;;  %v4281_v35 = vmul.f32 %v11367_v15, %v11634_v43  ;;  %v4285_v50 = vmul.f32 %v11375_v4, %v11646_v55  ;;  %v5129_v4 = vmul.f32 %v11559_v48, %v3561_v24 }
 0x47a   : > { %3546 = vst.msk [vmem:[#allocation3 + $0x21] sm:$0xff] %vm3543_vm9, %v3500_v34  ;;  %13556 = vst [vmem:[#allocation154_spill] sm:$0xff] %v11659_v10  ;;  %v4872_v34 = vrot.slane %v4808_v9, 1  ;;  %v4817_v15 = vmul.f32 %v11535_v8, %v11659_v10  ;;  %v5128_v9 = vmul.f32 %v11559_v48, %v3560_v6 }
 0x47b   : > { %4082 = vrot.lane.b32.xlu0 %v4045_v58, %s10389_s21  ;;  %v4284_v58 = vmul.f32 %v11373_v7, %v11637_v44 }
 0x47c   : > { %4312 = vrot.lane.b32.xlu1 %v4280_v37, %s10390_s13  ;;  %v3502_v56 = vpop.permute.xlu0 %3501  ;;  %v4873_v37 = vrot.slane %v4809_v38, 1  ;;  %v4875_v38 = vrot.slane %v4810_v31, 1 }
 0x47d   : > { %v3508_v59 = vpop.permute.xlu1 %3507  ;;  %3547 = vst.msk [vmem:[#allocation3 + $0x31] sm:$0xff] %vm3543_vm9, %v3502_v56  ;;  %v4816_v56 = vmul.f32 %v11535_v8, %v11637_v44  ;;  %v4818_v8 = vmul.f32 %v11533_v17, %v11646_v55  ;;  %v4885_v44 = vrot.slane %v4817_v15, 1  ;;  %v11700_v15 = vld [vmem:[#allocation3 + $0x90] sm:$0xff] }
 0x47e   : > { %3550 = vst.msk [vmem:[#allocation3 + $0x61] sm:$0xff] %vm3543_vm9, %v3508_v59  ;;  %v11676_v59 = vld [vmem:[#allocation3 + $0x58] sm:$0x3] }
 0x47f   : > { %4314 = vrot.lane.b32.xlu0 %v4281_v35, %s10390_s13  ;;  %v4876_v35 = vrot.slane %v4811_v62, 1  ;;  %v4819_v10 = vmul.f32 %v11533_v17, %v11676_v59  ;;  %v4887_v62 = vrot.slane %v4818_v8, 1 }
 0x480   : > { %4320 = vrot.lane.b32.xlu1 %v4284_v58, %s10390_s13  ;;  %v3510_v7 = vpop.permute.xlu0 %3509  ;;  %v4874_v58 = vsel %vm1050_vm3, %v4872_v34, %v4873_v37  ;;  %v5192_v37 = vrot.slane %v5128_v9, 1 }
 0x481   : > { %v3516_v60 = vpop.permute.xlu1 %3515  ;;  %3551 = vst.msk [vmem:[#allocation3 + $0x71] sm:$0xff] %vm3543_vm9, %v3510_v7  ;;  %v4884_v7 = vrot.slane %v4816_v56, 1  ;;  %v4877_v31 = vsel %vm1050_vm3, %v4875_v38, %v4876_v35  ;;  %v4888_v17 = vrot.slane %v4819_v10, 1  ;;  %v5193_v56 = vrot.slane %v5129_v4, 1  ;;  %v11704_v10 = vld [vmem:[#allocation3 + $0x80] sm:$0xff]  ;;  %v11711_v38 = vld [vmem:[#allocation3 + $0xd0] sm:$0xff] }
 0x482   : > { %3554 = vst.msk [vmem:[#allocation3 + $0xa1] sm:$0xff] %vm3543_vm9, %v3516_v60  ;;  %v4048_v9 = vmul.f32 %v11349_v20, %v11704_v10  ;;  %v11714_v35 = vld [vmem:[#allocation3 + $0xc0] sm:$0xff]  ;;  %v4053_v8 = vmul.f32 %v11359_v18, %v11711_v38  ;;  %v11725_v20 = vld [vmem:[#allocation3 + $0x88] sm:$0x3]  ;;  %v4288_v4 = vmul.f32 %v11381_v54, %v11704_v10  ;;  %v4826_v18 = vmul.f32 %v11541_v45, %v11700_v15 }
 0x483   : > { %4322 = vrot.lane.b32.xlu0 %v4285_v50, %s10390_s13  ;;  %v4886_v34 = vsel %vm1050_vm3, %v4884_v7, %v4885_v44  ;;  %v4889_v24 = vsel %vm1050_vm3, %v4887_v62, %v4888_v17  ;;  %v5194_v50 = vsel %vm1050_vm3, %v5192_v37, %v5193_v56  ;;  %v4049_v44 = vmul.f32 %v11351_v29, %v11700_v15  ;;  %v11722_v29 = vld [vmem:[#allocation3 + $0x98] sm:$0x3] }
 0x484   : > { %4920 = vrot.lane.b32.xlu1 %v4874_v58, %s10389_s21  ;;  %v3518_v6 = vpop.permute.xlu0 %3517  ;;  %v4052_v58 = vmul.f32 %v11357_v30, %v11714_v35  ;;  %v4289_v7 = vmul.f32 %v11383_v53, %v11700_v15  ;;  %v4827_v30 = vmul.f32 %v11541_v45, %v11722_v29  ;;  %v11743_v53 = vld [vmem:[#allocation3 + $0xc8] sm:$0x3]  ;;  %v4292_v54 = vmul.f32 %v11389_v26, %v11714_v35 }
 0x485   : > { %v3524_v60 = vpop.permute.xlu1 %3523  ;;  %3555 = vst.msk [vmem:[#allocation3 + $0xb1] sm:$0xff] %vm3543_vm9, %v3518_v6  ;;  %v11736_v6 = vld [vmem:[#allocation3 + $0xd8] sm:$0x3]  ;;  %v4293_v45 = vmul.f32 %v11391_v23, %v11711_v38  ;;  %v4899_v62 = vrot.slane %v4826_v18, 1  ;;  %v4833_v26 = vmul.f32 %v11551_v39, %v11743_v53  ;;  %v11771_v18 = vld [vmem:[#allocation3 + $0x30] sm:$0xff] }
 0x486   : > { %3558 = vst.msk [vmem:[#allocation3 + $0xe1] sm:$0xff] %vm3543_vm9, %v3524_v60  ;;  %v4824_v60 = vmul.f32 %v11543_v16, %v11704_v10  ;;  %v4900_v17 = vrot.slane %v4827_v30, 1  ;;  %v4835_v37 = vmul.f32 %v11549_v25, %v11736_v6  ;;  %v11773_v30 = vld [vmem:[#allocation3 + $0x60] sm:$0xff] }
 0x487   : > { %4922 = vrot.lane.b32.xlu0 %v4877_v31, %s10389_s21  ;;  %v4825_v31 = vmul.f32 %v11543_v16, %v11725_v20 }
 0x488   : > { %4928 = vrot.lane.b32.xlu1 %v4886_v34, %s10389_s21  ;;  %v3526_v48 = vpop.permute.xlu0 %3525  ;;  %v4834_v34 = vmul.f32 %v11549_v25, %v11711_v38  ;;  %v4896_v16 = vrot.slane %v4824_v60, 1  ;;  %v4901_v23 = vsel %vm1050_vm3, %v4899_v62, %v4900_v17  ;;  %v4043_v60 = vmul.f32 %v11339_v63, %v11771_v18  ;;  %v11790_v17 = vld [vmem:[#allocation3 + $0x38] sm:$0x3] }
 0x489   : > { %3559 = vst.msk [vmem:[#allocation3 + $0xf1] sm:$0xff] %vm3543_vm9, %v3526_v48  ;;  %v4897_v56 = vrot.slane %v4825_v31, 1  ;;  %v4832_v48 = vmul.f32 %v11551_v39, %v11714_v35  ;;  %v11766_v39 = vld [vmem:[#allocation3 + $0x20] sm:$0xff]  ;;  %v4046_v31 = vmul.f32 %v11345_v46, %v11773_v30 }
 0x48a   : > { %v4282_v62 = vmul.f32 %v11369_v28, %v11766_v39  ;;  %v4812_v63 = vmul.f32 %v11529_v57, %v11766_v39 }
 0x48b   : > { %4930 = vrot.lane.b32.xlu0 %v4889_v24, %s10389_s21  ;;  %v4911_v24 = vrot.slane %v4834_v34, 1  ;;  %v4908_v25 = vrot.slane %v4832_v48, 1  ;;  %v5740_v34 = vmul.f32 %v11589_v42, %v11766_v39 }
 0x48c   : > { %5240 = vrot.lane.b32.xlu1 %v5194_v50, %s10390_s13  ;;  %v4912_v50 = vrot.slane %v4835_v37, 1  ;;  %v11800_v37 = vld [vmem:[#allocation3 + $0x68] sm:$0x3]  ;;  %v11804_v28 = vpop.permute.xlu0 %5993 }
 0x48d   : > { %v5806_v48 = vrot.slane %v5740_v34, 2 }
 0x48f   : > { %4090 = vrot.lane.b32.xlu0 %v4049_v44, %s10389_s21  ;;  %v4898_v44 = vsel %vm1050_vm3, %v4896_v16, %v4897_v56  ;;  %v4283_v16 = vmul.f32 %v11371_v14, %v11771_v18  ;;  %v4814_v56 = vmul.f32 %v11527_v0, %v11771_v18  ;;  %v4821_v14 = vmul.f32 %v11539_v61, %v11800_v37 }
 0x490   : > { %4088 = vrot.lane.b32.xlu1 %v4048_v9, %s10389_s21  ;;  %v4909_v9 = vrot.slane %v4833_v26, 1  ;;  %v4286_v26 = vmul.f32 %v11377_v47, %v11773_v30 }
 0x493   : > { %4098 = vrot.lane.b32.xlu0 %v4053_v8, %s10389_s21  ;;  %v4913_v8 = vsel %vm1050_vm3, %v4911_v24, %v4912_v50  ;;  %v4878_v24 = vrot.slane %v4812_v63, 1  ;;  %v4820_v50 = vmul.f32 %v11539_v61, %v11773_v30 }
 0x494   : > { %4096 = vrot.lane.b32.xlu1 %v4052_v58, %s10389_s21  ;;  %v4910_v58 = vsel %vm1050_vm3, %v4908_v25, %v4909_v9  ;;  %v4881_v25 = vrot.slane %v4814_v56, 1 }
 0x497   : > { %4330 = vrot.lane.b32.xlu0 %v4289_v7, %s10390_s13  ;;  %v9259_v7 = vld [vmem:[#allocation11 + $0x66] ss:$0 sm:$0xff] }
 0x498   : > { %4328 = vrot.lane.b32.xlu1 %v4288_v4, %s10390_s13  ;;  %v4042_v4 = vmul.f32 %v11337_v41, %v11766_v39 }
 0x49b   : > { %4338 = vrot.lane.b32.xlu0 %v4293_v45, %s10390_s13  ;;  %v11783_v45 = vld [vmem:[#allocation3 + $0x28] sm:$0x3] }
 0x49c   : > { %4336 = vrot.lane.b32.xlu1 %v4292_v54, %s10390_s13  ;;  %v11780_v54 = vld [vmem:[#allocation3 + $0x70] sm:$0xff]  ;;  %v4813_v46 = vmul.f32 %v11529_v57, %v11783_v45  ;;  %v4815_v57 = vmul.f32 %v11527_v0, %v11790_v17 }
 0x49d   : > { %v4047_v41 = vmul.f32 %v11347_v33, %v11780_v54  ;;  %v5741_v33 = vmul.f32 %v11589_v42, %v11783_v45  ;;  %v4287_v47 = vmul.f32 %v11379_v40, %v11780_v54  ;;  %v6060_v40 = vmul.f32 %v11597_v3, %v11766_v39 }
 0x49e   : > { %v4879_v42 = vrot.slane %v4813_v46, 1  ;;  %v4882_v9 = vrot.slane %v4815_v57, 1 }
 0x49f   : > { %4938 = vrot.lane.b32.xlu0 %v4901_v23, %s10389_s21  ;;  %v5807_v23 = vrot.slane %v5741_v33, 2  ;;  %v6126_v63 = vrot.slane %v6060_v40, 2  ;;  %v11843_v33 = vld [vmem:[#allocation3 + $0xa0] sm:$0xff]  ;;  %v11895_v40 = vld [vmem:[#allocation3 + $0xe8] sm:$0x3] }
 0x4a0   : > { %4936 = vrot.lane.b32.xlu1 %v4898_v44, %s10389_s21  ;;  %v11819_v44 = vld [vmem:[#allocation3 + $0x78] sm:$0x3]  ;;  %v4880_v61 = vsel %vm1050_vm3, %v4878_v24, %v4879_v42  ;;  %v11860_v42 = vld [vmem:[#allocation3 + $0xb0] sm:$0xff] }
 0x4a1   : > { %v11823_v0 = vsel %vm1371_vm6, %v5806_v48, %v5807_v23  ;;  %v4050_v23 = vmul.f32 %v11353_v19, %v11843_v33 }
 0x4a3   : > { %4946 = vrot.lane.b32.xlu0 %v4913_v8, %s10389_s21  ;;  %v4822_v8 = vmul.f32 %v11537_v1, %v11780_v54 }
 0x4a4   : > { %4944 = vrot.lane.b32.xlu1 %v4910_v58, %s10389_s21  ;;  %v4823_v58 = vmul.f32 %v11537_v1, %v11819_v44 }
 0x4a6   : > { %v4894_v1 = vrot.slane %v4823_v58, 1  ;;  %v11881_v58 = vld [vmem:[#allocation3 + $0xa8] sm:$0x3] }
 0x4a7   : > { %5409 = vperm.xlu0 %10050, %v9259_v7   ;;  %v11831_v7 = vpop.permute.xlu0 %6009 }
 0x4a8   : > { %4076 = vrot.lane.b32.xlu1 %v4042_v4, %s10389_s21  ;;  %v4890_v4 = vrot.slane %v4820_v50, 1 }
 0x4ab   : > { %4078 = vrot.lane.b32.xlu0 %v4043_v60, %s10389_s21  ;;  %v4891_v60 = vrot.slane %v4821_v14, 1  ;;  %v11853_v57 = vpop.permute.xlu0 %5705  ;;  %v11863_v14 = vld [vmem:[#allocation3 + $0xe0] sm:$0xff] }
 0x4ac   : > { %4084 = vrot.lane.b32.xlu1 %v4046_v31, %s10389_s21  ;;  %v6061_v31 = vmul.f32 %v11597_v3, %v11783_v45  ;;  %v4525_v3 = vmul.f32 %v11401_v49, %v11783_v45  ;;  %v4054_v19 = vmul.f32 %v11361_v32, %v11863_v14  ;;  %v4828_v32 = vmul.f32 %v11547_v12, %v11843_v33 }
 0x4ad   : > { %v4892_v34 = vsel %vm1050_vm3, %v4890_v4, %v4891_v60  ;;  %v4829_v4 = vmul.f32 %v11547_v12, %v11881_v58  ;;  %v11892_v60 = vld [vmem:[#allocation3 + $0xb8] sm:$0x3] }
 0x4ae   : > { %v6127_v46 = vrot.slane %v6061_v31, 2  ;;  %v4591_v50 = vrot.slane %v4525_v3, 1  ;;  %v4831_v12 = vmul.f32 %v11545_v2, %v11892_v60 }
 0x4af   : > { %4086 = vrot.lane.b32.xlu0 %v4047_v41, %s10389_s21  ;;  %v4883_v41 = vsel %vm1050_vm3, %v4881_v25, %v4882_v9  ;;  %v11873_v25 = vld [vmem:[#allocation3 + $0xf0] sm:$0xff]  ;;  %v11875_v9 = vpop.permute.xlu0 %5721 }
 0x4b0   : > { %4316 = vrot.lane.b32.xlu1 %v4282_v62, %s10390_s13  ;;  %v4893_v62 = vrot.slane %v4822_v8, 1  ;;  %v11849_v56 = vsel %vm1371_vm6, %v6126_v63, %v6127_v46  ;;  %v4903_v63 = vrot.slane %v4829_v4, 1  ;;  %v4836_v46 = vmul.f32 %v11555_v36, %v11863_v14 }
 0x4b1   : > { %v4906_v3 = vrot.slane %v4831_v12, 1  ;;  %v9263_v12 = vld [vmem:[#allocation11 + $0x6a] ss:$0 sm:$0xff] }
 0x4b2   : > { %v4895_v24 = vsel %vm1050_vm3, %v4893_v62, %v4894_v1  ;;  %v4830_v62 = vmul.f32 %v11545_v2, %v11860_v42  ;;  %v4902_v1 = vrot.slane %v4828_v32, 1  ;;  %v4838_v2 = vmul.f32 %v11553_v13, %v11873_v25  ;;  %v9256_v32 = vld [vmem:[#allocation11 + $0x63] ss:$0 sm:$0xff] }
 0x4b3   : > { %4318 = vrot.lane.b32.xlu0 %v4283_v16, %s10390_s13  ;;  %v4524_v16 = vmul.f32 %v11401_v49, %v11766_v39  ;;  %v11897_v31 = vpop.permute.xlu0 %6025 }
 0x4b4   : > { %4324 = vrot.lane.b32.xlu1 %v4286_v26, %s10390_s13  ;;  %v11855_v26 = vpop.permute.xlu1 %5693 }
 0x4b5   : > { %v4590_v48 = vrot.slane %v4524_v16, 1  ;;  %v4905_v16 = vrot.slane %v4830_v62, 1 }
 0x4b7   : > { %4326 = vrot.lane.b32.xlu0 %v4287_v47, %s10390_s13  ;;  %v11867_v49 = vsel %vm1050_vm3, %v4590_v48, %v4591_v50  ;;  %v4051_v47 = vmul.f32 %v11355_v11, %v11860_v42  ;;  %v4290_v11 = vmul.f32 %v11385_v52, %v11843_v33 }
 0x4b8   : > { %4924 = vrot.lane.b32.xlu1 %v4880_v61, %s10389_s21  ;;  %v11878_v8 = vpop.permute.xlu1 %5997  ;;  %v4055_v61 = vmul.f32 %v11363_v21, %v11873_v25  ;;  %v4291_v21 = vmul.f32 %v11387_v27, %v11860_v42  ;;  %v4837_v27 = vmul.f32 %v11555_v36, %v11895_v40  ;;  %v4914_v36 = vrot.slane %v4836_v46, 1 }
 0x4ba   : > { %v4915_v50 = vrot.slane %v4837_v27, 1 }
 0x4bb   : > { %4926 = vrot.lane.b32.xlu0 %v4883_v41, %s10389_s21  ;;  %v4294_v41 = vmul.f32 %v11393_v22, %v11863_v14  ;;  %v4295_v22 = vmul.f32 %v11395_v51, %v11873_v25  ;;  %v4907_v51 = vsel %vm1050_vm3, %v4905_v16, %v4906_v3  ;;  %v9264_v16 = vld [vmem:[#allocation11 + $0x6b] ss:$0 sm:$0xff]  ;;  %v9253_v3 = vld [vmem:[#allocation11 + $0x60] ss:$0 sm:$0xff] }
 0x4bc   : > { %4932 = vrot.lane.b32.xlu1 %v4892_v34, %s10389_s21  ;;  %v11901_v52 = vpop.permute.xlu1 %6013  ;;  %v11914_v34 = vld [vmem:[#allocation3 + $0xf8] sm:$0x3] }
 0x4bd   : > { %v4839_v48 = vmul.f32 %v11553_v13, %v11914_v34 }
 0x4bf   : > { %4934 = vrot.lane.b32.xlu0 %v4895_v24, %s10389_s21  ;;  %v4904_v24 = vsel %vm1050_vm3, %v4902_v1, %v4903_v63  ;;  %v9260_v1 = vld [vmem:[#allocation11 + $0x67] ss:$0 sm:$0xff] }
 0x4c0   : > { %4092 = vrot.lane.b32.xlu1 %v4050_v23, %s10389_s21  ;;  %v11923_v23 = vpop.permute.xlu0 %6041 }
 0x4c3   : > { %4094 = vrot.lane.b32.xlu0 %v4051_v47, %s10389_s21  ;;  %v11927_v47 = vpop.permute.xlu1 %5709 }
 0x4c4   : > { %4100 = vrot.lane.b32.xlu1 %v4054_v19, %s10389_s21  ;;  %v4917_v19 = vrot.slane %v4838_v2, 1  ;;  %v5394_v13 = vpop.permute.xlu0 %5393 }
 0x4c5   : > { %v5453_v62 = vmul.f32 %v5394_v13, %v11783_v45 }
 0x4c7   : > { %4102 = vrot.lane.b32.xlu0 %v4055_v61, %s10389_s21  ;;  %v4918_v61 = vrot.slane %v4839_v48, 1  ;;  %v11934_v4 = vpop.permute.xlu1 %5725  ;;  %v5519_v27 = vrot.slane %v5453_v62, 2  ;;  %v9268_v48 = vld [vmem:[#allocation11 + $0x6f] ss:$0 sm:$0xff] }
 0x4c8   : > { %4332 = vrot.lane.b32.xlu1 %v4290_v11, %s10390_s13  ;;  %v4916_v11 = vsel %vm1050_vm3, %v4914_v36, %v4915_v50  ;;  %v13557_v36 = vld [vmem:[#allocation123_spill] sm:$0xff] }
 0x4c9   : > { %v5132_v50 = vmul.f32 %v13557_v36, %v11766_v39 }
 0x4cb   : > { %4334 = vrot.lane.b32.xlu0 %v4291_v21, %s10390_s13  ;;  %v4919_v21 = vsel %vm1050_vm3, %v4917_v19, %v4918_v61  ;;  %v11940_v63 = vpop.permute.xlu1 %6029  ;;  %v9257_v19 = vld [vmem:[#allocation11 + $0x64] ss:$0 sm:$0xff]  ;;  %v9254_v61 = vld [vmem:[#allocation11 + $0x61] ss:$0 sm:$0xff] }
 0x4cc   : > { %4340 = vrot.lane.b32.xlu1 %v4294_v41, %s10390_s13  ;;  %v5452_v41 = vmul.f32 %v5394_v13, %v11766_v39  ;;  %v5198_v13 = vrot.slane %v5132_v50, 1 }
 0x4ce   : > { %v5518_v46 = vrot.slane %v5452_v41, 2 }
 0x4cf   : > { %4342 = vrot.lane.b32.xlu0 %v4295_v22, %s10390_s13  ;;  %v9267_v22 = vld [vmem:[#allocation11 + $0x6e] ss:$0 sm:$0xff] }
 0x4d0   : > { %4940 = vrot.lane.b32.xlu1 %v4904_v24, %s10389_s21  ;;  %v11943_v2 = vsel %vm1371_vm6, %v5518_v46, %v5519_v27  ;;  %v11945_v24 = vpop.permute.xlu1 %6045  ;;  %v9258_v27 = vld [vmem:[#allocation11 + $0x65] ss:$0 sm:$0xff] }
 0x4d3   : > { %4942 = vrot.lane.b32.xlu0 %v4907_v51, %s10389_s21  ;;  %v5133_v51 = vmul.f32 %v13557_v36, %v11783_v45 }
 0x4d4   : > { %4948 = vrot.lane.b32.xlu1 %v4916_v11, %s10389_s21 }
 0x4d7   : > { %4950 = vrot.lane.b32.xlu0 %v4919_v21, %s10389_s21  ;;  %v13559_v21 = vld [vmem:[#allocation127_spill] sm:$0xff] }
 0x4d8   : > { %5397 = vperm.xlu1 %10051, %v9256_v32   ;;  %v5199_v32 = vrot.slane %v5133_v51, 1  ;;  %v5140_v41 = vmul.f32 %v13559_v21, %v11773_v30  ;;  %v5141_v62 = vmul.f32 %v13559_v21, %v11800_v37  ;;  %v13563_v51 = vld [vmem:[#allocation126_spill] sm:$0xff] }
 0x4d9   : > { %v5143_v21 = vmul.f32 %v13563_v51, %v11819_v44 }
 0x4db   : > { %5425 = vperm.xlu0 %10050, %v9263_v12   ;;  %v13560_v12 = vld [vmem:[#allocation122_spill] sm:$0xff] }
 0x4dc   : > { %5413 = vperm.xlu1 %10051, %v9260_v1   ;;  %v5134_v1 = vmul.f32 %v13560_v12, %v11771_v18  ;;  %v5135_v45 = vmul.f32 %v13560_v12, %v11790_v17 }
 0x4de   : > { %v5201_v36 = vrot.slane %v5134_v1, 1  ;;  %v5202_v50 = vrot.slane %v5135_v45, 1 }
 0x4df   : > { %5441 = vperm.xlu0 %10050, %v9267_v22  }
 0x4e0   : > { %5429 = vperm.xlu1 %10051, %v9264_v16   ;;  %v5200_v16 = vsel %vm1050_vm3, %v5198_v13, %v5199_v32  ;;  %v5203_v13 = vsel %vm1050_vm3, %v5201_v36, %v5202_v50 }
 0x4e3   : > { %5385 = vperm.xlu0 %10050, %v9253_v3   ;;  %v5210_v3 = vrot.slane %v5140_v41, 1  ;;  %v5214_v41 = vrot.slane %v5143_v21, 1  ;;  %v9265_v21 = vld [vmem:[#allocation11 + $0x6c] ss:$0 sm:$0xff] }
 0x4e4   : > { %5445 = vperm.xlu1 %10051, %v9268_v48   ;;  %v5211_v48 = vrot.slane %v5141_v62, 1  ;;  %v9303_v62 = vld [vmem:[#allocation12 + $0x2] ss:$0 sm:$0xff] }
 0x4e6   : > { %v11951_v11 = vpop.permute.xlu1 %4072 }
 0x4e7   : > { %13558 = vst [vmem:[#allocation123_spill] sm:$0xff] %v11951_v11  ;;  %5401 = vperm.xlu0 %10050, %v9257_v19   ;;  %v5142_v19 = vmul.f32 %v13563_v51, %v11780_v54  ;;  %v5212_v11 = vsel %vm1050_vm3, %v5210_v3, %v5211_v48  ;;  %v9304_v48 = vld [vmem:[#allocation12 + $0x3] ss:$0 sm:$0xff]  ;;  %v9308_v51 = vld [vmem:[#allocation12 + $0x7] ss:$0 sm:$0xff] }
 0x4e8   : > { %5389 = vperm.xlu1 %10051, %v9254_v61  }
 0x4e9   : > { %v11961_v46 = vpop.permute.xlu0 %4074  ;;  %v5213_v32 = vrot.slane %v5142_v19, 1 }
 0x4ea   : > { %13561 = vst [vmem:[#allocation127_spill] sm:$0xff] %v11961_v46  ;;  %v11963_v22 = vpop.permute.xlu1 %4080 }
 0x4eb   : > { %13562 = vst [vmem:[#allocation122_spill] sm:$0xff] %v11963_v22  ;;  %5244 = vrot.lane.b32.xlu0 %v5200_v16, %s10390_s13  ;;  %v9307_v16 = vld [vmem:[#allocation12 + $0x6] ss:$0 sm:$0xff] }
 0x4ec   : > { %5405 = vperm.xlu1 %10051, %v9258_v27   ;;  %v5215_v27 = vsel %vm1050_vm3, %v5213_v32, %v5214_v41 }
 0x4ed   : > { %v11971_v61 = vpop.permute.xlu0 %4082 }
 0x4ee   : > { %13564 = vst [vmem:[#allocation126_spill] sm:$0xff] %v11971_v61  ;;  %v11973_v12 = vpop.permute.xlu1 %4312 }
 0x4ef   : > { %13565 = vst [vmem:[#allocation155_spill] sm:$0xff] %v11973_v12  ;;  %5252 = vrot.lane.b32.xlu0 %v5212_v11, %s10390_s13  ;;  %v9261_v11 = vld [vmem:[#allocation11 + $0x68] ss:$0 sm:$0xff] }
 0x4f0   : > { %5246 = vrot.lane.b32.xlu1 %v5203_v13, %s10390_s13  ;;  %v9262_v13 = vld [vmem:[#allocation11 + $0x69] ss:$0 sm:$0xff] }
 0x4f1   : > { %v11979_v1 = vpop.permute.xlu0 %4314 }
 0x4f2   : > { %13566 = vst [vmem:[#allocation156_spill] sm:$0xff] %v11979_v1  ;;  %v11981_v45 = vpop.permute.xlu1 %4320 }
 0x4f3   : > { %13567 = vst [vmem:[#allocation157_spill] sm:$0xff] %v11981_v45  ;;  %6337 = vperm.xlu0 %10050, %v9303_v62   ;;  %v9319_v62 = vld [vmem:[#allocation14 + $0x4] ss:$0 sm:$0xff] }
 0x4f4   : > { %5254 = vrot.lane.b32.xlu1 %v5215_v27, %s10390_s13  ;;  %v9266_v27 = vld [vmem:[#allocation11 + $0x6d] ss:$0 sm:$0xff] }
 0x4f5   : > { %v11985_v3 = vpop.permute.xlu0 %4322 }
 0x4f6   : > { %13568 = vst [vmem:[#allocation158_spill] sm:$0xff] %v11985_v3  ;;  %v11987_v36 = vpop.permute.xlu1 %4920  ;;  %v13579_v3 = vld [vmem:[#allocation130_spill] sm:$0xff] }
 0x4f7   : > { %13569 = vst [vmem:[#allocation159_spill] sm:$0xff] %v11987_v36  ;;  %6353 = vperm.xlu0 %10050, %v9307_v16  }
 0x4f8   : > { %6341 = vperm.xlu1 %10051, %v9304_v48   ;;  %v13575_v48 = vld [vmem:[#allocation131_spill] sm:$0xff] }
 0x4f9   : > { %v11989_v50 = vpop.permute.xlu0 %4922  ;;  %v5148_v36 = vmul.f32 %v13575_v48, %v11843_v33  ;;  %v5149_v12 = vmul.f32 %v13575_v48, %v11881_v58  ;;  %v5150_v48 = vmul.f32 %v13579_v3, %v11860_v42 }
 0x4fa   : > { %13570 = vst [vmem:[#allocation160_spill] sm:$0xff] %v11989_v50  ;;  %v11991_v19 = vpop.permute.xlu1 %4928 }
 0x4fb   : > { %13571 = vst [vmem:[#allocation161_spill] sm:$0xff] %v11991_v19  ;;  %5417 = vperm.xlu0 %10050, %v9261_v11   ;;  %v5223_v50 = vrot.slane %v5149_v12, 1 }
 0x4fc   : > { %6357 = vperm.xlu1 %10051, %v9308_v51   ;;  %v9335_v51 = vld [vmem:[#allocation14 + $0x5] ss:$0 sm:$0xff] }
 0x4fd   : > { %v11995_v41 = vpop.permute.xlu0 %4930 }
 0x4fe   : > { %v11993_v32 = vpop.permute.xlu1 %5240  ;;  %13573 = vst [vmem:[#allocation163_spill] sm:$0xff] %v11995_v41  ;;  %v13577_v41 = vld [vmem:[#allocation135_spill] sm:$0xff] }
 0x4ff   : > { %13572 = vst [vmem:[#allocation162_spill] sm:$0xff] %v11993_v32  ;;  %5433 = vperm.xlu0 %10050, %v9265_v21   ;;  %v9323_v32 = vld [vmem:[#allocation14 + $0xc] ss:$0 sm:$0xff]  ;;  %v5156_v21 = vmul.f32 %v13577_v41, %v11863_v14 }
 0x500   : > { %5421 = vperm.xlu1 %10051, %v9262_v13   ;;  %v5157_v13 = vmul.f32 %v13577_v41, %v11895_v40 }
 0x501   : > { %v12003_v11 = vpop.permute.xlu0 %4090 }
 0x502   : > { %v11997_v16 = vpop.permute.xlu1 %4088  ;;  %13576 = vst [vmem:[#allocation131_spill] sm:$0xff] %v12003_v11  ;;  %v5234_v11 = vrot.slane %v5156_v21, 1  ;;  %v5235_v45 = vrot.slane %v5157_v13, 1 }
 0x503   : > { %13574 = vst [vmem:[#allocation164_spill] sm:$0xff] %v11997_v16  ;;  %6529 = vperm.xlu0 %10050, %v9319_v62   ;;  %v5222_v16 = vrot.slane %v5148_v36, 1  ;;  %v5151_v62 = vmul.f32 %v13579_v3, %v11892_v60  ;;  %v13582_v36 = vld [vmem:[#allocation134_spill] sm:$0xff] }
 0x504   : > { %5437 = vperm.xlu1 %10051, %v9266_v27   ;;  %v9339_v27 = vld [vmem:[#allocation14 + $0xd] ss:$0 sm:$0xff]  ;;  %v5158_v12 = vmul.f32 %v13582_v36, %v11873_v25 }
 0x505   : > { %v12015_v61 = vpop.permute.xlu0 %4098  ;;  %v5224_v41 = vsel %vm1050_vm3, %v5222_v16, %v5223_v50  ;;  %v5226_v3 = vrot.slane %v5151_v62, 1 }
 0x506   : > { %v12009_v19 = vpop.permute.xlu1 %4096  ;;  %13580 = vst [vmem:[#allocation130_spill] sm:$0xff] %v12015_v61  ;;  %v5237_v13 = vrot.slane %v5158_v12, 1 }
 0x507   : > { %13578 = vst [vmem:[#allocation135_spill] sm:$0xff] %v12009_v19  ;;  %6689 = vperm.xlu0 %10050, %v9335_v51   ;;  %v5159_v51 = vmul.f32 %v13582_v36, %v11914_v34  ;;  %v5225_v19 = vrot.slane %v5150_v48, 1  ;;  %v13585_v48 = vld [vmem:[#allocation136_spill] sm:$0xff] }
 0x508   : > { %6545 = vperm.xlu1 %10051, %v9323_v32   ;;  %v5236_v32 = vsel %vm1050_vm3, %v5234_v11, %v5235_v45  ;;  %v5742_v62 = vmul.f32 %v13585_v48, %v11771_v18  ;;  %v5743_v45 = vmul.f32 %v13585_v48, %v11790_v17 }
 0x509   : > { %v5238_v61 = vrot.slane %v5159_v51, 1  ;;  %v5227_v1 = vsel %vm1050_vm3, %v5225_v19, %v5226_v3  ;;  %v12038_v11 = vpop.permute.xlu0 %4330  ;;  %v13588_v51 = vld [vmem:[#allocation138_spill] sm:$0xff] }
 0x50a   : > { %v12017_v22 = vpop.permute.xlu1 %4328  ;;  %v5809_v19 = vrot.slane %v5742_v62, 2  ;;  %v5810_v12 = vrot.slane %v5743_v45, 2  ;;  %v5750_v3 = vmul.f32 %v13588_v51, %v11780_v54 }
 0x50b   : > { %13581 = vst [vmem:[#allocation165_spill] sm:$0xff] %v12017_v22  ;;  %5260 = vrot.lane.b32.xlu0 %v5224_v41, %s10390_s13  ;;  %v13584_v22 = vld [vmem:[#allocation137_spill] sm:$0xff]  ;;  %v5239_v41 = vsel %vm1050_vm3, %v5237_v13, %v5238_v61 }
 0x50c   : > { %6705 = vperm.xlu1 %10051, %v9339_v27   ;;  %v5748_v50 = vmul.f32 %v13584_v22, %v11773_v30  ;;  %v5749_v16 = vmul.f32 %v13584_v22, %v11800_v37  ;;  %13586 = vst [vmem:[#allocation137_spill] sm:$0xff] %v12038_v11  ;;  %v5811_v13 = vsel %vm1371_vm6, %v5809_v19, %v5810_v12  ;;  %v13593_v12 = vld [vmem:[#allocation140_spill] sm:$0xff] }
 0x50e   : > { %v12026_v21 = vpop.permute.xlu1 %4336  ;;  %v5818_v36 = vrot.slane %v5748_v50, 2  ;;  %v5819_v22 = vrot.slane %v5749_v16, 2  ;;  %v9311_v16 = vld [vmem:[#allocation12 + $0xa] ss:$0 sm:$0xff] }
 0x50f   : > { %13583 = vst [vmem:[#allocation134_spill] sm:$0xff] %v12026_v21  ;;  %5268 = vrot.lane.b32.xlu0 %v5236_v32, %s10390_s13  ;;  %v5751_v32 = vmul.f32 %v13588_v51, %v11819_v44  ;;  %v9315_v51 = vld [vmem:[#allocation12 + $0xe] ss:$0 sm:$0xff] }
 0x510   : > { %5262 = vrot.lane.b32.xlu1 %v5227_v1, %s10390_s13  ;;  %v12051_v1 = vpop.permute.xlu0 %4338  ;;  %v5820_v61 = vsel %vm1371_vm6, %v5818_v36, %v5819_v22  ;;  %v13592_v22 = vld [vmem:[#allocation139_spill] sm:$0xff] }
 0x511   : > { %13589 = vst [vmem:[#allocation138_spill] sm:$0xff] %v12051_v1  ;;  %v5822_v50 = vrot.slane %v5751_v32, 2  ;;  %v6062_v19 = vmul.f32 %v13592_v22, %v11771_v18  ;;  %v6069_v32 = vmul.f32 %v13593_v12, %v11800_v37 }
 0x512   : > { %v12041_v27 = vpop.permute.xlu1 %4936 }
 0x513   : > { %13587 = vst [vmem:[#allocation136_spill] sm:$0xff] %v12041_v27  ;;  %5852 = vrot.lane.b32.xlu0 %v11823_v0, %s10389_s21  ;;  %v5821_v0 = vrot.slane %v5750_v3, 2  ;;  %v6068_v3 = vmul.f32 %v13593_v12, %v11773_v30  ;;  %v6129_v18 = vrot.slane %v6062_v19, 2  ;;  %v6139_v21 = vrot.slane %v6069_v32, 2  ;;  %v9343_v32 = vld [vmem:[#allocation14 + $0x15] ss:$0 sm:$0xff] }
 0x514   : > { %5270 = vrot.lane.b32.xlu1 %v5239_v41, %s10390_s13  ;;  %v12060_v41 = vpop.permute.xlu0 %4938 }
 0x515   : > { %v5823_v45 = vsel %vm1371_vm6, %v5821_v0, %v5822_v50  ;;  %13591 = vst [vmem:[#allocation167_spill] sm:$0xff] %v12060_v41  ;;  %v6063_v0 = vmul.f32 %v13592_v22, %v11790_v17  ;;  %v6138_v41 = vrot.slane %v6068_v3, 2 }
 0x516   : > { %v12053_v48 = vpop.permute.xlu1 %4944 }
 0x517   : > { %13590 = vst [vmem:[#allocation166_spill] sm:$0xff] %v12053_v48  ;;  %5860 = vrot.lane.b32.xlu0 %v5820_v61, %s10389_s21  ;;  %v9312_v48 = vld [vmem:[#allocation12 + $0xb] ss:$0 sm:$0xff]  ;;  %v6130_v37 = vrot.slane %v6063_v0, 2 }
 0x518   : > { %5854 = vrot.lane.b32.xlu1 %v5811_v13, %s10389_s21  ;;  %v13594_v61 = vld [vmem:[#allocation92_spill] sm:$0xff] }
 0x519   : > { %v3882_v13 = vmul.f32 %v13594_v61, %v11766_v39  ;;  %v13596_v39 = vld [vmem:[#allocation141_spill] sm:$0xff]  ;;  %v6131_v19 = vsel %vm1371_vm6, %v6129_v18, %v6130_v37  ;;  %v9347_v18 = vld [vmem:[#allocation14 + $0x1d] ss:$0 sm:$0xff] }
 0x51a   : > { %v4077_v62 = vpop.permute.xlu1 %4076  ;;  %v6071_v17 = vmul.f32 %v13596_v39, %v11819_v44  ;;  %v13597_v61 = vld [vmem:[#allocation121_spill] sm:$0xff] }
 0x51b   : > { %6369 = vperm.xlu0 %10050, %v9311_v16   ;;  %v4122_v50 = vadd.f32 %v4077_v62, %v3882_v13  ;;  %v9316_v16 = vld [vmem:[#allocation12 + $0xf] ss:$0 sm:$0xff]  ;;  %v5130_v13 = vmul.f32 %v13597_v61, %v11634_v43  ;;  %v5131_v0 = vmul.f32 %v13597_v61, %v11656_v5  ;;  %v13601_v37 = vld [vmem:[#allocation125_spill] sm:$0xff] }
 0x51c   : > { %5862 = vrot.lane.b32.xlu1 %v5823_v45, %s10389_s21  ;;  %v12075_v45 = vpop.permute.xlu0 %4946  ;;  %v6142_v12 = vrot.slane %v6071_v17, 2  ;;  %v13603_v43 = vld [vmem:[#allocation124_spill] sm:$0xff] }
 0x51d   : > { %13595 = vst [vmem:[#allocation139_spill] sm:$0xff] %v12075_v45  ;;  %v5139_v5 = vmul.f32 %v13603_v43, %v11676_v59 }
 0x51e   : > { %v12063_v36 = vpop.permute.xlu1 %4084 }
 0x51f   : > { %6385 = vperm.xlu0 %10050, %v9315_v51   ;;  %v6070_v51 = vmul.f32 %v13596_v39, %v11780_v54  ;;  %v9327_v54 = vld [vmem:[#allocation14 + $0x14] ss:$0 sm:$0xff] }
 0x520   : > { %6373 = vperm.xlu1 %10051, %v9312_v48  }
 0x522   : > { %v4317_v27 = vpop.permute.xlu1 %4316 }
 0x523   : > { %v4362_v30 = vadd.f32 %v4317_v27, %v4122_v50  ;;  %6172 = vrot.lane.b32.xlu0 %v11849_v56, %s10390_s13  ;;  %v6140_v27 = vsel %vm1371_vm6, %v6138_v41, %v6139_v21  ;;  %v6141_v56 = vrot.slane %v6070_v51, 2  ;;  %v9331_v21 = vld [vmem:[#allocation14 + $0x1c] ss:$0 sm:$0xff]  ;;  %v13602_v51 = vld [vmem:[#allocation154_spill] sm:$0xff] }
 0x524   : > { %6389 = vperm.xlu1 %10051, %v9316_v16   ;;  %v9351_v16 = vld [vmem:[%s13598_s24 + $0x2] ss:$0 sm:$0xff]  ;;  %v5137_v17 = vmul.f32 %v13601_v37, %v13602_v51  ;;  %s13851_s24 = sld [smem:[#allocation201_spill]] }
 0x525   : > { %v12084_v48 = vadd.f32 %v11867_v49, %v4362_v30  ;;  %v6143_v49 = vsel %vm1371_vm6, %v6141_v56, %v6142_v12  ;;  %v13600_v30 = vld [vmem:[#allocation153_spill] sm:$0xff]  ;;  %v5195_v56 = vrot.slane %v5130_v13, 1  ;;  %v5196_v12 = vrot.slane %v5131_v0, 1 }
 0x526   : > { %v12086_v62 = vpop.permute.xlu1 %4324  ;;  %v12088_v22 = vpop.permute.xlu0 %5409  ;;  %v5136_v39 = vmul.f32 %v13601_v37, %v13600_v30  ;;  %v5208_v30 = vrot.slane %v5139_v5, 1  ;;  %v13605_v37 = vld [vmem:[#allocation143_spill] sm:$0xff] }
 0x527   : > { %6180 = vrot.lane.b32.xlu0 %v6140_v27, %s10390_s13  ;;  %v5138_v27 = vmul.f32 %v13603_v43, %v11646_v55  ;;  %v5197_v59 = vsel %vm1050_vm3, %v5195_v56, %v5196_v12  ;;  %v5758_v13 = vmul.f32 %v13605_v37, %v11860_v42  ;;  %v5759_v0 = vmul.f32 %v13605_v37, %v11892_v60  ;;  %v13607_v56 = vld [vmem:[#allocation145_spill] sm:$0xff] }
 0x528   : > { %6174 = vrot.lane.b32.xlu1 %v6131_v19, %s10390_s13  ;;  %v5766_v12 = vmul.f32 %v13607_v56, %v11873_v25 }
 0x529   : > { %v5207_v61 = vrot.slane %v5138_v27, 1  ;;  %v5833_v27 = vrot.slane %v5758_v13, 2  ;;  %v5834_v5 = vrot.slane %v5759_v0, 2 }
 0x52a   : > { %v12094_v44 = vpop.permute.xlu1 %4924  ;;  %v12096_v3 = vpop.permute.xlu0 %4078  ;;  %v5845_v0 = vrot.slane %v5766_v12, 2  ;;  %s13190_s16 = scalar_lea.vmem %s13851_s24, %s9416_s22 }
 0x52b   : > { %6561 = vperm.xlu0 %10050, %v9327_v54   ;;  %v5835_v13 = vsel %vm1371_vm6, %v5833_v27, %v5834_v5  ;;  %v9302_v27 = vld [vmem:[#allocation12 + $0x1] ss:$0 sm:$0xff]  ;;  %v9301_v5 = vld [vmem:[#allocation12] ss:$0 sm:$0xff] }
 0x52c   : > { %6182 = vrot.lane.b32.xlu1 %v6143_v49, %s10390_s13  ;;  %v9355_v49 = vld [vmem:[%s13599_s14 + $0x6] ss:$0 sm:$0xff] }
 0x52e   : > { %v12100_v41 = vpop.permute.xlu0 %4086  ;;  %v12106_v50 = vpop.permute.xlu1 %4932 }
 0x52f   : > { %6721 = vperm.xlu0 %10050, %v9343_v32   ;;  %v5204_v32 = vrot.slane %v5136_v39, 1 }
 0x530   : > { %6577 = vperm.xlu1 %10051, %v9331_v21   ;;  %v5205_v21 = vrot.slane %v5137_v17, 1  ;;  %v5209_v17 = vsel %vm1050_vm3, %v5207_v61, %v5208_v30 }
 0x532   : > { %v12119_v19 = vpop.permute.xlu0 %4318  ;;  %v12121_v54 = vpop.permute.xlu1 %4092  ;;  %v5206_v51 = vsel %vm1050_vm3, %v5204_v32, %v5205_v21  ;;  %v13608_v32 = vld [vmem:[#allocation144_spill] sm:$0xff] }
 0x533   : > { %6881 = vperm.xlu0 %10050, %v9351_v16   ;;  %13604 = vst [vmem:[#allocation140_spill] sm:$0xff] %v12121_v54  ;;  %v13606_v16 = vld [vmem:[#allocation142_spill] sm:$0xff]  ;;  %v5764_v21 = vmul.f32 %v13608_v32, %v11863_v14  ;;  %v5765_v61 = vmul.f32 %v13608_v32, %v11895_v40 }
 0x534   : > { %6737 = vperm.xlu1 %10051, %v9347_v18   ;;  %v5756_v18 = vmul.f32 %v13606_v16, %v11843_v33  ;;  %v5757_v39 = vmul.f32 %v13606_v16, %v11881_v58 }
 0x536   : > { %v12126_v55 = vpop.permute.xlu0 %4326  ;;  %v12146_v37 = vpop.permute.xlu1 %4100  ;;  %v5830_v16 = vrot.slane %v5756_v18, 2  ;;  %v5842_v18 = vrot.slane %v5764_v21, 2  ;;  %v13612_v21 = vld [vmem:[#allocation147_spill] sm:$0xff] }
 0x537   : > { %5242 = vrot.lane.b32.xlu0 %v5197_v59, %s10390_s13  ;;  %v5767_v59 = vmul.f32 %v13607_v56, %v11914_v34 }
 0x538   : > { %6897 = vperm.xlu1 %10051, %v9355_v49   ;;  %v5831_v49 = vrot.slane %v5757_v39, 2  ;;  %v5843_v39 = vrot.slane %v5765_v61, 2  ;;  %v6078_v61 = vmul.f32 %v13612_v21, %v11860_v42  ;;  %v9367_v42 = vld [vmem:[%s13615_s12 + $0x2] ss:$0 sm:$0xff] }
 0x539   : > { %v5846_v56 = vrot.slane %v5767_v59, 2 }
 0x53a   : > { %v12140_v43 = vpop.permute.xlu0 %4926  ;;  %v5832_v45 = vsel %vm1371_vm6, %v5830_v16, %v5831_v49  ;;  %v5844_v32 = vsel %vm1371_vm6, %v5842_v18, %v5843_v39  ;;  %v9305_v16 = vld [vmem:[#allocation12 + $0x4] ss:$0 sm:$0xff]  ;;  %v9371_v39 = vld [vmem:[%s13614_s27 + $0x6] ss:$0 sm:$0xff] }
 0x53b   : > { %5250 = vrot.lane.b32.xlu0 %v5209_v17, %s10390_s13  ;;  %v12160_v17 = vpop.permute.xlu1 %4332 }
 0x53c   : > { %5248 = vrot.lane.b32.xlu1 %v5206_v51, %s10390_s13  ;;  %13609 = vst [vmem:[#allocation92_spill] sm:$0xff] %v12160_v17  ;;  %v5847_v51 = vsel %vm1371_vm6, %v5845_v0, %v5846_v56  ;;  %v13613_v0 = vld [vmem:[#allocation146_spill] sm:$0xff] }
 0x53d   : > { %v6076_v56 = vmul.f32 %v13613_v0, %v11843_v33  ;;  %v6077_v18 = vmul.f32 %v13613_v0, %v11881_v58  ;;  %v13617_v33 = vld [vmem:[#allocation149_spill] sm:$0xff] }
 0x53e   : > { %v12154_v30 = vpop.permute.xlu0 %4934  ;;  %v6087_v58 = vmul.f32 %v13617_v33, %v11914_v34 }
 0x53f   : > { %5870 = vrot.lane.b32.xlu0 %v5835_v13, %s10389_s21  ;;  %v12170_v59 = vpop.permute.xlu1 %4340  ;;  %v6079_v13 = vmul.f32 %v13612_v21, %v11892_v60  ;;  %v6153_v60 = vrot.slane %v6078_v61, 2  ;;  %v13618_v21 = vld [vmem:[#allocation148_spill] sm:$0xff]  ;;  %v12203_v61 = vld [vmem:[%s13619_s23] sm:$0xff] }
 0x540   : > { %5868 = vrot.lane.b32.xlu1 %v5832_v45, %s10389_s21  ;;  %v9306_v45 = vld [vmem:[#allocation12 + $0x5] ss:$0 sm:$0xff]  ;;  %v6084_v0 = vmul.f32 %v13618_v21, %v11863_v14  ;;  %v6085_v11 = vmul.f32 %v13618_v21, %v11895_v40  ;;  %13620 = vst [vmem:[#allocation125_spill] sm:$0xff] %v12203_v61  ;;  %9714 = vmatpush3.msra.mxu0 %v12203_v61  ;;  %v13622_v14 = vmov 0.0  }
 0x541   : > { %9719 = vmatpush3.msra.mxu1 %v12203_v61  ;;  %9723 = vmatprep.subr.mxu0 %v13622_v14 }
 0x542   : > { %v12162_v1 = vpop.permute.xlu0 %4094  ;;  %9728 = vmatprep.subr.mxu1 %v13622_v14  ;;  %v12298_v14 = vld [vmem:[#allocation3 + $0x40] sm:$0xff] }
 0x543   : > { %13610 = vst [vmem:[#allocation141_spill] sm:$0xff] %v12162_v1  ;;  %5878 = vrot.lane.b32.xlu0 %v5847_v51, %s10389_s21  ;;  %v12185_v51 = vpop.permute.xlu1 %4940  ;;  %13645 = vst [vmem:[#allocation169_spill] sm:$0xff] %v12298_v14 }
 0x544   : > { %5876 = vrot.lane.b32.xlu1 %v5844_v32, %s10389_s21  ;;  %13616 = vst [vmem:[#allocation153_spill] sm:$0xff] %v12185_v51 }
 0x546   : > { %v12168_v12 = vpop.permute.xlu0 %4102 }
 0x547   : > { %6333 = vperm.xlu0 %10050, %v9302_v27   ;;  %v6154_v27 = vrot.slane %v6079_v13, 2  ;;  %v12212_v40 = vpop.permute.xlu1 %4948 }
 0x548   : > { %6329 = vperm.xlu1 %10051, %v9301_v5   ;;  %v6086_v5 = vmul.f32 %v13617_v33, %v11873_v25  ;;  %13623 = vst [vmem:[#allocation124_spill] sm:$0xff] %v12212_v40 }
 0x549   : > { %v6155_v34 = vsel %vm1371_vm6, %v6153_v60, %v6154_v27 }
 0x54a   : > { %v12172_v49 = vpop.permute.xlu0 %4334  ;;  %v6165_v13 = vrot.slane %v6086_v5, 2 }
 0x54b   : > { %13611 = vst [vmem:[#allocation121_spill] sm:$0xff] %v12172_v49  ;;  %6349 = vperm.xlu0 %10050, %v9306_v45   ;;  %v6150_v45 = vrot.slane %v6076_v56, 2  ;;  %v6166_v56 = vrot.slane %v6087_v58, 2  ;;  %v9321_v58 = vld [vmem:[#allocation14 + $0x8] ss:$0 sm:$0xff] }
 0x54c   : > { %6345 = vperm.xlu1 %10051, %v9305_v16   ;;  %v6151_v16 = vrot.slane %v6077_v18, 2 }
 0x54d   : > { %v6167_v60 = vsel %vm1371_vm6, %v6165_v13, %v6166_v56 }
 0x54e   : > { %v12190_v32 = vpop.permute.xlu0 %4342  ;;  %v6152_v18 = vsel %vm1371_vm6, %v6150_v45, %v6151_v16  ;;  %v9317_v45 = vld [vmem:[#allocation14] ss:$0 sm:$0xff] }
 0x54f   : > { %7073 = vperm.xlu0 %10050, %v9371_v39   ;;  %v6162_v39 = vrot.slane %v6084_v0, 2  ;;  %v9333_v0 = vld [vmem:[#allocation14 + $0x1] ss:$0 sm:$0xff] }
 0x550   : > { %7057 = vperm.xlu1 %10051, %v9367_v42   ;;  %v6163_v42 = vrot.slane %v6085_v11, 2  ;;  %v9337_v11 = vld [vmem:[#allocation14 + $0x9] ss:$0 sm:$0xff] }
 0x552   : > { %v12207_v25 = vpop.permute.xlu0 %4942  ;;  %v6164_v5 = vsel %vm1371_vm6, %v6162_v39, %v6163_v42  ;;  %v13629_v42 = vld [vmem:[#allocation129_spill] sm:$0xff] }
 0x553   : > { %13621 = vst [vmem:[#allocation154_spill] sm:$0xff] %v12207_v25  ;;  %6190 = vrot.lane.b32.xlu0 %v6155_v34, %s10390_s13  ;;  %v13626_v34 = vld [vmem:[#allocation128_spill] sm:$0xff] }
 0x554   : > { %6188 = vrot.lane.b32.xlu1 %v6152_v18, %s10390_s13  ;;  %v5146_v13 = vmul.f32 %v13626_v34, %v11700_v15  ;;  %v5147_v56 = vmul.f32 %v13626_v34, %v11722_v29  ;;  %v9359_v15 = vld [vmem:[%s13599_s14 + $0xa] ss:$0 sm:$0xff]  ;;  %v13630_v34 = vld [vmem:[#allocation133_spill] sm:$0xff] }
 0x556   : > { %v12217_v33 = vpop.permute.xlu0 %4950  ;;  %v5219_v29 = vrot.slane %v5146_v13, 1 }
 0x557   : > { %13624 = vst [vmem:[#allocation143_spill] sm:$0xff] %v12217_v33  ;;  %v12220_v27 = vpop.permute.xlu1 %5397  ;;  %6198 = vrot.lane.b32.xlu0 %v6167_v60, %s10390_s13  ;;  %v5144_v60 = vmul.f32 %v13629_v42, %v11704_v10  ;;  %v5153_v10 = vmul.f32 %v13630_v34, %v11743_v53  ;;  %v13635_v53 = vld [vmem:[#allocation150_spill] sm:$0xff] }
 0x558   : > { %6196 = vrot.lane.b32.xlu1 %v6164_v5, %s10390_s13  ;;  %v5145_v5 = vmul.f32 %v13629_v42, %v11725_v20  ;;  %v13632_v20 = vld [vmem:[#allocation132_spill] sm:$0xff] }
 0x559   : > { %v5155_v42 = vmul.f32 %v13632_v20, %v11736_v6  ;;  %v5216_v51 = vrot.slane %v5144_v60, 1  ;;  %v12266_v6 = vld [vmem:[#allocation3 + $0x10] sm:$0xff] }
 0x55a   : > { %v12225_v16 = vpop.permute.xlu0 %5425  ;;  %v5217_v13 = vrot.slane %v5145_v5, 1  ;;  %13637 = vst [vmem:[#allocation128_spill] sm:$0xff] %v12266_v6  ;;  %v12270_v5 = vld [vmem:[#allocation3 + $0x18] sm:$0x3] }
 0x55b   : > { %13625 = vst [vmem:[#allocation142_spill] sm:$0xff] %v12225_v16  ;;  %v12227_v21 = vpop.permute.xlu1 %5413  ;;  %6537 = vperm.xlu0 %10050, %v9321_v58   ;;  %v9363_v58 = vld [vmem:[%s13599_s14 + $0xe] ss:$0 sm:$0xff]  ;;  %v12260_v16 = vld [vmem:[#allocation3] sm:$0xff]  ;;  %v5232_v49 = vrot.slane %v5155_v42, 1  ;;  %13639 = vst [vmem:[#allocation129_spill] sm:$0xff] %v12270_v5 }
 0x55c   : > { %6521 = vperm.xlu1 %10051, %v9317_v45   ;;  %v5220_v45 = vrot.slane %v5147_v56, 1  ;;  %13634 = vst [vmem:[#allocation149_spill] sm:$0xff] %v12260_v16  ;;  %v12287_v42 = vld [vmem:[#allocation3 + $0x58] sm:$0x3] }
 0x55e   : > { %v12233_v18 = vpop.permute.xlu0 %5441  ;;  %v5221_v56 = vsel %vm1050_vm3, %v5219_v29, %v5220_v45  ;;  %v5218_v29 = vsel %vm1050_vm3, %v5216_v51, %v5217_v13  ;;  %v12278_v45 = vld [vmem:[#allocation3 + $0x8] sm:$0x3]  ;;  %v4970_v51 = vadd.f32 %v12094_v44, %v12084_v48 }
 0x55f   : > { %13627 = vst [vmem:[#allocation145_spill] sm:$0xff] %v12233_v18  ;;  %v12235_v39 = vpop.permute.xlu1 %5429  ;;  %6697 = vperm.xlu0 %10050, %v9337_v11   ;;  %v5152_v11 = vmul.f32 %v13630_v34, %v11714_v35  ;;  %v5736_v34 = vmul.f32 %v12260_v16, %v13635_v53  ;;  %13641 = vst [vmem:[#allocation132_spill] sm:$0xff] %v12278_v45  ;;  %v12302_v48 = vld [vmem:[#allocation3 + $0x48] sm:$0x3] }
 0x560   : > { %13628 = vst [vmem:[#allocation144_spill] sm:$0xff] %v12235_v39  ;;  %6681 = vperm.xlu1 %10051, %v9333_v0   ;;  %v5154_v0 = vmul.f32 %v13632_v20, %v11711_v38  ;;  %v5229_v39 = vrot.slane %v5153_v10, 1  ;;  %v13638_v20 = vld [vmem:[#allocation151_spill] sm:$0xff]  ;;  %v12283_v10 = vld [vmem:[#allocation3 + $0x50] sm:$0xff] }
 0x561   : > { %v5228_v35 = vrot.slane %v5152_v11, 1  ;;  %v5738_v60 = vmul.f32 %v12266_v6, %v13638_v20  ;;  %v5737_v11 = vmul.f32 %v12278_v45, %v13635_v53  ;;  %13642 = vst [vmem:[#allocation150_spill] sm:$0xff] %v12283_v10  ;;  %13643 = vst [vmem:[#allocation151_spill] sm:$0xff] %v12287_v42  ;;  %v5800_v13 = vrot.slane %v5736_v34, 2 }
 0x562   : > { %v12251_v46 = vpop.permute.xlu0 %5385  ;;  %v5231_v38 = vrot.slane %v5154_v0, 1  ;;  %v5746_v0 = vmul.f32 %v12283_v10, %v11855_v26 }
 0x563   : > { %13631 = vst [vmem:[#allocation147_spill] sm:$0xff] %v12251_v46  ;;  %v12257_v25 = vpop.permute.xlu1 %5445  ;;  %6929 = vperm.xlu0 %10050, %v9363_v58   ;;  %v5739_v58 = vmul.f32 %v12270_v5, %v13638_v20  ;;  %v5747_v20 = vmul.f32 %v12287_v42, %v11855_v26  ;;  %v5801_v54 = vrot.slane %v5737_v11, 2  ;;  %v13646_v26 = vld [vmem:[#allocation152_spill] sm:$0xff] }
 0x564   : > { %13633 = vst [vmem:[#allocation146_spill] sm:$0xff] %v12257_v25  ;;  %6913 = vperm.xlu1 %10051, %v9359_v15   ;;  %v5233_v53 = vsel %vm1050_vm3, %v5231_v38, %v5232_v49  ;;  %v5744_v61 = vmul.f32 %v12298_v14, %v13646_v26  ;;  %13647 = vst [vmem:[#allocation152_spill] sm:$0xff] %v12302_v48  ;;  %v5745_v44 = vmul.f32 %v12302_v48, %v13646_v26 }
 0x566   : > { %v12264_v46 = vpop.permute.xlu0 %5401  ;;  %v5812_v11 = vrot.slane %v5744_v61, 2 }
 0x567   : > { %13636 = vst [vmem:[#allocation148_spill] sm:$0xff] %v12264_v46  ;;  %v12274_v15 = vpop.permute.xlu1 %5389  ;;  %5258 = vrot.lane.b32.xlu0 %v5221_v56, %s10390_s13  ;;  %v5230_v46 = vsel %vm1050_vm3, %v5228_v35, %v5229_v39  ;;  %v5815_v39 = vrot.slane %v5746_v0, 2  ;;  %v5816_v35 = vrot.slane %v5747_v20, 2 }
 0x568   : > { %13640 = vst [vmem:[#allocation133_spill] sm:$0xff] %v12274_v15  ;;  %5256 = vrot.lane.b32.xlu1 %v5218_v29, %s10390_s13  ;;  %v5803_v29 = vrot.slane %v5738_v60, 2  ;;  %v5804_v15 = vrot.slane %v5739_v58, 2  ;;  %v5802_v58 = vsel %vm1371_vm6, %v5800_v13, %v5801_v54  ;;  %v9309_v54 = vld [vmem:[#allocation12 + $0x8] ss:$0 sm:$0xff] }
 0x569   : > { %v9314_v13 = vld [vmem:[#allocation12 + $0xd] ss:$0 sm:$0xff] }
 0x56a   : > { %v5245_v56 = vpop.permute.xlu0 %5244  ;;  %v5805_v38 = vsel %vm1371_vm6, %v5803_v29, %v5804_v15  ;;  %v9310_v15 = vld [vmem:[#allocation12 + $0x9] ss:$0 sm:$0xff]  ;;  %v6059_v29 = vmul.f32 %v12270_v5, %v11878_v8 }
 0x56b   : > { %v12295_v17 = vpop.permute.xlu1 %5405  ;;  %v5290_v1 = vadd.f32 %v5245_v56, %v4970_v51  ;;  %5266 = vrot.lane.b32.xlu0 %v5233_v53, %s10390_s13  ;;  %v5813_v51 = vrot.slane %v5745_v44, 2  ;;  %v9313_v56 = vld [vmem:[#allocation12 + $0xc] ss:$0 sm:$0xff]  ;;  %v6058_v53 = vmul.f32 %v12266_v6, %v11878_v8  ;;  %v6056_v44 = vmul.f32 %v12260_v16, %v11804_v28  ;;  %v9375_v8 = vld [vmem:[%s13615_s12 + $0xa] ss:$0 sm:$0xff] }
 0x56c   : > { %13644 = vst [vmem:[#allocation168_spill] sm:$0xff] %v12295_v17  ;;  %5264 = vrot.lane.b32.xlu1 %v5230_v46, %s10390_s13  ;;  %v12406_v17 = vld [vmem:[#allocation3 + $0xd0] sm:$0xff] }
 0x56d   : > { %v12308_v49 = vadd.f32 %v11943_v2, %v5290_v1  ;;  %v5817_v2 = vsel %vm1371_vm6, %v5815_v39, %v5816_v35  ;;  %v5814_v0 = vsel %vm1371_vm6, %v5812_v11, %v5813_v51  ;;  %v6057_v39 = vmul.f32 %v12278_v45, %v11804_v28  ;;  %13660 = vst [vmem:[#allocation182_spill] sm:$0xff] %v12406_v17 }
 0x56e   : > { %v12310_v34 = vpop.permute.xlu0 %5252  ;;  %v6124_v11 = vrot.slane %v6059_v29, 2  ;;  %v6066_v51 = vmul.f32 %v12283_v10, %v11901_v52  ;;  %v6067_v28 = vmul.f32 %v12287_v42, %v11901_v52  ;;  %v5762_v16 = vmul.f32 %v12406_v17, %v11934_v4 }
 0x56f   : > { %v12313_v60 = vpop.permute.xlu1 %5246  ;;  %5850 = vrot.lane.b32.xlu0 %v5805_v38, %s10389_s21  ;;  %v9379_v38 = vld [vmem:[%s13615_s12 + $0xe] ss:$0 sm:$0xff] }
 0x570   : > { %5848 = vrot.lane.b32.xlu1 %v5802_v58, %s10389_s21  ;;  %v6123_v58 = vrot.slane %v6058_v53, 2  ;;  %v6135_v53 = vrot.slane %v6066_v51, 2  ;;  %v6136_v29 = vrot.slane %v6067_v28, 2  ;;  %v5839_v6 = vrot.slane %v5762_v16, 2 }
 0x572   : > { %v12318_v46 = vpop.permute.xlu0 %6337  ;;  %v6125_v52 = vsel %vm1371_vm6, %v6123_v58, %v6124_v11  ;;  %v9329_v58 = vld [vmem:[#allocation14 + $0x18] ss:$0 sm:$0xff]  ;;  %v9325_v11 = vld [vmem:[#allocation14 + $0x10] ss:$0 sm:$0xff] }
 0x573   : > { %v12321_v1 = vpop.permute.xlu1 %5254  ;;  %5858 = vrot.lane.b32.xlu0 %v5817_v2, %s10389_s21 }
 0x574   : > { %5856 = vrot.lane.b32.xlu1 %v5814_v0, %s10389_s21  ;;  %v6120_v0 = vrot.slane %v6056_v44, 2 }
 0x576   : > { %v12326_v20 = vpop.permute.xlu0 %6353 }
 0x577   : > { %v12328_v61 = vpop.permute.xlu1 %6341  ;;  %6365 = vperm.xlu0 %10050, %v9310_v15   ;;  %v6121_v15 = vrot.slane %v6057_v39, 2 }
 0x578   : > { %6361 = vperm.xlu1 %10051, %v9309_v54   ;;  %v6064_v54 = vmul.f32 %v12298_v14, %v11831_v7 }
 0x579   : > { %v6122_v39 = vsel %vm1371_vm6, %v6120_v0, %v6121_v15  ;;  %v9345_v15 = vld [vmem:[#allocation14 + $0x19] ss:$0 sm:$0xff] }
 0x57a   : > { %v12334_v26 = vpop.permute.xlu0 %5417  ;;  %v6132_v45 = vrot.slane %v6064_v54, 2  ;;  %v9341_v54 = vld [vmem:[#allocation14 + $0x11] ss:$0 sm:$0xff] }
 0x57b   : > { %13648 = vst [vmem:[#allocation170_spill] sm:$0xff] %v12334_v26  ;;  %v12340_v35 = vpop.permute.xlu1 %6357  ;;  %6381 = vperm.xlu0 %10050, %v9314_v13   ;;  %v6065_v13 = vmul.f32 %v12302_v48, %v11831_v7  ;;  %v12416_v48 = vld [vmem:[#allocation3 + $0xc0] sm:$0xff] }
 0x57c   : > { %6377 = vperm.xlu1 %10051, %v9313_v56   ;;  %13662 = vst [vmem:[#allocation184_spill] sm:$0xff] %v12416_v48 }
 0x57e   : > { %v12352_v2 = vpop.permute.xlu0 %5433 }
 0x57f   : > { %13649 = vst [vmem:[#allocation171_spill] sm:$0xff] %v12352_v2  ;;  %v12358_v56 = vpop.permute.xlu1 %5421  ;;  %7105 = vperm.xlu0 %10050, %v9379_v38   ;;  %v6133_v2 = vrot.slane %v6065_v13, 2  ;;  %v6137_v38 = vsel %vm1371_vm6, %v6135_v53, %v6136_v29  ;;  %v12380_v13 = vld [vmem:[#allocation3 + $0x90] sm:$0xff] }
 0x580   : > { %13650 = vst [vmem:[#allocation172_spill] sm:$0xff] %v12358_v56  ;;  %7089 = vperm.xlu1 %10051, %v9375_v8   ;;  %13654 = vst [vmem:[#allocation176_spill] sm:$0xff] %v12380_v13  ;;  %v5754_v53 = vmul.f32 %v12380_v13, %v11927_v47 }
 0x581   : > { %v6134_v51 = vsel %vm1371_vm6, %v6132_v45, %v6133_v2  ;;  %v12384_v45 = vld [vmem:[#allocation3 + $0x98] sm:$0x3] }
 0x582   : > { %v12360_v26 = vpop.permute.xlu0 %6529  ;;  %13655 = vst [vmem:[#allocation177_spill] sm:$0xff] %v12384_v45  ;;  %v5755_v2 = vmul.f32 %v12384_v45, %v11927_v47  ;;  %v9353_v47 = vld [vmem:[%s13599_s14 + $0x4] ss:$0 sm:$0xff]  ;;  %v6075_v16 = vmul.f32 %v12384_v45, %v11940_v63 }
 0x583   : > { %13651 = vst [vmem:[#allocation173_spill] sm:$0xff] %v12360_v26  ;;  %v12363_v44 = vpop.permute.xlu1 %5437  ;;  %6170 = vrot.lane.b32.xlu0 %v6125_v52, %s10390_s13  ;;  %v12390_v52 = vld [vmem:[#allocation3 + $0x80] sm:$0xff] }
 0x584   : > { %13652 = vst [vmem:[#allocation174_spill] sm:$0xff] %v12363_v44  ;;  %6168 = vrot.lane.b32.xlu1 %v6122_v39, %s10390_s13  ;;  %13657 = vst [vmem:[#allocation179_spill] sm:$0xff] %v12390_v52  ;;  %v5752_v39 = vmul.f32 %v12390_v52, %v11853_v57  ;;  %v5827_v44 = vrot.slane %v5754_v53, 2  ;;  %v5828_v56 = vrot.slane %v5755_v2, 2  ;;  %v5760_v53 = vmul.f32 %v12416_v48, %v11875_v9  ;;  %v12420_v2 = vld [vmem:[#allocation3 + $0xc8] sm:$0x3] }
 0x585   : > { %13663 = vst [vmem:[#allocation185_spill] sm:$0xff] %v12420_v2  ;;  %v5761_v14 = vmul.f32 %v12420_v2, %v11875_v9  ;;  %v6074_v9 = vmul.f32 %v12380_v13, %v11940_v63  ;;  %v9369_v63 = vld [vmem:[%s13615_s12 + $0x4] ss:$0 sm:$0xff] }
 0x586   : > { %v12368_v7 = vpop.permute.xlu0 %6689  ;;  %v5824_v42 = vrot.slane %v5752_v39, 2  ;;  %v5829_v39 = vsel %vm1371_vm6, %v5827_v44, %v5828_v56  ;;  %v10072_v13 = vld [vmem:[#allocation3 + $0x60] sm:$0xff] }
 0x587   : > { %v12371_v8 = vpop.permute.xlu1 %6545  ;;  %6178 = vrot.lane.b32.xlu0 %v6137_v38, %s10390_s13  ;;  %v12394_v38 = vld [vmem:[#allocation3 + $0x88] sm:$0x3]  ;;  %v6147_v44 = vrot.slane %v6074_v9, 2 }
 0x588   : > { %6176 = vrot.lane.b32.xlu1 %v6134_v51, %s10390_s13  ;;  %13658 = vst [vmem:[#allocation180_spill] sm:$0xff] %v12394_v38  ;;  %v5753_v51 = vmul.f32 %v12394_v38, %v11853_v57  ;;  %v12410_v57 = vld [vmem:[#allocation3 + $0xd8] sm:$0x3] }
 0x589   : > { %13661 = vst [vmem:[#allocation183_spill] sm:$0xff] %v12410_v57 }
 0x58a   : > { %v12376_v28 = vpop.permute.xlu0 %5260  ;;  %v5825_v10 = vrot.slane %v5753_v51, 2  ;;  %v5836_v51 = vrot.slane %v5760_v53, 2 }
 0x58b   : > { %13653 = vst [vmem:[#allocation175_spill] sm:$0xff] %v12376_v28  ;;  %v12378_v0 = vpop.permute.xlu1 %6705  ;;  %6569 = vperm.xlu0 %10050, %v9329_v58   ;;  %v5837_v28 = vrot.slane %v5761_v14, 2  ;;  %v6072_v14 = vmul.f32 %v12390_v52, %v11897_v31 }
 0x58c   : > { %6553 = vperm.xlu1 %10051, %v9325_v11   ;;  %v9349_v11 = vld [vmem:[%s13599_s14] ss:$0 sm:$0xff]  ;;  %v5826_v33 = vsel %vm1371_vm6, %v5824_v42, %v5825_v10  ;;  %v6073_v10 = vmul.f32 %v12394_v38, %v11897_v31  ;;  %v6082_v31 = vmul.f32 %v12406_v17, %v11945_v24 }
 0x58d   : > { %v6144_v53 = vrot.slane %v6072_v14, 2  ;;  %v13674_v38 = vld [vmem:[#allocation111_spill] sm:$0xff] }
 0x58e   : > { %v12388_v29 = vpop.permute.xlu0 %5268  ;;  %v6159_v9 = vrot.slane %v6082_v31, 2  ;;  %v4532_v52 = vmul.f32 %v10072_v13, %v13674_v38 }
 0x58f   : > { %13656 = vst [vmem:[#allocation178_spill] sm:$0xff] %v12388_v29  ;;  %v12398_v58 = vpop.permute.xlu1 %5262  ;;  %6729 = vperm.xlu0 %10050, %v9345_v15   ;;  %v5763_v15 = vmul.f32 %v12410_v57, %v11934_v4 }
 0x590   : > { %13659 = vst [vmem:[#allocation181_spill] sm:$0xff] %v12398_v58  ;;  %6713 = vperm.xlu1 %10051, %v9341_v54  }
 0x591   : > { %v5840_v4 = vrot.slane %v5763_v15, 2 }
 0x592   : > { %v12414_v54 = vpop.permute.xlu0 %5852 }
 0x593   : > { %v12424_v5 = vpop.permute.xlu1 %5270  ;;  %6889 = vperm.xlu0 %10050, %v9353_v47   ;;  %v5841_v56 = vsel %vm1371_vm6, %v5839_v6, %v5840_v4  ;;  %v9365_v6 = vld [vmem:[%s13615_s12] ss:$0 sm:$0xff]  ;;  %v6145_v4 = vrot.slane %v6073_v10, 2 }
 0x594   : > { %13664 = vst [vmem:[#allocation186_spill] sm:$0xff] %v12424_v5  ;;  %6873 = vperm.xlu1 %10051, %v9349_v11   ;;  %v6148_v11 = vrot.slane %v6075_v16, 2 }
 0x595   : > { %v6146_v10 = vsel %vm1371_vm6, %v6144_v53, %v6145_v4  ;;  %v13669_v53 = vld [vmem:[#allocation112_spill] sm:$0xff] }
 0x596   : > { %v12426_v58 = vpop.permute.xlu0 %5860 }
 0x597   : > { %v12429_v29 = vpop.permute.xlu1 %5854  ;;  %5866 = vrot.lane.b32.xlu0 %v5829_v39, %s10389_s21  ;;  %v6080_v39 = vmul.f32 %v12416_v48, %v11923_v23 }
 0x598   : > { %5864 = vrot.lane.b32.xlu1 %v5826_v33, %s10389_s21  ;;  %v5838_v33 = vsel %vm1371_vm6, %v5836_v51, %v5837_v28  ;;  %v6083_v28 = vmul.f32 %v12410_v57, %v11945_v24  ;;  %v6081_v51 = vmul.f32 %v12420_v2, %v11923_v23  ;;  %v6149_v24 = vsel %vm1371_vm6, %v6147_v44, %v6148_v11  ;;  %v9324_v44 = vld [vmem:[#allocation14 + $0xe] ss:$0 sm:$0xff]  ;;  %v9320_v11 = vld [vmem:[#allocation14 + $0x6] ss:$0 sm:$0xff]  ;;  %v13672_v2 = vld [vmem:[#allocation108_spill] sm:$0xff] }
 0x599   : > { %v6156_v57 = vrot.slane %v6080_v39, 2  ;;  %v10069_v39 = vld [vmem:[#allocation3 + $0x78] sm:$0x3] }
 0x59a   : > { %v12438_v47 = vpop.permute.xlu0 %6369  ;;  %v6160_v16 = vrot.slane %v6083_v28, 2  ;;  %v6157_v17 = vrot.slane %v6081_v51, 2  ;;  %v10068_v28 = vld [vmem:[#allocation3 + $0x70] sm:$0xff]  ;;  %v4535_v51 = vmul.f32 %v10069_v39, %v13669_v53 }
 0x59b   : > { %13665 = vst [vmem:[#allocation187_spill] sm:$0xff] %v12438_v47  ;;  %v12445_v42 = vpop.permute.xlu1 %5862  ;;  %5874 = vrot.lane.b32.xlu0 %v5841_v56, %s10389_s21  ;;  %v4534_v4 = vmul.f32 %v10068_v28, %v13669_v53 }
 0x59c   : > { %5872 = vrot.lane.b32.xlu1 %v5838_v33, %s10389_s21  ;;  %v6158_v31 = vsel %vm1371_vm6, %v6156_v57, %v6157_v17  ;;  %v10071_v17 = vld [vmem:[#allocation3 + $0x38] sm:$0x3]  ;;  %v4606_v40 = vrot.slane %v4535_v51, 1  ;;  %v5460_v51 = vmul.f32 %v10072_v13, %v12088_v22 }
 0x59d   : > { %v4527_v57 = vmul.f32 %v10071_v17, %v13672_v2  ;;  %v4605_v5 = vrot.slane %v4534_v4, 1  ;;  %v5455_v4 = vmul.f32 %v10071_v17, %v12220_v27 }
 0x59e   : > { %v12460_v15 = vpop.permute.xlu0 %6385 }
 0x59f   : > { %13666 = vst [vmem:[#allocation188_spill] sm:$0xff] %v12460_v15  ;;  %v12466_v56 = vpop.permute.xlu1 %6373  ;;  %7065 = vperm.xlu0 %10050, %v9369_v63   ;;  %v6161_v63 = vsel %vm1371_vm6, %v6159_v9, %v6160_v16  ;;  %v10070_v16 = vld [vmem:[#allocation3 + $0x30] sm:$0xff]  ;;  %v4594_v25 = vrot.slane %v4527_v57, 1 }
 0x5a0   : > { %13667 = vst [vmem:[#allocation189_spill] sm:$0xff] %v12466_v56  ;;  %7049 = vperm.xlu1 %10051, %v9365_v6   ;;  %v4526_v48 = vmul.f32 %v10070_v16, %v13672_v2  ;;  %v10073_v56 = vld [vmem:[#allocation3 + $0x68] sm:$0x3] }
 0x5a1   : > { %v4533_v53 = vmul.f32 %v10073_v56, %v13674_v38 }
 0x5a2   : > { %v12468_v33 = vpop.permute.xlu0 %6172  ;;  %v4593_v26 = vrot.slane %v4526_v48, 1  ;;  %v5462_v48 = vmul.f32 %v10068_v28, %v12227_v21 }
 0x5a3   : > { %v12471_v14 = vpop.permute.xlu1 %6389  ;;  %6186 = vrot.lane.b32.xlu0 %v6149_v24, %s10390_s13 }
 0x5a4   : > { %13668 = vst [vmem:[#allocation190_spill] sm:$0xff] %v12471_v14  ;;  %6184 = vrot.lane.b32.xlu1 %v6146_v10, %s10390_s13  ;;  %v13671_v10 = vld [vmem:[#allocation97_spill] sm:$0xff] }
 0x5a5   : > { %v3887_v9 = vmul.f32 %v10068_v28, %v13671_v10  ;;  %v13675_v10 = vld [vmem:[#allocation96_spill] sm:$0xff]  ;;  %v9336_v14 = vld [vmem:[#allocation14 + $0x7] ss:$0 sm:$0xff] }
 0x5a6   : > { %v12476_v23 = vpop.permute.xlu0 %6180  ;;  %v3886_v47 = vmul.f32 %v10072_v13, %v13675_v10  ;;  %v4603_v10 = vrot.slane %v4533_v53, 1  ;;  %v5533_v13 = vrot.slane %v5462_v48, 2 }
 0x5a7   : > { %v12479_v6 = vpop.permute.xlu1 %6174  ;;  %6194 = vrot.lane.b32.xlu0 %v6161_v63, %s10390_s13  ;;  %v4127_v15 = vadd.f32 %v12100_v41, %v3887_v9  ;;  %v5522_v9 = vrot.slane %v5455_v4, 2  ;;  %v10074_v4 = vld [vmem:[#allocation3 + $0xe0] sm:$0xff] }
 0x5a8   : > { %6192 = vrot.lane.b32.xlu1 %v6158_v31, %s10390_s13  ;;  %v13673_v31 = vld [vmem:[#allocation93_spill] sm:$0xff]  ;;  %s13788_s13 = sld [smem:[#allocation198_spill]] }
 0x5a9   : > { %v3883_v45 = vmul.f32 %v10070_v16, %v13673_v31  ;;  %v4126_v31 = vadd.f32 %v12063_v36, %v3886_v47  ;;  %v4367_v18 = vadd.f32 %v12126_v55, %v4127_v15  ;;  %v9357_v36 = vld [vmem:[%s13599_s14 + $0x8] ss:$0 sm:$0xff]  ;;  %v4607_v55 = vsel %vm1050_vm3, %v4605_v5, %v4606_v40 }
 0x5aa   : > { %v12486_v24 = vpop.permute.xlu0 %6561  ;;  %v5461_v40 = vmul.f32 %v10073_v56, %v12088_v22 }
 0x5ab   : > { %13670 = vst [vmem:[#allocation112_spill] sm:$0xff] %v12486_v24  ;;  %v12491_v63 = vpop.permute.xlu1 %6182  ;;  %6549 = vperm.xlu0 %10050, %v9324_v44   ;;  %v9340_v24 = vld [vmem:[#allocation14 + $0xf] ss:$0 sm:$0xff]  ;;  %v4123_v2 = vadd.f32 %v12096_v3, %v3883_v45  ;;  %v9361_v3 = vld [vmem:[%s13599_s14 + $0xc] ss:$0 sm:$0xff]  ;;  %v4366_v45 = vadd.f32 %v12086_v62, %v4126_v31  ;;  %v4655_v15 = vadd.f32 %v4607_v55, %v4367_v18 }
 0x5ac   : > { %6533 = vperm.xlu1 %10051, %v9320_v11   ;;  %v4602_v11 = vrot.slane %v4532_v52, 1  ;;  %v5463_v52 = vmul.f32 %v10069_v39, %v12227_v21  ;;  %v5531_v57 = vrot.slane %v5461_v40, 2  ;;  %v9328_v31 = vld [vmem:[#allocation14 + $0x16] ss:$0 sm:$0xff] }
 0x5ad   : > { %v4363_v41 = vadd.f32 %v12119_v19, %v4123_v2  ;;  %v4595_v19 = vsel %vm1050_vm3, %v4593_v26, %v4594_v25  ;;  %v9377_v25 = vld [vmem:[%s13615_s12 + $0xc] ss:$0 sm:$0xff]  ;;  %v4975_v18 = vadd.f32 %v12154_v30, %v4655_v15  ;;  %v5530_v30 = vrot.slane %v5460_v51, 2  ;;  %v9332_v2 = vld [vmem:[#allocation14 + $0x1e] ss:$0 sm:$0xff] }
 0x5ae   : > { %v12499_v44 = vpop.permute.xlu0 %6721  ;;  %v4604_v5 = vsel %vm1050_vm3, %v4602_v11, %v4603_v10  ;;  %v5534_v39 = vrot.slane %v5463_v52, 2  ;;  %v13676_v51 = vld [vmem:[#allocation120_spill] sm:$0xff] }
 0x5af   : > { %v12503_v38 = vpop.permute.xlu1 %6577  ;;  %6709 = vperm.xlu0 %10050, %v9340_v24   ;;  %v4651_v28 = vadd.f32 %v4595_v19, %v4363_v41  ;;  %v4654_v21 = vadd.f32 %v4604_v5, %v4366_v45  ;;  %v5532_v45 = vsel %vm1371_vm6, %v5530_v30, %v5531_v57  ;;  %v4548_v40 = vmul.f32 %v10074_v4, %v13676_v51  ;;  %v10075_v5 = vld [vmem:[#allocation3 + $0xe8] sm:$0x3] }
 0x5b0   : > { %6693 = vperm.xlu1 %10051, %v9336_v14   ;;  %v5454_v14 = vmul.f32 %v10070_v16, %v12220_v27  ;;  %v9373_v27 = vld [vmem:[%s13615_s12 + $0x8] ss:$0 sm:$0xff]  ;;  %v5295_v16 = vadd.f32 %v12321_v1, %v4975_v18  ;;  %v5535_v11 = vsel %vm1371_vm6, %v5533_v13, %v5534_v39  ;;  %v10077_v18 = vld [vmem:[#allocation3 + $0xf8] sm:$0x3]  ;;  %v9352_v13 = vld [vmem:[%s13599_s14 + $0x3] ss:$0 sm:$0xff] }
 0x5b1   : > { %v4971_v26 = vadd.f32 %v12140_v43, %v4651_v28  ;;  %v4974_v56 = vadd.f32 %v12106_v50, %v4654_v21  ;;  %v4549_v28 = vmul.f32 %v10075_v5, %v13676_v51  ;;  %v4626_v30 = vrot.slane %v4548_v40, 1  ;;  %v13685_v51 = vld [vmem:[#allocation145_spill] sm:$0xff] }
 0x5b2   : > { %v12516_v47 = vpop.permute.xlu0 %6881  ;;  %v5521_v24 = vrot.slane %v5454_v14, 2  ;;  %v5583_v41 = vadd.f32 %v5535_v11, %v5295_v16  ;;  %v5476_v40 = vmul.f32 %v10074_v4, %v13685_v51 }
 0x5b3   : > { %v12521_v62 = vpop.permute.xlu1 %6737  ;;  %6921 = vperm.xlu0 %10050, %v9361_v3   ;;  %v5291_v53 = vadd.f32 %v12313_v60, %v4971_v26  ;;  %v5294_v43 = vadd.f32 %v12310_v34, %v4974_v56  ;;  %v9348_v60 = vld [vmem:[#allocation14 + $0x1f] ss:$0 sm:$0xff]  ;;  %v9344_v34 = vld [vmem:[#allocation14 + $0x17] ss:$0 sm:$0xff]  ;;  %v13679_v56 = vld [vmem:[#allocation105_spill] sm:$0xff]  ;;  %v4627_v57 = vrot.slane %v4549_v28, 1  ;;  %v5477_v28 = vmul.f32 %v10075_v5, %v13685_v51 }
 0x5b4   : > { %6905 = vperm.xlu1 %10051, %v9357_v36   ;;  %v5523_v50 = vsel %vm1371_vm6, %v5521_v24, %v5522_v9  ;;  %v5903_v55 = vadd.f32 %v12445_v42, %v5583_v41  ;;  %v5898_v42 = vadd.f32 %v12414_v54, %v12308_v49  ;;  %v13678_v49 = vld [vmem:[#allocation104_spill] sm:$0xff]  ;;  %v5554_v5 = vrot.slane %v5476_v40, 2 }
 0x5b5   : > { %v5579_v3 = vadd.f32 %v5523_v50, %v5291_v53  ;;  %v5582_v36 = vadd.f32 %v5532_v45, %v5294_v43  ;;  %v3894_v54 = vmul.f32 %v10074_v4, %v13678_v49  ;;  %v9322_v45 = vld [vmem:[#allocation14 + $0xa] ss:$0 sm:$0xff]  ;;  %v10079_v51 = vld [vmem:[#allocation3 + $0xa8] sm:$0x3] }
 0x5b6   : > { %v12534_v22 = vpop.permute.xlu0 %5242  ;;  %v6223_v15 = vadd.f32 %v12491_v63, %v5903_v55  ;;  %v10076_v63 = vld [vmem:[#allocation3 + $0xf0] sm:$0xff]  ;;  %v13683_v55 = vld [vmem:[#allocation146_spill] sm:$0xff] }
 0x5b7   : > { %v12538_v17 = vpop.permute.xlu1 %6897  ;;  %7097 = vperm.xlu0 %10050, %v9377_v25   ;;  %v5899_v48 = vadd.f32 %v12429_v29, %v5579_v3  ;;  %v5902_v19 = vadd.f32 %v12426_v58, %v5582_v36  ;;  %v9356_v58 = vld [vmem:[%s13599_s14 + $0x7] ss:$0 sm:$0xff]  ;;  %v3895_v24 = vmul.f32 %v10076_v63, %v13679_v56  ;;  %v9318_v36 = vld [vmem:[#allocation14 + $0x2] ss:$0 sm:$0xff]  ;;  %v13688_v56 = vld [vmem:[#allocation186_spill] sm:$0xff] }
 0x5b8   : > { %7081 = vperm.xlu1 %10051, %v9373_v27   ;;  %v13677_v25 = vld [vmem:[#allocation119_spill] sm:$0xff]  ;;  %v12577_v9 = vadd.f32 %v12340_v35, %v6223_v15 }
 0x5b9   : > { %v6219_v29 = vadd.f32 %v12479_v6, %v5899_v48  ;;  %v4550_v21 = vmul.f32 %v10076_v63, %v13677_v25  ;;  %v4551_v27 = vmul.f32 %v10077_v18, %v13677_v25  ;;  %v6222_v26 = vadd.f32 %v12476_v23, %v5902_v19  ;;  %v13684_v48 = vld [vmem:[#allocation173_spill] sm:$0xff] }
 0x5ba   : > { %v12543_v10 = vpop.permute.xlu0 %5250  ;;  %v6218_v6 = vadd.f32 %v12468_v33, %v5898_v42  ;;  %v4134_v23 = vadd.f32 %v12146_v37, %v3894_v54  ;;  %v9372_v33 = vld [vmem:[%s13615_s12 + $0x7] ss:$0 sm:$0xff]  ;;  %v9368_v37 = vld [vmem:[%s13615_s12 + $0x3] ss:$0 sm:$0xff] }
 0x5bb   : > { %v12546_v1 = vpop.permute.xlu1 %5248  ;;  %6581 = vperm.xlu0 %10050, %v9332_v2   ;;  %v12583_v53 = vadd.f32 %v12328_v61, %v6219_v29  ;;  %v4135_v2 = vadd.f32 %v12168_v12, %v3895_v24  ;;  %v4629_v43 = vrot.slane %v4550_v21, 1  ;;  %v4630_v35 = vrot.slane %v4551_v27, 1  ;;  %v13687_v21 = vld [vmem:[#allocation143_spill] sm:$0xff] }
 0x5bc   : > { %6565 = vperm.xlu1 %10051, %v9328_v31   ;;  %v12590_v31 = vadd.f32 %v12326_v20, %v6222_v26  ;;  %v4374_v11 = vadd.f32 %v12170_v59, %v4134_v23  ;;  %v12597_v61 = vadd.f32 %v12318_v46, %v6218_v6  ;;  %v6750_v12 = vmul.f32 %v12378_v0, %v12577_v9  ;;  %v9334_v26 = vld [vmem:[#allocation14 + $0x3] ss:$0 sm:$0xff] }
 0x5bd   : > { %13680 = vst [vmem:[#allocation97_spill] sm:$0xff] %v12583_v53  ;;  %v4375_v41 = vadd.f32 %v12190_v32, %v4135_v2  ;;  %v6746_v20 = vmul.f32 %v12368_v7, %v12583_v53  ;;  %v4628_v59 = vsel %vm1050_vm3, %v4626_v30, %v4627_v57  ;;  %v4631_v46 = vsel %vm1050_vm3, %v4629_v43, %v4630_v35  ;;  %v13689_v57 = vld [vmem:[#allocation178_spill] sm:$0xff] }
 0x5be   : > { %v12551_v52 = vpop.permute.xlu0 %5870  ;;  %13681 = vst [vmem:[#allocation108_spill] sm:$0xff] %v12590_v31  ;;  %13682 = vst [vmem:[#allocation93_spill] sm:$0xff] %v12597_v61  ;;  %v4662_v32 = vadd.f32 %v4628_v59, %v4374_v11  ;;  %v5479_v0 = vmul.f32 %v10077_v18, %v13683_v55  ;;  %v6586_v19 = vmul.f32 %v13684_v48, %v12597_v61  ;;  %v5555_v6 = vrot.slane %v5477_v28, 2  ;;  %v10078_v48 = vld [vmem:[#allocation3 + $0xa0] sm:$0xff]  ;;  %v10080_v28 = vld [vmem:[#allocation3 + $0xb0] sm:$0xff] }
 0x5bf   : > { %v12555_v14 = vpop.permute.xlu1 %5868  ;;  %6741 = vperm.xlu0 %10050, %v9348_v60   ;;  %v6590_v60 = vmul.f32 %v12371_v8, %v12590_v31  ;;  %v4663_v7 = vadd.f32 %v4631_v46, %v4375_v41  ;;  %v13691_v59 = vmov 0.0   ;;  %v13768_v31 = vld [vmem:[#allocation165_spill] sm:$0xff] }
 0x5c0   : > { %6725 = vperm.xlu1 %10051, %v9344_v34   ;;  %v5478_v34 = vmul.f32 %v10076_v63, %v13683_v55  ;;  %v6762_v8 = vadd.f32 %v6746_v20, %v6586_v19  ;;  %v13686_v63 = vld [vmem:[#allocation124_spill] sm:$0xff]  ;;  %v5558_v49 = vrot.slane %v5479_v0, 2  ;;  %v5556_v11 = vsel %vm1371_vm6, %v5554_v5, %v5555_v6  ;;  %v13699_v5 = vld [vmem:[#allocation101_spill] sm:$0xff] }
 0x5c1   : > { %v6766_v42 = vadd.f32 %v6750_v12, %v6590_v60  ;;  %v4982_v25 = vadd.f32 %v13686_v63, %v4662_v32  ;;  %v4983_v18 = vadd.f32 %v13687_v21, %v4663_v7  ;;  %v9376_v60 = vld [vmem:[%s13615_s12 + $0xb] ss:$0 sm:$0xff]  ;;  %v9326_v63 = vld [vmem:[#allocation14 + $0x12] ss:$0 sm:$0xff]  ;;  %v3891_v6 = vmul.f32 %v10080_v28, %v13699_v5 }
 0x5c2   : > { %v12573_v39 = vpop.permute.xlu0 %5878  ;;  %v6938_v4 = vadd.f32 %v12516_v47, %v6762_v8  ;;  %v9360_v47 = vld [vmem:[%s13599_s14 + $0xb] ss:$0 sm:$0xff] }
 0x5c3   : > { %v12579_v16 = vpop.permute.xlu1 %5876  ;;  %6901 = vperm.xlu0 %10050, %v9356_v58   ;;  %v9338_v58 = vld [vmem:[#allocation14 + $0xb] ss:$0 sm:$0xff]  ;;  %v6942_v27 = vadd.f32 %v12538_v17, %v6766_v42  ;;  %v5303_v24 = vadd.f32 %v13688_v56, %v4983_v18  ;;  %v9364_v17 = vld [vmem:[%s13599_s14 + $0xf] ss:$0 sm:$0xff]  ;;  %v13693_v42 = vld [vmem:[#allocation115_spill] sm:$0xff] }
 0x5c4   : > { %6885 = vperm.xlu1 %10051, %v9352_v13   ;;  %v5557_v13 = vrot.slane %v5478_v34, 2  ;;  %v13692_v19 = vld [vmem:[#allocation116_spill] sm:$0xff]  ;;  %v4542_v8 = vmul.f32 %v10080_v28, %v13693_v42 }
 0x5c5   : > { %v4540_v7 = vmul.f32 %v10078_v48, %v13692_v19  ;;  %v4541_v40 = vmul.f32 %v10079_v51, %v13692_v19  ;;  %v13696_v18 = vld [vmem:[#allocation188_spill] sm:$0xff] }
 0x5c6   : > { %v12599_v50 = vpop.permute.xlu0 %6333  ;;  %v5559_v43 = vsel %vm1371_vm6, %v5557_v13, %v5558_v49  ;;  %v9346_v56 = vld [vmem:[#allocation14 + $0x1b] ss:$0 sm:$0xff] }
 0x5c7   : > { %v12604_v3 = vpop.permute.xlu1 %6329  ;;  %7077 = vperm.xlu0 %10050, %v9372_v33   ;;  %v5302_v33 = vadd.f32 %v13689_v57, %v4982_v25  ;;  %v5591_v41 = vadd.f32 %v5559_v43, %v5303_v24  ;;  %v10081_v25 = vld [vmem:[#allocation3 + $0xb8] sm:$0x3]  ;;  %v4617_v57 = vrot.slane %v4542_v8, 1 }
 0x5c8   : > { %7061 = vperm.xlu1 %10051, %v9368_v37   ;;  %v13690_v37 = vld [vmem:[#allocation125_spill] sm:$0xff]  ;;  %v4543_v21 = vmul.f32 %v10081_v25, %v13693_v42 }
 0x5c9   : > { %v5590_v20 = vadd.f32 %v5556_v11, %v5302_v33  ;;  %v5911_v46 = vadd.f32 %v12573_v39, %v5591_v41  ;;  %v9330_v39 = vld [vmem:[#allocation14 + $0x1a] ss:$0 sm:$0xff]  ;;  %v9342_v33 = vld [vmem:[#allocation14 + $0x13] ss:$0 sm:$0xff] }
 0x5ca   : > { %v12616_v15 = vpop.permute.xlu0 %6349 }
 0x5cb   : > { %v12620_v29 = vpop.permute.xlu1 %6345  ;;  %6541 = vperm.xlu0 %10050, %v9322_v45   ;;  %v9380_v45 = vld [vmem:[%s13615_s12 + $0xf] ss:$0 sm:$0xff] }
 0x5cc   : > { %6525 = vperm.xlu1 %10051, %v9318_v36   ;;  %v5910_v36 = vadd.f32 %v12579_v16, %v5590_v20  ;;  %v13702_v20 = vld [vmem:[#allocation92_spill] sm:$0xff] }
 0x5ce   : > { %v7074_v54 = vpop.permute.xlu0 %7073 }
 0x5cf   : > { %v7058_v23 = vpop.permute.xlu1 %7057  ;;  %v7118_v30 = vmul.f32 %v7074_v54, %v6942_v27  ;;  %6701 = vperm.xlu0 %10050, %v9338_v58   ;;  %v13694_v58 = vld [vmem:[#allocation190_spill] sm:$0xff] }
 0x5d0   : > { %v7114_v2 = vmul.f32 %v7058_v23, %v6938_v4  ;;  %6685 = vperm.xlu1 %10051, %v9334_v26   ;;  %v13698_v4 = vld [vmem:[#allocation100_spill] sm:$0xff]  ;;  %v4614_v23 = vrot.slane %v4540_v7, 1 }
 0x5d1   : > { %9721 = vmatmul.mubr.msk.f32.vlgmr.msra.gmra.mrb[24].mxu1 %vm7134_vm10, %v7118_v30  ;;  %v3890_v54 = vmul.f32 %v10078_v48, %v13698_v4  ;;  %v4615_v30 = vrot.slane %v4541_v40, 1  ;;  %v13705_v7 = vld [vmem:[#allocation144_spill] sm:$0xff] }
 0x5d2   : > { %9716 = vmatmul.mubr.msk.f32.vlgmr.msra.gmra.mrb[24].mxu0 %vm7134_vm10, %v7114_v2  ;;  %v12637_v35 = vpop.permute.xlu0 %6190  ;;  %9729 = vmatpush3.msra.mxu1 %v13690_v37  ;;  %v13700_v2 = vld [vmem:[#allocation140_spill] sm:$0xff]  ;;  %v5470_v40 = vmul.f32 %v10080_v28, %v13705_v7  ;;  %v5471_v42 = vmul.f32 %v10081_v25, %v13705_v7 }
 0x5d3   : > { %v12641_v12 = vpop.permute.xlu1 %6188  ;;  %6933 = vperm.xlu0 %10050, %v9364_v17   ;;  %9724 = vmatpush3.msra.mxu0 %v13690_v37  ;;  %v4130_v17 = vadd.f32 %v13700_v2, %v3890_v54  ;;  %v4618_v37 = vrot.slane %v4543_v21, 1  ;;  %v9370_v21 = vld [vmem:[%s13615_s12 + $0x5] ss:$0 sm:$0xff]  ;;  %v9358_v2 = vld [vmem:[%s13599_s14 + $0x9] ss:$0 sm:$0xff] }
 0x5d4   : > { %6917 = vperm.xlu1 %10051, %v9360_v47   ;;  %9725 = vmatprep.mubr.msk.f32.mxu0 %vm10392_vm5, %v13691_v59  ;;  %v13701_v47 = vld [vmem:[#allocation141_spill] sm:$0xff]  ;;  %v5545_v5 = vrot.slane %v5470_v40, 2  ;;  %v13713_v40 = vld [vmem:[#allocation91_spill] sm:$0xff] }
 0x5d5   : > { %9730 = vmatprep.mubr.msk.f32.mxu1 %vm10392_vm5, %v13691_v59  ;;  %9733 = vmatprep.subr.mxu0 %v13691_v59  ;;  %v4131_v43 = vadd.f32 %v13701_v47, %v3891_v6  ;;  %v5546_v6 = vrot.slane %v5471_v42, 2 }
 0x5d6   : > { %v6199_v32 = vpop.permute.xlu0 %6198  ;;  %9738 = vmatprep.subr.mxu1 %v13691_v59 }
 0x5d7   : > { %v6197_v55 = vpop.permute.xlu1 %6196  ;;  %v6231_v34 = vadd.f32 %v6199_v32, %v5911_v46  ;;  %7109 = vperm.xlu0 %10050, %v9380_v45   ;;  %v4370_v45 = vadd.f32 %v13702_v20, %v4130_v17  ;;  %v13703_v46 = vld [vmem:[#allocation121_spill] sm:$0xff]  ;;  %v4616_v32 = vsel %vm1050_vm3, %v4614_v23, %v4615_v30 }
 0x5d8   : > { %v6230_v0 = vadd.f32 %v6197_v55, %v5910_v36  ;;  %7093 = vperm.xlu1 %10051, %v9376_v60   ;;  %v9354_v60 = vld [vmem:[%s13599_s14 + $0x5] ss:$0 sm:$0xff]  ;;  %v9350_v36 = vld [vmem:[%s13599_s14 + $0x1] ss:$0 sm:$0xff]  ;;  %v4619_v55 = vsel %vm1050_vm3, %v4617_v57, %v4618_v37  ;;  %v13709_v30 = vld [vmem:[#allocation181_spill] sm:$0xff] }
 0x5d9   : > { %v12662_v16 = vadd.f32 %v13694_v58, %v6231_v34  ;;  %v4658_v58 = vadd.f32 %v4616_v32, %v4370_v45 }
 0x5da   : > { %v12666_v27 = vadd.f32 %v13696_v18, %v6230_v0  ;;  %v12668_v26 = vpop.permute.xlu0 %6537  ;;  %v13704_v0 = vld [vmem:[#allocation142_spill] sm:$0xff]  ;;  %v13706_v18 = vld [vmem:[#allocation153_spill] sm:$0xff] }
 0x5db   : > { %13695 = vst [vmem:[#allocation111_spill] sm:$0xff] %v12662_v16  ;;  %v12670_v13 = vpop.permute.xlu1 %6521  ;;  %6573 = vperm.xlu0 %10050, %v9330_v39   ;;  %v6758_v49 = vmul.f32 %v12521_v62, %v12662_v16  ;;  %v5468_v39 = vmul.f32 %v10078_v48, %v13704_v0  ;;  %v5469_v19 = vmul.f32 %v10079_v51, %v13704_v0  ;;  %v9366_v48 = vld [vmem:[%s13615_s12 + $0x1] ss:$0 sm:$0xff] }
 0x5dc   : > { %13697 = vst [vmem:[#allocation96_spill] sm:$0xff] %v12666_v27  ;;  %6557 = vperm.xlu1 %10051, %v9326_v63   ;;  %v6598_v24 = vmul.f32 %v12503_v38, %v12666_v27  ;;  %v4371_v38 = vadd.f32 %v13703_v46, %v4131_v43  ;;  %v4978_v51 = vadd.f32 %v13706_v18, %v4658_v58  ;;  %v9378_v46 = vld [vmem:[%s13615_s12 + $0xd] ss:$0 sm:$0xff] }
 0x5dd   : > { %v5542_v25 = vrot.slane %v5468_v39, 2  ;;  %v5543_v54 = vrot.slane %v5469_v19, 2  ;;  %v5547_v43 = vsel %vm1371_vm6, %v5545_v5, %v5546_v6  ;;  %v13716_v18 = vld [vmem:[#allocation152_spill] sm:$0xff]  ;;  %v13720_v6 = vld [vmem:[#allocation151_spill] sm:$0xff] }
 0x5de   : > { %v12680_v11 = vpop.permute.xlu0 %6697  ;;  %v12682_v62 = vadd.f32 %v6758_v49, %v6598_v24  ;;  %v4659_v63 = vadd.f32 %v4619_v55, %v4371_v38  ;;  %v13707_v49 = vld [vmem:[#allocation154_spill] sm:$0xff]  ;;  %v13708_v24 = vld [vmem:[#allocation175_spill] sm:$0xff]  ;;  %v9374_v38 = vld [vmem:[%s13615_s12 + $0x9] ss:$0 sm:$0xff] }
 0x5df   : > { %v12684_v41 = vpop.permute.xlu1 %6681  ;;  %6733 = vperm.xlu0 %10050, %v9346_v56   ;;  %v5298_v23 = vadd.f32 %v13708_v24, %v4978_v51  ;;  %v5544_v47 = vsel %vm1371_vm6, %v5542_v25, %v5543_v54  ;;  %v13712_v55 = vld [vmem:[#allocation129_spill] sm:$0xff]  ;;  %v13718_v25 = vld [vmem:[#allocation110_spill] sm:$0xff] }
 0x5e0   : > { %6717 = vperm.xlu1 %10051, %v9342_v33   ;;  %v4979_v28 = vadd.f32 %v13707_v49, %v4659_v63  ;;  %v9362_v33 = vld [vmem:[%s13599_s14 + $0xd] ss:$0 sm:$0xff]  ;;  %v13714_v63 = vld [vmem:[#allocation109_spill] sm:$0xff]  ;;  %v13719_v54 = vld [vmem:[#allocation150_spill] sm:$0xff]  ;;  %v4531_v24 = vmul.f32 %v13720_v6, %v13718_v25 }
 0x5e1   : > { %v5586_v20 = vadd.f32 %v5544_v47, %v5298_v23  ;;  %v4529_v51 = vmul.f32 %v13716_v18, %v13714_v63  ;;  %v4530_v5 = vmul.f32 %v13719_v54, %v13718_v25  ;;  %v13722_v47 = vld [vmem:[#allocation95_spill] sm:$0xff] }
 0x5e2   : > { %v12696_v34 = vpop.permute.xlu0 %6929  ;;  %v5299_v57 = vadd.f32 %v13709_v30, %v4979_v28 }
 0x5e3   : > { %v12702_v8 = vpop.permute.xlu1 %6913  ;;  %6893 = vperm.xlu0 %10050, %v9354_v60   ;;  %v13710_v60 = vld [vmem:[#allocation107_spill] sm:$0xff]  ;;  %v5906_v39 = vadd.f32 %v12555_v14, %v5586_v20 }
 0x5e4   : > { %6877 = vperm.xlu1 %10051, %v9350_v36   ;;  %v5587_v45 = vadd.f32 %v5547_v43, %v5299_v57  ;;  %v13711_v36 = vld [vmem:[#allocation128_spill] sm:$0xff]  ;;  %v4523_v0 = vmul.f32 %v13712_v55, %v13710_v60 }
 0x5e5   : > { %v4522_v32 = vmul.f32 %v13711_v36, %v13710_v60  ;;  %v3881_v42 = vmul.f32 %v13711_v36, %v13713_v40  ;;  %v6226_v49 = vadd.f32 %v12641_v12, %v5906_v39  ;;  %v3885_v12 = vmul.f32 %v13719_v54, %v13722_v47  ;;  %v13726_v39 = vld [vmem:[#allocation189_spill] sm:$0xff]  ;;  %v13729_v40 = vld [vmem:[#allocation126_spill] sm:$0xff] }
 0x5e6   : > { %v12712_v4 = vpop.permute.xlu0 %5258  ;;  %v5907_v19 = vadd.f32 %v12551_v52, %v5587_v45  ;;  %v13717_v52 = vld [vmem:[#allocation127_spill] sm:$0xff]  ;;  %v4588_v30 = vrot.slane %v4523_v0, 1  ;;  %v13728_v0 = vld [vmem:[#allocation122_spill] sm:$0xff] }
 0x5e7   : > { %v12714_v56 = vpop.permute.xlu1 %5256  ;;  %7069 = vperm.xlu0 %10050, %v9370_v21   ;;  %v13715_v21 = vld [vmem:[#allocation169_spill] sm:$0xff]  ;;  %v4121_v28 = vadd.f32 %v13717_v52, %v3881_v42  ;;  %v4587_v23 = vrot.slane %v4522_v32, 1  ;;  %v4125_v42 = vadd.f32 %v13729_v40, %v3885_v12  ;;  %v4600_v52 = vrot.slane %v4531_v24, 1  ;;  %v13733_v12 = vld [vmem:[#allocation106_spill] sm:$0xff]  ;;  %v13737_v40 = vld [vmem:[#allocation148_spill] sm:$0xff] }
 0x5e8   : > { %7053 = vperm.xlu1 %10051, %v9366_v48   ;;  %v4528_v48 = vmul.f32 %v13715_v21, %v13714_v63  ;;  %v6227_v14 = vadd.f32 %v12637_v35, %v5907_v19  ;;  %v13723_v35 = vld [vmem:[#allocation156_spill] sm:$0xff]  ;;  %v4599_v63 = vrot.slane %v4530_v5, 1  ;;  %v13734_v5 = vld [vmem:[#allocation149_spill] sm:$0xff] }
 0x5e9   : > { %v4361_v43 = vadd.f32 %v13723_v35, %v4121_v28  ;;  %v4589_v25 = vsel %vm1050_vm3, %v4587_v23, %v4588_v30  ;;  %v4520_v24 = vmul.f32 %v13734_v5, %v13733_v12  ;;  %v13735_v23 = vld [vmem:[#allocation112_spill] sm:$0xff] }
 0x5ea   : > { %v12724_v17 = vpop.permute.xlu0 %5266  ;;  %v4596_v45 = vrot.slane %v4528_v48, 1  ;;  %v12772_v32 = vadd.f32 %v13726_v39, %v6227_v14  ;;  %v13732_v14 = vld [vmem:[#allocation158_spill] sm:$0xff]  ;;  %v13736_v39 = vld [vmem:[#allocation160_spill] sm:$0xff] }
 0x5eb   : > { %v12728_v37 = vpop.permute.xlu1 %5264  ;;  %6925 = vperm.xlu0 %10050, %v9362_v33   ;;  %v13721_v33 = vld [vmem:[#allocation94_spill] sm:$0xff]  ;;  %v4365_v35 = vadd.f32 %v13732_v14, %v4125_v42 }
 0x5ec   : > { %6909 = vperm.xlu1 %10051, %v9358_v2   ;;  %v3884_v2 = vmul.f32 %v13715_v21, %v13721_v33  ;;  %13727 = vst [vmem:[#allocation119_spill] sm:$0xff] %v12772_v32  ;;  %v13730_v33 = vld [vmem:[#allocation133_spill] sm:$0xff] }
 0x5ed   : > { %v5450_v28 = vmul.f32 %v13711_v36, %v13730_v33  ;;  %v5451_v48 = vmul.f32 %v13712_v55, %v13730_v33  ;;  %v6754_v36 = vmul.f32 %v12499_v44, %v12772_v32  ;;  %v13738_v33 = vld [vmem:[#allocation168_spill] sm:$0xff]  ;;  %v13766_v32 = vld [vmem:[#allocation137_spill] sm:$0xff] }
 0x5ee   : > { %v12742_v7 = vpop.permute.xlu0 %5850  ;;  %v4124_v19 = vadd.f32 %v13728_v0, %v3884_v2  ;;  %v5459_v14 = vmul.f32 %v13720_v6, %v13738_v33  ;;  %v13741_v6 = vld [vmem:[#allocation161_spill] sm:$0xff] }
 0x5ef   : > { %v12746_v58 = vpop.permute.xlu1 %5848  ;;  %7101 = vperm.xlu0 %10050, %v9378_v46   ;;  %v4597_v46 = vrot.slane %v4529_v51, 1  ;;  %v5515_v42 = vrot.slane %v5450_v28, 2  ;;  %v13740_v28 = vld [vmem:[#allocation132_spill] sm:$0xff] }
 0x5f0   : > { %7085 = vperm.xlu1 %10051, %v9374_v38   ;;  %v13724_v38 = vld [vmem:[#allocation187_spill] sm:$0xff] }
 0x5f1   : > { %v12769_v60 = vadd.f32 %v13724_v38, %v6226_v49  ;;  %v13731_v49 = vld [vmem:[#allocation157_spill] sm:$0xff]  ;;  %v4649_v38 = vadd.f32 %v4589_v25, %v4361_v43  ;;  %v4598_v55 = vsel %vm1050_vm3, %v4596_v45, %v4597_v46  ;;  %v5456_v43 = vmul.f32 %v13715_v21, %v13737_v40  ;;  %v13739_v21 = vld [vmem:[#allocation90_spill] sm:$0xff] }
 0x5f2   : > { %v12759_v57 = vpop.permute.xlu0 %5858  ;;  %v4364_v47 = vadd.f32 %v13731_v49, %v4124_v19  ;;  %v4601_v19 = vsel %vm1050_vm3, %v4599_v63, %v4600_v52  ;;  %v5516_v25 = vrot.slane %v5451_v48, 2  ;;  %v5458_v49 = vmul.f32 %v13719_v54, %v13738_v33  ;;  %v13742_v33 = vld [vmem:[#allocation163_spill] sm:$0xff] }
 0x5f3   : > { %v12766_v20 = vpop.permute.xlu1 %5856  ;;  %13725 = vst [vmem:[#allocation120_spill] sm:$0xff] %v12769_v60  ;;  %v6594_v30 = vmul.f32 %v13735_v23, %v12769_v60  ;;  %v4969_v0 = vadd.f32 %v13736_v39, %v4649_v38  ;;  %v4653_v60 = vadd.f32 %v4601_v19, %v4365_v35  ;;  %v5457_v45 = vmul.f32 %v13716_v18, %v13737_v40 }
 0x5f4   : > { %v4652_v44 = vadd.f32 %v4598_v55, %v4364_v47  ;;  %v3880_v52 = vmul.f32 %v13734_v5, %v13739_v21  ;;  %v4521_v54 = vmul.f32 %v13740_v28, %v13733_v12  ;;  %v4584_v48 = vrot.slane %v4520_v24, 1 }
 0x5f5   : > { %v5289_v46 = vadd.f32 %v12534_v22, %v4969_v0  ;;  %v6770_v38 = vadd.f32 %v6754_v36, %v6594_v30  ;;  %v4973_v47 = vadd.f32 %v13742_v33, %v4653_v60  ;;  %v5524_v35 = vrot.slane %v5456_v43, 2  ;;  %v13743_v60 = vld [vmem:[#allocation123_spill] sm:$0xff] }
 0x5f6   : > { %v12781_v51 = vpop.permute.xlu0 %6365  ;;  %v4972_v39 = vadd.f32 %v13741_v6, %v4652_v44  ;;  %v6950_v18 = vadd.f32 %v12696_v34, %v12682_v62  ;;  %v5527_v55 = vrot.slane %v5458_v49, 2  ;;  %v5528_v22 = vrot.slane %v5459_v14, 2  ;;  %v12820_v44 = vld [vmem:[#allocation15] sm:$0xff]  ;;  %v10082_v49 = vld [vmem:[#allocation3] sm:$0xff] }
 0x5f7   : > { %v12785_v2 = vpop.permute.xlu1 %6361  ;;  %v6946_v0 = vadd.f32 %v12702_v8, %v6770_v38  ;;  %v5517_v19 = vsel %vm1371_vm6, %v5515_v42, %v5516_v25  ;;  %v5525_v40 = vrot.slane %v5457_v45, 2  ;;  %v5293_v12 = vadd.f32 %v12543_v10, %v4973_v47  ;;  %v13744_v14 = vld [vmem:[#allocation147_spill] sm:$0xff] }
 0x5f8   : > { %v5577_v24 = vadd.f32 %v5517_v19, %v5289_v46  ;;  %v4120_v43 = vadd.f32 %v13743_v60, %v3880_v52  ;;  %v4585_v21 = vrot.slane %v4521_v54, 1  ;;  %v5292_v62 = vadd.f32 %v12546_v1, %v4972_v39  ;;  %v13745_v10 = vld [vmem:[#allocation155_spill] sm:$0xff]  ;;  %v13748_v60 = vld [vmem:[#allocation114_spill] sm:$0xff] }
 0x5f9   : > { %v5448_v8 = vmul.f32 %v10082_v49, %v13744_v14  ;;  %v5449_v42 = vmul.f32 %v13740_v28, %v13744_v14  ;;  %v5529_v46 = vsel %vm1371_vm6, %v5527_v55, %v5528_v22  ;;  %v5526_v1 = vsel %vm1371_vm6, %v5524_v35, %v5525_v40  ;;  %v13746_v19 = vld [vmem:[#allocation159_spill] sm:$0xff]  ;;  %v13751_v49 = vld [vmem:[#allocation113_spill] sm:$0xff]  ;;  %v13752_v14 = vld [vmem:[#allocation176_spill] sm:$0xff] }
 0x5fa   : > { %v12802_v23 = vpop.permute.xlu0 %6381  ;;  %v5897_v25 = vadd.f32 %v12742_v7, %v5577_v24  ;;  %v4360_v45 = vadd.f32 %v13745_v10, %v4120_v43  ;;  %v5581_v54 = vadd.f32 %v5529_v46, %v5293_v12  ;;  %v4586_v7 = vsel %vm1050_vm3, %v4584_v48, %v4585_v21  ;;  %v13750_v21 = vld [vmem:[#allocation180_spill] sm:$0xff]  ;;  %v13754_v10 = vld [vmem:[#allocation118_spill] sm:$0xff]  ;;  %v13756_v46 = vld [vmem:[#allocation185_spill] sm:$0xff] }
 0x5fb   : > { %v12807_v63 = vpop.permute.xlu1 %6377  ;;  %v5580_v28 = vadd.f32 %v5526_v1, %v5292_v62  ;;  %v5512_v39 = vrot.slane %v5448_v8, 2  ;;  %v5513_v33 = vrot.slane %v5449_v42, 2  ;;  %v4537_v62 = vmul.f32 %v13750_v21, %v13748_v60  ;;  %v13757_v1 = vld [vmem:[#allocation99_spill] sm:$0xff] }
 0x5fc   : > { %v5901_v47 = vadd.f32 %v12759_v57, %v5581_v54  ;;  %v13747_v57 = vld [vmem:[#allocation162_spill] sm:$0xff]  ;;  %v4538_v8 = vmul.f32 %v13752_v14, %v13751_v49  ;;  %v3889_v54 = vmul.f32 %v13752_v14, %v13757_v1 }
 0x5fd   : > { %v5900_v55 = vadd.f32 %v12766_v20, %v5580_v28  ;;  %v5514_v12 = vsel %vm1371_vm6, %v5512_v39, %v5513_v33  ;;  %v13749_v20 = vld [vmem:[#allocation179_spill] sm:$0xff] }
 0x5fe   : > { %v7106_v5 = vpop.permute.xlu0 %7105  ;;  %v4536_v43 = vmul.f32 %v13749_v20, %v13748_v60  ;;  %v13760_v39 = vld [vmem:[#allocation183_spill] sm:$0xff] }
 0x5ff   : > { %v7090_v30 = vpop.permute.xlu1 %7089  ;;  %v7126_v36 = vmul.f32 %v7106_v5, %v6950_v18  ;;  %v4648_v18 = vadd.f32 %v4586_v7, %v4360_v45  ;;  %v13759_v7 = vld [vmem:[#allocation182_spill] sm:$0xff] }
 0x600   : > { %v7122_v34 = vmul.f32 %v7090_v30, %v6946_v0 }
 0x601   : > { %9731 = vmatmul.mubr.msk.f32.vlgmr.msra.gmra.mrb[26].mxu1 %vm7134_vm10, %v7126_v36  ;;  %v4968_v5 = vadd.f32 %v13746_v19, %v4648_v18  ;;  %v4608_v19 = vrot.slane %v4536_v43, 1  ;;  %v13767_v43 = vld [vmem:[#allocation102_spill] sm:$0xff] }
 0x602   : > { %9726 = vmatmul.mubr.msk.f32.vlgmr.msra.gmra.mrb[26].mxu0 %vm7134_vm10, %v7122_v34  ;;  %v6171_v52 = vpop.permute.xlu0 %6170  ;;  %9739 = vmatpush3.msra.mxu1 %v12820_v44 }
 0x603   : > { %v6169_v38 = vpop.permute.xlu1 %6168  ;;  %v6217_v6 = vadd.f32 %v6171_v52, %v5897_v25  ;;  %9734 = vmatpush3.msra.mxu0 %v12820_v44  ;;  %9735 = vmatprep.mubr.msk.f32.mxu0 %vm10392_vm5, %v13691_v59  ;;  %v5288_v30 = vadd.f32 %v13747_v57, %v4968_v5  ;;  %v4545_v52 = vmul.f32 %v13756_v46, %v13754_v10  ;;  %v4609_v5 = vrot.slane %v4537_v62, 1 }
 0x604   : > { %9740 = vmatprep.mubr.msk.f32.mxu1 %vm10392_vm5, %v13691_v59  ;;  %9743 = vmatprep.subr.mxu0 %v13691_v59 }
 0x605   : > { %v12843_v35 = vadd.f32 %v12599_v50, %v6217_v6  ;;  %9748 = vmatprep.subr.mxu1 %v13691_v59  ;;  %v5576_v25 = vadd.f32 %v5514_v12, %v5288_v30  ;;  %v13758_v6 = vld [vmem:[#allocation117_spill] sm:$0xff]  ;;  %v13763_v12 = vld [vmem:[#allocation131_spill] sm:$0xff]  ;;  %v4611_v30 = vrot.slane %v4538_v8, 1  ;;  %v13769_v8 = vld [vmem:[#allocation138_spill] sm:$0xff] }
 0x606   : > { %v6179_v22 = vpop.permute.xlu0 %6178  ;;  %v4546_v28 = vmul.f32 %v13759_v7, %v13758_v6  ;;  %v4547_v33 = vmul.f32 %v13760_v39, %v13758_v6  ;;  %v4129_v57 = vadd.f32 %v13763_v12, %v3889_v54  ;;  %v13765_v6 = vld [vmem:[#allocation130_spill] sm:$0xff]  ;;  %v13772_v12 = vld [vmem:[#allocation172_spill] sm:$0xff] }
 0x607   : > { %v6177_v48 = vpop.permute.xlu1 %6176  ;;  %v6221_v0 = vadd.f32 %v6179_v22, %v5901_v47  ;;  %v5896_v47 = vadd.f32 %v12746_v58, %v5576_v25  ;;  %v4621_v25 = vrot.slane %v4545_v52, 1 }
 0x608   : > { %v6220_v40 = vadd.f32 %v6177_v48, %v5900_v55  ;;  %v13761_v55 = vld [vmem:[#allocation98_spill] sm:$0xff]  ;;  %v13762_v48 = vld [vmem:[#allocation103_spill] sm:$0xff]  ;;  %v4623_v16 = vrot.slane %v4546_v28, 1  ;;  %v4624_v61 = vrot.slane %v4547_v33, 1 }
 0x609   : > { %v12850_v24 = vadd.f32 %v12616_v15, %v6221_v0  ;;  %v13753_v15 = vld [vmem:[#allocation177_spill] sm:$0xff]  ;;  %v3888_v22 = vmul.f32 %v13749_v20, %v13761_v55  ;;  %v3893_v0 = vmul.f32 %v13759_v7, %v13762_v48  ;;  %v4369_v55 = vadd.f32 %v13766_v32, %v4129_v57  ;;  %v13771_v33 = vld [vmem:[#allocation170_spill] sm:$0xff] }
 0x60a   : > { %v12854_v50 = vadd.f32 %v12620_v29, %v6220_v40  ;;  %v12856_v36 = vpop.permute.xlu0 %6569  ;;  %v4539_v42 = vmul.f32 %v13753_v15, %v13751_v49  ;;  %v13755_v29 = vld [vmem:[#allocation184_spill] sm:$0xff]  ;;  %v6216_v49 = vadd.f32 %v6169_v38, %v5896_v47  ;;  %v4610_v38 = vsel %vm1050_vm3, %v4608_v19, %v4609_v5  ;;  %v13770_v47 = vld [vmem:[#allocation135_spill] sm:$0xff]  ;;  %v13773_v57 = vld [vmem:[#allocation134_spill] sm:$0xff] }
 0x60b   : > { %v12862_v34 = vpop.permute.xlu1 %6553  ;;  %v4544_v45 = vmul.f32 %v13755_v29, %v13754_v10  ;;  %v13764_v10 = vld [vmem:[#allocation164_spill] sm:$0xff]  ;;  %v4133_v27 = vadd.f32 %v13765_v6, %v3893_v0  ;;  %v3892_v62 = vmul.f32 %v13755_v29, %v13767_v43  ;;  %v5466_v19 = vmul.f32 %v13752_v14, %v13772_v12  ;;  %v13776_v6 = vld [vmem:[#allocation171_spill] sm:$0xff] }
 0x60c   : > { %v4612_v60 = vrot.slane %v4539_v42, 1  ;;  %v4128_v1 = vadd.f32 %v13764_v10, %v3888_v22  ;;  %v12898_v52 = vadd.f32 %v12604_v3, %v6216_v49  ;;  %v5464_v22 = vmul.f32 %v13749_v20, %v13771_v33  ;;  %v13774_v10 = vld [vmem:[#allocation167_spill] sm:$0xff] }
 0x60d   : > { %v4620_v58 = vrot.slane %v4544_v45, 1  ;;  %v4373_v42 = vadd.f32 %v13769_v8, %v4133_v27  ;;  %v4132_v32 = vadd.f32 %v13770_v47, %v3892_v62  ;;  %v4625_v27 = vsel %vm1050_vm3, %v4623_v16, %v4624_v61 }
 0x60e   : > { %v12879_v18 = vpop.permute.xlu0 %6729  ;;  %v4368_v53 = vadd.f32 %v13768_v31, %v4128_v1  ;;  %v4613_v45 = vsel %vm1050_vm3, %v4611_v30, %v4612_v60  ;;  %v5465_v31 = vmul.f32 %v13750_v21, %v13771_v33  ;;  %v5467_v3 = vmul.f32 %v13753_v15, %v13772_v12  ;;  %v13775_v15 = vld [vmem:[#allocation136_spill] sm:$0xff] }
 0x60f   : > { %v12885_v40 = vpop.permute.xlu1 %6713  ;;  %v4622_v28 = vsel %vm1050_vm3, %v4620_v58, %v4621_v25  ;;  %v4657_v0 = vadd.f32 %v4613_v45, %v4369_v55  ;;  %v4372_v30 = vadd.f32 %v13773_v57, %v4132_v32  ;;  %v6588_v49 = vmul.f32 %v12668_v26, %v12854_v50  ;;  %v13778_v32 = vld [vmem:[#allocation139_spill] sm:$0xff] }
 0x610   : > { %v4656_v60 = vadd.f32 %v4610_v38, %v4368_v53  ;;  %v6748_v20 = vmul.f32 %v12680_v11, %v12850_v24  ;;  %v4661_v61 = vadd.f32 %v4625_v27, %v4373_v42  ;;  %v6584_v16 = vmul.f32 %v12670_v13, %v12898_v52  ;;  %v13777_v11 = vld [vmem:[#allocation174_spill] sm:$0xff] }
 0x611   : > { %v4977_v1 = vadd.f32 %v13774_v10, %v4657_v0  ;;  %v6744_v14 = vmul.f32 %v12684_v41, %v12843_v35  ;;  %v5536_v25 = vrot.slane %v5464_v22, 2  ;;  %v5537_v53 = vrot.slane %v5465_v31, 2  ;;  %v13779_v31 = vld [vmem:[#allocation166_spill] sm:$0xff] }
 0x612   : > { %v6890_v48 = vpop.permute.xlu0 %6889  ;;  %v4976_v58 = vadd.f32 %v13775_v15, %v4656_v60  ;;  %v5472_v26 = vmul.f32 %v13755_v29, %v13776_v6  ;;  %v5539_v55 = vrot.slane %v5466_v19, 2  ;;  %v5540_v43 = vrot.slane %v5467_v3, 2 }
 0x613   : > { %v6874_v54 = vpop.permute.xlu1 %6873  ;;  %v5474_v62 = vmul.f32 %v13759_v7, %v13777_v11  ;;  %v5475_v8 = vmul.f32 %v13760_v39, %v13777_v11  ;;  %v4660_v13 = vadd.f32 %v4622_v28, %v4372_v30  ;;  %v5473_v41 = vmul.f32 %v13756_v46, %v13776_v6 }
 0x614   : > { %v5297_v38 = vadd.f32 %v12712_v4, %v4977_v1  ;;  %v6764_v45 = vadd.f32 %v6748_v20, %v6588_v49  ;;  %v4981_v33 = vadd.f32 %v13778_v32, %v4661_v61  ;;  %v5296_v29 = vadd.f32 %v12714_v56, %v4976_v58 }
 0x615   : > { %v6760_v22 = vadd.f32 %v6744_v14, %v6584_v16  ;;  %v4980_v0 = vadd.f32 %v13779_v31, %v4660_v13  ;;  %v5548_v7 = vrot.slane %v5472_v26, 2  ;;  %v5538_v39 = vsel %vm1371_vm6, %v5536_v25, %v5537_v53 }
 0x616   : > { %v5867_v5 = vpop.permute.xlu0 %5866  ;;  %v6940_v27 = vadd.f32 %v6890_v48, %v6764_v45  ;;  %v5551_v12 = vrot.slane %v5474_v62, 2  ;;  %v5552_v28 = vrot.slane %v5475_v8, 2  ;;  %v5541_v46 = vsel %vm1371_vm6, %v5539_v55, %v5540_v43 }
 0x617   : > { %v5865_v21 = vpop.permute.xlu1 %5864  ;;  %v6936_v19 = vadd.f32 %v6874_v54, %v6760_v22  ;;  %v5549_v4 = vrot.slane %v5473_v41, 2  ;;  %v5301_v57 = vadd.f32 %v12724_v17, %v4981_v33  ;;  %v5585_v30 = vadd.f32 %v5541_v46, %v5297_v38 }
 0x618   : > { %v5300_v56 = vadd.f32 %v12728_v37, %v4980_v0  ;;  %v5584_v20 = vadd.f32 %v5538_v39, %v5296_v29  ;;  %v5553_v61 = vsel %vm1371_vm6, %v5551_v12, %v5552_v28  ;;  %v13780_v12 = vld [vmem:[#allocation97_spill] sm:$0xff] }
 0x619   : > { %v5905_v1 = vadd.f32 %v5867_v5, %v5585_v30  ;;  %v5550_v17 = vsel %vm1371_vm6, %v5548_v7, %v5549_v4  ;;  %v5589_v16 = vadd.f32 %v5553_v61, %v5301_v57 }
 0x61a   : > { %v5875_v42 = vpop.permute.xlu0 %5874  ;;  %v5904_v48 = vadd.f32 %v5865_v21, %v5584_v20  ;;  %v5588_v37 = vadd.f32 %v5550_v17, %v5300_v56 }
 0x61b   : > { %v5873_v47 = vpop.permute.xlu1 %5872  ;;  %v5909_v21 = vadd.f32 %v5875_v42, %v5589_v16  ;;  %v13783_v16 = vld [vmem:[#allocation111_spill] sm:$0xff] }
 0x61c   : > { %v5908_v25 = vadd.f32 %v5873_v47, %v5588_v37  ;;  %v13784_v37 = vld [vmem:[#allocation119_spill] sm:$0xff] }
 0x61e   : > { %v7066_v3 = vpop.permute.xlu0 %7065 }
 0x61f   : > { %v7050_v60 = vpop.permute.xlu1 %7049  ;;  %v7116_v49 = vmul.f32 %v7066_v3, %v6940_v27  ;;  %v13782_v3 = vld [vmem:[#allocation93_spill] sm:$0xff] }
 0x620   : > { %v7112_v10 = vmul.f32 %v7050_v60, %v6936_v19  ;;  %v13781_v19 = vld [vmem:[#allocation108_spill] sm:$0xff] }
 0x621   : > { %9741 = vmatmul.mubr.msk.f32.vlgmr.msra.gmra.mrb[24].mxu1 %vm7134_vm10, %v7116_v49 }
 0x622   : > { %9736 = vmatmul.mubr.msk.f32.vlgmr.msra.gmra.mrb[24].mxu0 %vm7134_vm10, %v7112_v10  ;;  %v6187_v54 = vpop.permute.xlu0 %6186  ;;  %9749 = vmatpush3.msra.mxu1 %v12820_v44 }
 0x623   : > { %v6185_v14 = vpop.permute.xlu1 %6184  ;;  %v6225_v15 = vadd.f32 %v6187_v54, %v5905_v1  ;;  %9744 = vmatpush3.msra.mxu0 %v12820_v44  ;;  %9745 = vmatprep.mubr.msk.f32.mxu0 %vm10392_vm5, %v13691_v59 }
 0x624   : > { %v6224_v5 = vadd.f32 %v6185_v14, %v5904_v48  ;;  %9750 = vmatprep.mubr.msk.f32.mxu1 %vm10392_vm5, %v13691_v59  ;;  %9753 = vmatprep.subr.mxu0 %v13691_v59 }
 0x625   : > { %v12950_v58 = vadd.f32 %v12781_v51, %v6225_v15  ;;  %9758 = vmatprep.subr.mxu1 %v13691_v59 }
 0x626   : > { %v12954_v53 = vadd.f32 %v12785_v2, %v6224_v5  ;;  %v6195_v6 = vpop.permute.xlu0 %6194 }
 0x627   : > { %v6193_v26 = vpop.permute.xlu1 %6192  ;;  %v6229_v55 = vadd.f32 %v6195_v6, %v5909_v21  ;;  %v6752_v43 = vmul.f32 %v12885_v40, %v12950_v58  ;;  %v13785_v21 = vld [vmem:[#allocation96_spill] sm:$0xff] }
 0x628   : > { %v6228_v11 = vadd.f32 %v6193_v26, %v5908_v25  ;;  %v6592_v62 = vmul.f32 %v12862_v34, %v12954_v53  ;;  %v13786_v6 = vld [vmem:[#allocation120_spill] sm:$0xff] }
 0x629   : > { %v12964_v13 = vadd.f32 %v12802_v23, %v6229_v55 }
 0x62a   : > { %v6550_v8 = vpop.permute.xlu0 %6549  ;;  %v6768_v42 = vadd.f32 %v6752_v43, %v6592_v62  ;;  %v12961_v51 = vadd.f32 %v12807_v63, %v6228_v11 }
 0x62b   : > { %v6534_v2 = vpop.permute.xlu1 %6533  ;;  %v6756_v40 = vmul.f32 %v12879_v18, %v12964_v13  ;;  %v6591_v46 = vmul.f32 %v6550_v8, %v13781_v19 }
 0x62c   : > { %v6596_v45 = vmul.f32 %v12856_v36, %v12961_v51  ;;  %v10083_v36 = vld [vmem:[%s13619_s23] sm:$0xff]  ;;  %v6587_v4 = vmul.f32 %v6534_v2, %v13782_v3 }
 0x62e   : > { %v6710_v41 = vpop.permute.xlu0 %6709  ;;  %v6772_v34 = vadd.f32 %v6756_v40, %v6596_v45 }
 0x62f   : > { %v6694_v38 = vpop.permute.xlu1 %6693  ;;  %v6751_v27 = vmul.f32 %v6710_v41, %v12577_v9 }
 0x630   : > { %v6747_v28 = vmul.f32 %v6694_v38, %v13780_v12 }
 0x631   : > { %v6767_v60 = vadd.f32 %v6751_v27, %v6591_v46 }
 0x632   : > { %v6922_v47 = vpop.permute.xlu0 %6921  ;;  %v6763_v49 = vadd.f32 %v6747_v28, %v6587_v4 }
 0x633   : > { %v6906_v32 = vpop.permute.xlu1 %6905  ;;  %v6948_v33 = vadd.f32 %v6922_v47, %v6772_v34 }
 0x634   : > { %v6944_v29 = vadd.f32 %v6906_v32, %v6768_v42 }
 0x636   : > { %v7098_v22 = vpop.permute.xlu0 %7097 }
 0x637   : > { %v7082_v63 = vpop.permute.xlu1 %7081  ;;  %v7124_v31 = vmul.f32 %v7098_v22, %v6948_v33 }
 0x638   : > { %v7120_v0 = vmul.f32 %v7082_v63, %v6944_v29 }
 0x639   : > { %9751 = vmatmul.mubr.msk.f32.vlgmr.msra.gmra.mrb[26].mxu1 %vm7134_vm10, %v7124_v31 }
 0x63a   : > { %9746 = vmatmul.mubr.msk.f32.vlgmr.msra.gmra.mrb[26].mxu0 %vm7134_vm10, %v7120_v0  ;;  %v6582_v23 = vpop.permute.xlu0 %6581  ;;  %9759 = vmatpush3.msra.mxu1 %v10083_v36 }
 0x63b   : > { %v6566_v18 = vpop.permute.xlu1 %6565  ;;  %9754 = vmatpush3.msra.mxu0 %v10083_v36  ;;  %9755 = vmatprep.mubr.msk.f32.mxu0 %vm10392_vm5, %v13691_v59  ;;  %v6599_v25 = vmul.f32 %v6582_v23, %v13785_v21  ;;  %v7130_v21 = vld [vmem:[%s13788_s13] sm:$0xff] }
 0x63c   : > { %9760 = vmatprep.mubr.msk.f32.mxu1 %vm10392_vm5, %v13691_v59  ;;  %9763 = vmatprep.subr.mxu0 %v13691_v59  ;;  %v6595_v26 = vmul.f32 %v6566_v18, %v13786_v6  ;;  %v10084_v6 = vld [vmem:[#allocation2 + $0x18] sm:$0xff] }
 0x63d   : > { %9768 = vmatprep.subr.mxu1 %v13691_v59 }
 0x63e   : > { %v6742_v7 = vpop.permute.xlu0 %6741 }
 0x63f   : > { %v6726_v39 = vpop.permute.xlu1 %6725  ;;  %v6759_v14 = vmul.f32 %v6742_v7, %v13783_v16 }
 0x640   : > { %v6755_v5 = vmul.f32 %v6726_v39, %v13784_v37 }
 0x641   : > { %v6775_v11 = vadd.f32 %v6759_v14, %v6599_v25  ;;  %v7131_v25 = vld [vmem:[%s13788_s13 + $0x8] sm:$0xff] }
 0x642   : > { %v6902_v57 = vpop.permute.xlu0 %6901  ;;  %v6771_v62 = vadd.f32 %v6755_v5, %v6595_v26  ;;  %v13789_v26 = vld [vmem:[#allocation22_spill] sm:$0xff] }
 0x643   : > { %v6886_v30 = vpop.permute.xlu1 %6885  ;;  %v6943_v56 = vadd.f32 %v6902_v57, %v6767_v60 }
 0x644   : > { %v6939_v20 = vadd.f32 %v6886_v30, %v6763_v49 }
 0x646   : > { %v7078_v10 = vpop.permute.xlu0 %7077 }
 0x647   : > { %v7062_v1 = vpop.permute.xlu1 %7061  ;;  %v7119_v48 = vmul.f32 %v7078_v10, %v6943_v56 }
 0x648   : > { %v7115_v61 = vmul.f32 %v7062_v1, %v6939_v20 }
 0x649   : > { %9761 = vmatmul.mubr.msk.f32.vlgmr.msra.gmra.mrb[28].mxu1 %vm7134_vm10, %v7119_v48 }
 0x64a   : > { %9756 = vmatmul.mubr.msk.f32.vlgmr.msra.gmra.mrb[28].mxu0 %vm7134_vm10, %v7115_v61  ;;  %v6542_v9 = vpop.permute.xlu0 %6541  ;;  %9769 = vmatpush3.msra.mxu1 %v10083_v36 }
 0x64b   : > { %v6526_v54 = vpop.permute.xlu1 %6525  ;;  %9764 = vmatpush3.msra.mxu0 %v10083_v36  ;;  %9765 = vmatprep.mubr.msk.f32.mxu0 %vm10392_vm5, %v13691_v59  ;;  %v6589_v31 = vmul.f32 %v6542_v9, %v12854_v50  ;;  %v7133_v9 = vld [vmem:[%s13787_s1 + $0x8] sm:$0xff] }
 0x64c   : > { %9770 = vmatprep.mubr.msk.f32.mxu1 %vm10392_vm5, %v13691_v59  ;;  %9773 = vmatprep.subr.mxu0 %v13691_v59  ;;  %v6585_v0 = vmul.f32 %v6526_v54, %v12898_v52 }
 0x64d   : > { %9778 = vmatprep.subr.mxu1 %v13691_v59 }
 0x64e   : > { %v6702_v17 = vpop.permute.xlu0 %6701 }
 0x64f   : > { %v6686_v15 = vpop.permute.xlu1 %6685  ;;  %v6749_v34 = vmul.f32 %v6702_v17, %v12850_v24 }
 0x650   : > { %v6745_v29 = vmul.f32 %v6686_v15, %v12843_v35 }
 0x651   : > { %v6765_v7 = vadd.f32 %v6749_v34, %v6589_v31  ;;  %v10089_v34 = vld [vmem:[#allocation2 + $0x28] sm:$0x3]  ;;  %v10091_v31 = vld [vmem:[#allocation2 + $0x38] sm:$0xff] }
 0x652   : > { %v6934_v55 = vpop.permute.xlu0 %6933  ;;  %v6761_v27 = vadd.f32 %v6745_v29, %v6585_v0  ;;  %v10090_v29 = vld [vmem:[#allocation2 + $0x30] sm:$0xff] }
 0x653   : > { %v6918_v43 = vpop.permute.xlu1 %6917  ;;  %v6951_v8 = vadd.f32 %v6934_v55, %v6775_v11  ;;  %v13054_v55 = vmul.f32 %v10084_v6, %v13789_v26 }
 0x654   : > { %v6947_v42 = vadd.f32 %v6918_v43, %v6771_v62  ;;  %v10085_v43 = vld [vmem:[#allocation2 + $0x20] sm:$0xff] }
 0x655   : > { %v817_v11 = vmul.f32 %v10085_v43, %v13789_v26  ;;  %v10086_v62 = vld [vmem:[#allocation2] sm:$0xff] }
 0x656   : > { %v7110_v2 = vpop.permute.xlu0 %7109 }
 0x657   : > { %v7094_v41 = vpop.permute.xlu1 %7093  ;;  %v7127_v38 = vmul.f32 %v7110_v2, %v6951_v8  ;;  %v13790_v8 = vld [vmem:[#allocation26_spill] sm:$0xff]  ;;  %v10087_v2 = vld [vmem:[#allocation2 + $0x8] sm:$0xff] }
 0x658   : > { %v7123_v45 = vmul.f32 %v7094_v41, %v6947_v42  ;;  %v1026_v42 = vmul.f32 %v10086_v62, %v13790_v8  ;;  %v1027_v41 = vmul.f32 %v10087_v2, %v13790_v8 }
 0x659   : > { %9771 = vmatmul.mubr.msk.f32.vlgmr.msra.gmra.mrb[30].mxu1 %vm7134_vm10, %v7127_v38  ;;  %v10088_v38 = vld [vmem:[#allocation2 + $0x10] sm:$0x3] }
 0x65a   : > { %9766 = vmatmul.mubr.msk.f32.vlgmr.msra.gmra.mrb[30].mxu0 %vm7134_vm10, %v7123_v45  ;;  %v6574_v40 = vpop.permute.xlu0 %6573  ;;  %9779 = vmatpush3.msra.mxu1 %v12820_v44  ;;  %v1028_v45 = vmul.f32 %v10088_v38, %v13790_v8 }
 0x65b   : > { %v6558_v47 = vpop.permute.xlu1 %6557  ;;  %9774 = vmatpush3.msra.mxu0 %v12820_v44  ;;  %9775 = vmatprep.mubr.msk.f32.mxu0 %vm10392_vm5, %v13691_v59 }
 0x65c   : > { %9780 = vmatprep.mubr.msk.f32.mxu1 %vm10392_vm5, %v13691_v59  ;;  %9783 = vmatprep.subr.mxu0 %v13691_v59  ;;  %v6593_v22 = vmul.f32 %v6558_v47, %v12954_v53  ;;  %v6597_v53 = vmul.f32 %v6574_v40, %v12961_v51  ;;  %v13791_v40 = vld [vmem:[#allocation27_spill] sm:$0xff] }
 0x65d   : > { %9788 = vmatprep.subr.mxu1 %v13691_v59  ;;  %v1029_v47 = vmul.f32 %v10084_v6, %v13791_v40 }
 0x65e   : > { %v6734_v32 = vpop.permute.xlu0 %6733 }
 0x65f   : > { %v6718_v33 = vpop.permute.xlu1 %6717  ;;  %v6757_v24 = vmul.f32 %v6734_v32, %v12964_v13  ;;  %v1030_v32 = vmul.f32 %v10085_v43, %v13791_v40 }
 0x660   : > { %v6753_v63 = vmul.f32 %v6718_v33, %v12950_v58  ;;  %v1031_v33 = vmul.f32 %v10089_v34, %v13791_v40  ;;  %v13800_v40 = vld [vmem:[#allocation32_spill] sm:$0xff] }
 0x661   : > { %v6773_v58 = vadd.f32 %v6757_v24, %v6597_v53  ;;  %v13795_v53 = vld [vmem:[#allocation24_spill] sm:$0xff] }
 0x662   : > { %v6894_v23 = vpop.permute.xlu0 %6893  ;;  %v6769_v36 = vadd.f32 %v6753_v63, %v6593_v22  ;;  %v13792_v22 = vld [vmem:[#allocation28_spill] sm:$0xff] }
 0x663   : > { %v6878_v18 = vpop.permute.xlu1 %6877  ;;  %v6941_v39 = vadd.f32 %v6894_v23, %v6765_v7  ;;  %v1032_v63 = vmul.f32 %v10090_v29, %v13792_v22  ;;  %v1033_v0 = vmul.f32 %v10091_v31, %v13792_v22  ;;  %v10092_v23 = vld [vmem:[#allocation2 + $0x40] sm:$0x3]  ;;  %v13793_v7 = vld [vmem:[#allocation29_spill] sm:$0xff] }
 0x664   : > { %v6937_v12 = vadd.f32 %v6878_v18, %v6761_v27  ;;  %v10093_v18 = vld [vmem:[#allocation2 + $0x48] sm:$0xff] }
 0x665   : > { %v1035_v27 = vmul.f32 %v10093_v18, %v13793_v7 }
 0x666   : > { %v7070_v28 = vpop.permute.xlu0 %7069 }
 0x667   : > { %v7054_v19 = vpop.permute.xlu1 %7053  ;;  %v7117_v35 = vmul.f32 %v7070_v28, %v6941_v39  ;;  %v10094_v39 = vld [vmem:[#allocation2 + $0x50] sm:$0xff]  ;;  %v10095_v28 = vld [vmem:[#allocation2 + $0x58] sm:$0x3] }
 0x668   : > { %v7113_v46 = vmul.f32 %v7054_v19, %v6937_v12  ;;  %v1036_v12 = vmul.f32 %v10094_v39, %v13793_v7  ;;  %v1037_v24 = vmul.f32 %v10095_v28, %v13793_v7  ;;  %v13794_v19 = vld [vmem:[#allocation23_spill] sm:$0xff] }
 0x669   : > { %9781 = vmatmul.mubr.msk.f32.vlgmr.msra.gmra.mrb[28].mxu1 %vm7134_vm10, %v7117_v35  ;;  %v814_v35 = vmul.f32 %v10086_v62, %v13794_v19 }
 0x66a   : > { %9776 = vmatmul.mubr.msk.f32.vlgmr.msra.gmra.mrb[28].mxu0 %vm7134_vm10, %v7113_v46  ;;  %v6926_v50 = vpop.permute.xlu0 %6925  ;;  %9789 = vmatpush3.msra.mxu1 %v12820_v44  ;;  %v815_v46 = vmul.f32 %v10087_v2, %v13794_v19  ;;  %v1355_v19 = vmul.f32 %v10092_v23, %v13800_v40 }
 0x66b   : > { %v6910_v52 = vpop.permute.xlu1 %6909  ;;  %9784 = vmatpush3.msra.mxu0 %v12820_v44  ;;  %9785 = vmatprep.mubr.msk.f32.mxu0 %vm10392_vm5, %v13691_v59  ;;  %v6949_v13 = vadd.f32 %v6926_v50, %v6773_v58  ;;  %v7132_v44 = vld [vmem:[%s13787_s1] sm:$0xff]  ;;  %v818_v50 = vmul.f32 %v10090_v29, %v13795_v53  ;;  %v1051_v58 = vrot.slane %v1026_v42, 1 }
 0x66c   : > { %9790 = vmatprep.mubr.msk.f32.mxu1 %vm10392_vm5, %v13691_v59  ;;  %v6945_v3 = vadd.f32 %v6910_v52, %v6769_v36  ;;  %v1034_v36 = vmul.f32 %v10092_v23, %v13792_v22  ;;  %v819_v52 = vmul.f32 %v10091_v31, %v13795_v53  ;;  %v13806_v53 = vld [vmem:[#allocation39_spill] sm:$0xff] }
 0x66e   : > { %v7102_v51 = vpop.permute.xlu0 %7101 }
 0x66f   : > { %v7086_v4 = vpop.permute.xlu1 %7085  ;;  %v7125_v57 = vmul.f32 %v7102_v51, %v6949_v13  ;;  %v1052_v13 = vrot.slane %v1027_v41, 1  ;;  %v1056_v51 = vrot.slane %v1029_v47, 1  ;;  %v13799_v41 = vld [vmem:[#allocation34_spill] sm:$0xff]  ;;  %v13107_v47 = vmul.f32 %v10090_v29, %v13800_v40 }
 0x670   : > { %v7121_v30 = vmul.f32 %v7086_v4, %v6945_v3  ;;  %v1054_v3 = vrot.slane %v1028_v45, 1  ;;  %v1057_v4 = vrot.slane %v1030_v32, 1  ;;  %v13801_v32 = vld [vmem:[#allocation50_spill] sm:$0xff] }
 0x671   : > { %9791 = vmatmul.mubr.msk.f32.vlgmr.msra.gmra.mrb[30].mxu1 %vm7134_vm10, %v7125_v57  ;;  %v1059_v57 = vrot.slane %v1031_v33, 1  ;;  %v13802_v33 = vld [vmem:[#allocation35_spill] sm:$0xff]  ;;  %v13805_v29 = vld [vmem:[#allocation54_spill] sm:$0xff] }
 0x672   : > { %9786 = vmatmul.mubr.msk.f32.vlgmr.msra.gmra.mrb[30].mxu0 %vm7134_vm10, %v7121_v30  ;;  %9800 = vmatprep.mubr.msk.f32.mxu1 %vm7134_vm10, %v7132_v44  ;;  %v1061_v30 = vrot.slane %v1032_v63, 1  ;;  %v901_v22 = vadd.f32 %v13802_v33, %v817_v11 }
 0x673   : > { %9795 = vmatprep.mubr.msk.f32.mxu0 %vm7134_vm10, %v7132_v44 }
 0x6f4   : > { %v7569_v60 = vpop.f32.mrb[24].mxu1 }
 0x6f5   : > { %v7496_v59 = vpop.f32.mrb[24].mxu0  ;;  %v9742_v49 = vpop.f32.mrb[25].mxu1 }
 0x6f6   : > { %v9737_v56 = vpop.f32.mrb[25].mxu0  ;;  %v1067_v49 = vrot.slane %v1036_v12, 1 }
 0x6f7   : > { %v1069_v56 = vrot.slane %v1037_v24, 1 }
 0x6f9   : > { %v1070_v8 = vsel %vm1050_vm3, %v1067_v49, %v1069_v56 }
 0x70c   : > { %v7715_v20 = vpop.f32.mrb[26].mxu1 }
 0x70d   : > { %v7642_v10 = vpop.f32.mrb[26].mxu0  ;;  %v9752_v1 = vpop.f32.mrb[27].mxu1 }
 0x70e   : > { %v9747_v48 = vpop.f32.mrb[27].mxu0  ;;  %v13797_v1 = vld [vmem:[#allocation30_spill] sm:$0xff] }
 0x70f   : > { %v13075_v48 = vmul.f32 %v10086_v62, %v13797_v1 }
 0x711   : > { %v1372_v42 = vrot.slane %v13075_v48, 2 }
 0x73c   : > { %v8153_v61 = vpop.f32.mrb[28].mxu1 }
 0x73d   : > { %v8080_v54 = vpop.f32.mrb[28].mxu0  ;;  %v9782_v17 = vpop.f32.mrb[29].mxu1  ;;  %9798 = vmatprep.subr.mxu1 %v8153_v61 }
 0x73e   : > { %v9777_v16 = vpop.f32.mrb[29].mxu0  ;;  %9793 = vmatprep.subr.mxu0 %v8080_v54  ;;  %9799 = vmatpush3.msra.mxu1 %v8153_v61  ;;  %v13078_v61 = vmul.f32 %v10087_v2, %v13797_v1  ;;  %v13798_v17 = vld [vmem:[#allocation31_spill] sm:$0xff] }
 0x73f   : > { %9794 = vmatpush3.msra.mxu0 %v8080_v54  ;;  %9801 = vmatmul.mubr.msk.f32.vlgmr.msra.gmra.mrb[32].mxu1 %vm7134_vm10, %v7133_v9  ;;  %v13085_v16 = vmul.f32 %v10084_v6, %v13798_v17  ;;  %v13096_v26 = vmul.f32 %v10089_v34, %v13798_v17  ;;  %v898_v34 = vadd.f32 %v13801_v32, %v814_v35 }
 0x740   : > { %9796 = vmatmul.mubr.msk.f32.vlgmr.msra.gmra.mrb[32].mxu0 %vm7134_vm10, %v7133_v9  ;;  %9810 = vmatprep.mubr.msk.f32.mxu1 %vm7134_vm10, %v7132_v44  ;;  %v985_v35 = vadd.f32 %v13806_v53, %v901_v22  ;;  %v13825_v53 = vld [vmem:[#allocation63_spill] sm:$0xff] }
 0x741   : > { %9805 = vmatprep.mubr.msk.f32.mxu0 %vm7134_vm10, %v7132_v44  ;;  %v1062_v44 = vrot.slane %v1033_v0, 1  ;;  %v1377_v45 = vrot.slane %v13085_v16, 2  ;;  %v13113_v0 = vmul.f32 %v10091_v31, %v13800_v40  ;;  %v1380_v24 = vrot.slane %v13096_v26, 2  ;;  %v13817_v26 = vld [vmem:[#allocation42_spill] sm:$0xff] }
 0x742   : > { %v1385_v16 = vrot.slane %v1355_v19, 2  ;;  %v13818_v40 = vld [vmem:[#allocation58_spill] sm:$0xff] }
 0x744   : > { %v8299_v14 = vpop.f32.mrb[30].mxu1 }
 0x745   : > { %v8226_v15 = vpop.f32.mrb[30].mxu0  ;;  %v9792_v37 = vpop.f32.mrb[31].mxu1  ;;  %9808 = vmatprep.subr.mxu1 %v8299_v14 }
 0x746   : > { %v9787_v5 = vpop.f32.mrb[31].mxu0  ;;  %9803 = vmatprep.subr.mxu0 %v8226_v15  ;;  %9809 = vmatpush3.msra.mxu1 %v8299_v14  ;;  %v1053_v14 = vsel %vm1050_vm3, %v1051_v58, %v1052_v13  ;;  %v13090_v37 = vmul.f32 %v10085_v43, %v13798_v17  ;;  %v1373_v43 = vrot.slane %v13078_v61, 2  ;;  %v13807_v58 = vld [vmem:[#allocation33_spill] sm:$0xff] }
 0x747   : > { %9804 = vmatpush3.msra.mxu0 %v8226_v15  ;;  %9811 = vmatmul.mubr.msk.f32.vlgmr.msra.gmra.mrb[34].mxu1 %vm7134_vm10, %v7133_v9  ;;  %v1055_v15 = vsel %vm1050_vm3, %v1052_v13, %v1054_v3  ;;  %v1058_v5 = vsel %vm1050_vm3, %v1056_v51, %v1057_v4  ;;  %v1356_v11 = vmul.f32 %v10093_v18, %v13807_v58  ;;  %v13808_v3 = vld [vmem:[#allocation36_spill] sm:$0xff]  ;;  %v13809_v51 = vld [vmem:[#allocation55_spill] sm:$0xff] }
 0x748   : > { %9806 = vmatmul.mubr.msk.f32.vlgmr.msra.gmra.mrb[34].mxu0 %vm7134_vm10, %v7133_v9  ;;  %9813 = vmatprep.subr.mxu0 %v7496_v59  ;;  %v13081_v9 = vmul.f32 %v10088_v38, %v13797_v1  ;;  %v899_v38 = vadd.f32 %v13799_v41, %v815_v46  ;;  %v1378_v63 = vrot.slane %v13090_v37, 2  ;;  %v982_v46 = vadd.f32 %v13805_v29, %v898_v34  ;;  %v13816_v37 = vld [vmem:[#allocation57_spill] sm:$0xff]  ;;  %v13820_v34 = vld [vmem:[#allocation59_spill] sm:$0xff] }
 0x749   : > { %9818 = vmatprep.subr.mxu1 %v7569_v60  ;;  %9814 = vmatpush3.msra.mxu0 %v7496_v59  ;;  %v1066_v59 = vrot.slane %v1035_v27, 1  ;;  %v13804_v27 = vld [vmem:[#allocation38_spill] sm:$0xff]  ;;  %v1357_v13 = vmul.f32 %v10094_v39, %v13807_v58  ;;  %v903_v31 = vadd.f32 %v13808_v3, %v819_v52  ;;  %v13815_v52 = vld [vmem:[#allocation41_spill] sm:$0xff] }
 0x74a   : > { %9819 = vmatpush3.msra.mxu1 %v7569_v60  ;;  %9823 = vmatprep.subr.mxu0 %v7642_v10  ;;  %v1064_v60 = vrot.slane %v1034_v36, 1  ;;  %v1375_v2 = vrot.slane %v13081_v9, 2  ;;  %v13803_v36 = vld [vmem:[#allocation51_spill] sm:$0xff]  ;;  %v983_v12 = vadd.f32 %v13804_v27, %v899_v38  ;;  %v1079_v9 = vadd.f32 %v1053_v14, %v982_v46  ;;  %v13827_v3 = vld [vmem:[#allocation45_spill] sm:$0xff] }
 0x74b   : > { %9828 = vmatprep.subr.mxu1 %v7715_v20  ;;  %9815 = vmatprep.mubr.msk.f32.mxu0 %vm7134_vm10, %v7130_v21  ;;  %v1068_v6 = vsel %vm1050_vm3, %v1066_v59, %v1067_v49  ;;  %v900_v7 = vadd.f32 %v13803_v36, %v13054_v55  ;;  %v1382_v55 = vrot.slane %v13107_v47, 2  ;;  %v1383_v59 = vrot.slane %v13113_v0, 2  ;;  %v13812_v49 = vld [vmem:[#allocation53_spill] sm:$0xff]  ;;  %v13819_v47 = vld [vmem:[#allocation43_spill] sm:$0xff]  ;;  %v13821_v0 = vld [vmem:[#allocation46_spill] sm:$0xff] }
 0x74c   : > { %9820 = vmatprep.mubr.msk.f32.mxu1 %vm7134_vm10, %v7130_v21  ;;  %9816 = vmatmul.mubr.msk.f32.vlgmr.msra.gmra.mrb[32].mxu0 %vm7134_vm10, %v7131_v25  ;;  %v1065_v62 = vsel %vm1050_vm3, %v1062_v44, %v1064_v60  ;;  %v13811_v60 = vld [vmem:[#allocation37_spill] sm:$0xff]  ;;  %v1080_v1 = vadd.f32 %v1055_v15, %v983_v12  ;;  %v1388_v38 = vrot.slane %v1357_v13, 2  ;;  %v13823_v12 = vld [vmem:[#allocation47_spill] sm:$0xff] }
 0x74d   : > { %9821 = vmatmul.mubr.msk.f32.vlgmr.msra.gmra.mrb[32].mxu1 %vm7134_vm10, %v7131_v25  ;;  %9824 = vmatpush3.msra.mxu0 %v7642_v10 }
 0x74e   : > { %9829 = vmatpush3.msra.mxu1 %v7715_v20  ;;  %9825 = vmatprep.mubr.msk.f32.mxu0 %vm7134_vm10, %v7130_v21  ;;  %v13796_v20 = vld [vmem:[#allocation25_spill] sm:$0xff] }
 0x74f   : > { %9830 = vmatprep.mubr.msk.f32.mxu1 %vm7134_vm10, %v7130_v21  ;;  %v820_v10 = vmul.f32 %v10093_v18, %v13796_v20  ;;  %v821_v54 = vmul.f32 %v10094_v39, %v13796_v20  ;;  %v1060_v21 = vsel %vm1050_vm3, %v1057_v4, %v1059_v57  ;;  %v984_v4 = vadd.f32 %v13809_v51, %v900_v7  ;;  %v13813_v20 = vld [vmem:[#allocation40_spill] sm:$0xff]  ;;  %v13822_v7 = vld [vmem:[#allocation62_spill] sm:$0xff] }
 0x750   : > { %9826 = vmatmul.mubr.msk.f32.vlgmr.msra.gmra.mrb[34].mxu0 %vm7134_vm10, %v7131_v25  ;;  %v1358_v57 = vmul.f32 %v10095_v28, %v13807_v58  ;;  %v987_v18 = vadd.f32 %v13813_v20, %v903_v31  ;;  %v13814_v39 = vld [vmem:[#allocation56_spill] sm:$0xff]  ;;  %v1082_v17 = vadd.f32 %v1060_v21, %v985_v35  ;;  %v1374_v58 = vsel %vm1371_vm6, %v1372_v42, %v1373_v43  ;;  %v13828_v31 = vld [vmem:[#allocation61_spill] sm:$0xff] }
 0x751   : > { %9831 = vmatmul.mubr.msk.f32.vlgmr.msra.gmra.mrb[34].mxu1 %vm7134_vm10, %v7131_v25  ;;  %v1063_v25 = vsel %vm1050_vm3, %v1061_v30, %v1062_v44  ;;  %v13810_v30 = vld [vmem:[#allocation52_spill] sm:$0xff]  ;;  %v905_v23 = vadd.f32 %v13811_v60, %v821_v54  ;;  %v904_v56 = vadd.f32 %v13812_v49, %v820_v10  ;;  %v1081_v41 = vadd.f32 %v1058_v5, %v984_v4  ;;  %v13831_v60 = vld [vmem:[#allocation49_spill] sm:$0xff] }
 0x752   : > { %v902_v44 = vadd.f32 %v13810_v30, %v818_v50  ;;  %v1192_v50 = vadd.f32 %v13817_v26, %v1080_v1  ;;  %v1387_v54 = vrot.slane %v1356_v11, 2  ;;  %v1191_v10 = vadd.f32 %v13818_v40, %v1079_v9  ;;  %v13824_v5 = vld [vmem:[#allocation44_spill] sm:$0xff]  ;;  %v13832_v20 = vld [vmem:[#allocation65_spill] sm:$0xff]  ;;  %v13838_v40 = vld [vmem:[#allocation74_spill] sm:$0xff] }
 0x753   : > { %v989_v61 = vadd.f32 %v13815_v52, %v905_v23  ;;  %v988_v28 = vadd.f32 %v13816_v37, %v904_v56  ;;  %v1194_v32 = vadd.f32 %v13819_v47, %v1082_v17  ;;  %v1390_v15 = vrot.slane %v1358_v57, 2  ;;  %v13826_v11 = vld [vmem:[#allocation60_spill] sm:$0xff]  ;;  %v13835_v52 = vld [vmem:[#allocation69_spill] sm:$0xff] }
 0x754   : > { %v986_v48 = vadd.f32 %v13814_v39, %v902_v44  ;;  %v1193_v33 = vadd.f32 %v13820_v34, %v1081_v41  ;;  %v1084_v22 = vadd.f32 %v1065_v62, %v987_v18  ;;  %v1304_v14 = vadd.f32 %v13821_v0, %v1192_v50  ;;  %v13829_v4 = vld [vmem:[#allocation48_spill] sm:$0xff]  ;;  %v13833_v39 = vld [vmem:[#allocation67_spill] sm:$0xff]  ;;  %v13839_v47 = vld [vmem:[#allocation77_spill] sm:$0xff] }
 0x755   : > { %v1086_v36 = vadd.f32 %v1070_v8, %v989_v61  ;;  %v1303_v27 = vadd.f32 %v13822_v7, %v1191_v10  ;;  %v1306_v19 = vadd.f32 %v13823_v12, %v1194_v32  ;;  %v1085_v46 = vadd.f32 %v1068_v6, %v988_v28  ;;  %v13830_v44 = vld [vmem:[#allocation64_spill] sm:$0xff]  ;;  %v13840_v34 = vld [vmem:[#allocation71_spill] sm:$0xff] }
 0x756   : > { %v1083_v21 = vadd.f32 %v1063_v25, %v986_v48  ;;  %v1196_v29 = vadd.f32 %v13824_v5, %v1084_v22  ;;  %v1305_v35 = vadd.f32 %v13825_v53, %v1193_v33  ;;  %v1379_v25 = vsel %vm1371_vm6, %v1377_v45, %v1378_v63  ;;  %v13836_v9 = vld [vmem:[#allocation68_spill] sm:$0xff]  ;;  %v13845_v7 = vld [vmem:[#allocation83_spill] sm:$0xff]  ;;  %v13848_v53 = vld [vmem:[#allocation86_spill] sm:$0xff] }
 0x757   : > { %v1198_v62 = vadd.f32 %v13827_v3, %v1086_v36  ;;  %v1376_v8 = vsel %vm1371_vm6, %v1373_v43, %v1375_v2  ;;  %v1197_v51 = vadd.f32 %v13828_v31, %v1085_v46  ;;  %v1381_v30 = vsel %vm1371_vm6, %v1378_v63, %v1380_v24  ;;  %v13834_v2 = vld [vmem:[#allocation66_spill] sm:$0xff]  ;;  %v13841_v0 = vld [vmem:[#allocation76_spill] sm:$0xff]  ;;  %v13844_v36 = vld [vmem:[#allocation73_spill] sm:$0xff] }
 0x758   : > { %v1195_v13 = vadd.f32 %v13826_v11, %v1083_v21  ;;  %v1308_v57 = vadd.f32 %v13829_v4, %v1196_v29  ;;  %v1401_v6 = vadd.f32 %v1376_v8, %v1304_v14  ;;  %v1400_v49 = vadd.f32 %v1374_v58, %v1303_v27  ;;  %v13843_v14 = vld [vmem:[#allocation70_spill] sm:$0xff]  ;;  %v13846_v12 = vld [vmem:[#allocation72_spill] sm:$0xff]  ;;  %v13847_v5 = vld [vmem:[#allocation79_spill] sm:$0xff] }
 0x759   : > { %v1310_v23 = vadd.f32 %v13831_v60, %v1198_v62  ;;  %v1403_v56 = vadd.f32 %v1381_v30, %v1306_v19  ;;  %v1309_v18 = vadd.f32 %v13832_v20, %v1197_v51  ;;  %v1402_v1 = vadd.f32 %v1379_v25, %v1305_v35  ;;  %v13849_v58 = vld [vmem:[#allocation78_spill] sm:$0xff]  ;;  %v13852_v25 = vld [vmem:[#allocation87_spill] sm:$0xff]  ;;  %v13853_v51 = vld [vmem:[#allocation80_spill] sm:$0xff] }
 0x75a   : > { %v1307_v42 = vadd.f32 %v13830_v44, %v1195_v13  ;;  %v1384_v45 = vsel %vm1371_vm6, %v1382_v55, %v1383_v59  ;;  %v1513_v43 = vadd.f32 %v13833_v39, %v1401_v6  ;;  %v1512_v48 = vadd.f32 %v13834_v2, %v1400_v49  ;;  %v13837_v55 = vld [vmem:[#allocation75_spill] sm:$0xff]  ;;  %v13850_v13 = vld [vmem:[#allocation81_spill] sm:$0xff] }
 0x75b   : > { %v1515_v63 = vadd.f32 %v13835_v52, %v1403_v56  ;;  %v1386_v24 = vsel %vm1371_vm6, %v1383_v59, %v1385_v16  ;;  %v1389_v61 = vsel %vm1371_vm6, %v1387_v54, %v1388_v38  ;;  %v1514_v17 = vadd.f32 %v13836_v9, %v1402_v1  ;;  %v13842_v16 = vld [vmem:[#allocation82_spill] sm:$0xff]  ;;  %v13855_v49 = vld [vmem:[#allocation85_spill] sm:$0xff] }
 0x75c   : > { %v1405_v37 = vadd.f32 %v1386_v24, %v1308_v57  ;;  %v1391_v28 = vsel %vm1371_vm6, %v1388_v38, %v1390_v15  ;;  %v1625_v26 = vadd.f32 %v13837_v55, %v1513_v43  ;;  %v1404_v50 = vadd.f32 %v1384_v45, %v1307_v42  ;;  %v13854_v57 = vld [vmem:[#allocation84_spill] sm:$0xff]  ;;  %v13857_v52 = vld [vmem:[#allocation89_spill] sm:$0xff] }
 0x75d   : > { %v1407_v41 = vadd.f32 %v1391_v28, %v1310_v23  ;;  %v1624_v10 = vadd.f32 %v13838_v40, %v1512_v48  ;;  %v1627_v32 = vadd.f32 %v13839_v47, %v1515_v63  ;;  %v1406_v22 = vadd.f32 %v1389_v61, %v1309_v18  ;;  %v13856_v43 = vld [vmem:[#allocation88_spill] sm:$0xff] }
 0x75e   : > { %v1517_v33 = vadd.f32 %v13840_v34, %v1405_v37  ;;  %v1626_v59 = vadd.f32 %v13841_v0, %v1514_v17  ;;  %v1673_v54 = vadd.f32 %v13842_v16, %v1625_v26  ;;  %v1516_v21 = vadd.f32 %v13843_v14, %v1404_v50 }
 0x75f   : > { %v1519_v38 = vadd.f32 %v13844_v36, %v1407_v41  ;;  %v1672_v15 = vadd.f32 %v13842_v16, %v1624_v10  ;;  %v1675_v27 = vadd.f32 %v13845_v7, %v1627_v32  ;;  %v1518_v19 = vadd.f32 %v13846_v12, %v1406_v22 }
 0x760   : > { %v1629_v29 = vadd.f32 %v13847_v5, %v1517_v33  ;;  %v1674_v46 = vadd.f32 %v13845_v7, %v1626_v59  ;;  %v1721_v35 = vmul.f32 %v13848_v53, %v1673_v54  ;;  %v1628_v11 = vadd.f32 %v13849_v58, %v1516_v21 }
 0x761   : > { %v1631_v3 = vadd.f32 %v13850_v13, %v1519_v38  ;;  %v1723_v8 = vmul.f32 %v13852_v25, %v1675_v27  ;;  %v1720_v31 = vmul.f32 %v13848_v53, %v1672_v15  ;;  %v1630_v4 = vadd.f32 %v13853_v51, %v1518_v19 }
 0x762   : > { %v1677_v6 = vadd.f32 %v13854_v57, %v1629_v29  ;;  %v1722_v60 = vmul.f32 %v13852_v25, %v1674_v46  ;;  %v1676_v23 = vadd.f32 %v13854_v57, %v1628_v11 }
 0x763   : > { %v1679_v56 = vadd.f32 %v13855_v49, %v1631_v3  ;;  %v1678_v45 = vadd.f32 %v13855_v49, %v1630_v4 }
 0x764   : > { %v1725_v2 = vmul.f32 %v13856_v43, %v1677_v6  ;;  %v1724_v24 = vmul.f32 %v13856_v43, %v1676_v23 }
 0x765   : > { %v1727_v63 = vmul.f32 %v13857_v52, %v1679_v56  ;;  %v1726_v37 = vmul.f32 %v13857_v52, %v1678_v45 }
 0x81f   : > { %v9817_v62 = vpop.f32.mrb[32].mxu0 }
 0x820   : > { %v8916_v30 = vadd.f32 %v9817_v62, %v1721_v35  ;;  %v9822_v44 = vpop.f32.mrb[32].mxu1  ;;  %v8681_v42 = vpop.f32.mrb[33].mxu0 }
 0x821   : > { %v8918_v20 = vadd.f32 %v9822_v44, %v1723_v8  ;;  %v8915_v18 = vadd.f32 %v8681_v42, %v1720_v31  ;;  %v8756_v1 = vpop.f32.mrb[33].mxu1 }
 0x822   : > { %8924 = vst.msk [vmem:[%s13190_s16 + $0x8] sm:$0xff] %vm1734_vm4, %v8916_v30  ;;  %v8917_v39 = vadd.f32 %v8756_v1, %v1722_v60 }
 0x823   : > { %8926 = vst.msk [vmem:[%s13190_s16 + $0x18] sm:$0xff] %vm1734_vm4, %v8918_v20  ;;  %8923 = vst.msk [vmem:[%s13190_s16] sm:$0xff] %vm1734_vm4, %v8915_v18  ;;  %v9827_v48 = vpop.f32.mrb[34].mxu0 }
 0x824   : > { %8925 = vst.msk [vmem:[%s13190_s16 + $0x10] sm:$0xff] %vm1734_vm4, %v8917_v39  ;;  %v8920_v61 = vadd.f32 %v9827_v48, %v1725_v2  ;;  %v9832_v9 = vpop.f32.mrb[34].mxu1  ;;  %v8831_v17 = vpop.f32.mrb[35].mxu0 }
 0x825   : > { %v8922_v28 = vadd.f32 %v9832_v9, %v1727_v63  ;;  %v8919_v55 = vadd.f32 %v8831_v17, %v1724_v24  ;;  %v8906_v26 = vpop.f32.mrb[35].mxu1 }
 0x826   : > { %8928 = vst.msk [vmem:[%s13190_s16 + $0x28] sm:$0xff] %vm1734_vm4, %v8920_v61  ;;  %v8921_v50 = vadd.f32 %v8906_v26, %v1726_v37 }
 0x827   : > { %8930 = vst.msk [vmem:[%s13190_s16 + $0x38] sm:$0xff] %vm1734_vm4, %v8922_v28  ;;  %8927 = vst.msk [vmem:[%s13190_s16 + $0x20] sm:$0xff] %vm1734_vm4, %v8919_v55 }
 0x828   : > { %8929 = vst.msk [vmem:[%s13190_s16 + $0x30] sm:$0xff] %vm1734_vm4, %v8921_v50 }
 0x829 PF: > { %p31_p10 = scmp.ge.s32.totalorder %s10690_s18, 4   ;;  %s13858_s24 = smov %s10364_s25 }
 0x82a   : > { %s13859_s25 = smov %s10368_s26  ;;  %s13860_s26 = smov %s10701_s17 }
 0x82b   : > { %s13861_s27 = smov %s10690_s18  ;;  %33 = sbr.rel (!%p31_p10) target bundleno = 19 (0x13), region = 156 }
 0x832   :  { %8952 = vsyncpa [#allocation5], 1 }
 0x833   :  { %8954 = vsyncpa [#allocation5 + $0x1], 1 }
 0x834   :  { %8955 = vsyncpa [#allocation7], 1 }
 0x835   :  { %8956 = vsyncpa [#allocation10], 1 }
 0x836   :  { %8957 = vsyncpa [#allocation13], 1 }
 0x837   :  { %8958 = vsyncpa [#allocation16], 1 }

</bundles_post_ra>
